<compile_context>
chip_gen: v7x
topology: tpu7x:2x2x1
jax: 0.10.0
libtpu: 0.0.40
codegen_flags: <defaults>
</compile_context>

<pallas_src>
import functools

import jax
import jax.numpy as jnp
import numpy as np
from jax import lax
from jax.experimental import pallas as pl
from jax.experimental.pallas import tpu as pltpu

EPS = 1e-5


# ------------------------------ fused forward --------------------------------


def bottleneck_forward(x_nchw, params, *, out_dtype=jnp.float32):
    N, Cin, H, W = x_nchw.shape
    w1 = params["w1"]      # (Cin, width)        bf16, BN1 scale folded
    w2 = params["w2"]      # (9, width, width)   bf16, BN2 scale folded, tap-major
    w3 = params["w3"]      # (width, Cout)       bf16, BN3 scale folded
    b1 = params["b1"]      # (1, width)  f32
    b2 = params["b2"]      # (1, width)  f32
    b3 = params["b3"]      # (1, Cout)   f32
    width = w1.shape[1]
    Cout = w3.shape[1]
    assert Cin == Cout, "downsample is None => inplanes must equal planes*4"

    Hp, Wp = H + 2, W + 2          # padded h1 spatial extent (VMEM only)
    M = H * W                      # matmul M dimension (whole image)

    # Single boundary layout pass: NCHW -> NHWC, flatten spatial, cast bf16.
    # No HBM padding, no overlapping halo tiles.
    x_flat = (jnp.transpose(x_nchw, (0, 2, 3, 1))
              .reshape(N, M, Cin).astype(jnp.bfloat16))

    def kernel(x_ref, w1_ref, b1_ref, w2_ref, b2_ref, w3_ref, b3_ref,
               o_ref, h1_scr):
        xt = x_ref[0]                                          # (M, Cin) bf16

        # ---- conv1 (1x1, BN1 scale pre-folded) + bias + ReLU ------------------
        h1 = jnp.dot(xt, w1_ref[...], preferred_element_type=jnp.float32)
        h1 = jnp.maximum(h1 + b1_ref[...], 0.0)                # (M, width) f32

        # conv2 zero-pads conv1's *output*: place h1 in the interior of a
        # zeroed (Hp, Wp, width) bf16 scratch.  (Only the 1-px border really
        # needs the zeroing; full-zero keeps each grid step self-contained and
        # megacore-safe.)
        h1_scr[...] = jnp.zeros_like(h1_scr)
        h1_scr[1:H + 1, 1:W + 1, :] = (
            h1.reshape(H, W, width).astype(jnp.bfloat16))

        # ---- conv2 (3x3, BN2 scale pre-folded): 9 accumulated MXU pushes ------
        h2 = jnp.dot(h1_scr[0:H, 0:W, :].reshape(M, width), w2_ref[0],
                     preferred_element_type=jnp.float32)
        for k in range(1, 9):                       # static, fully unrolled
            ky, kx = divmod(k, 3)
            tap = h1_scr[ky:ky + H, kx:kx + W, :].reshape(M, width)
            h2 = h2 + jnp.dot(tap, w2_ref[k],
                              preferred_element_type=jnp.float32)
        h2 = jnp.maximum(h2 + b2_ref[...], 0.0)

        # ---- conv3 (1x1, BN3 scale pre-folded) + bias + residual + ReLU -------
        o = jnp.dot(h2.astype(jnp.bfloat16), w3_ref[...],
                    preferred_element_type=jnp.float32)
        o = o + b3_ref[...] + xt.astype(jnp.float32)
        o_ref[0] = jnp.maximum(o, 0.0).astype(o_ref.dtype)

    # Advisory cost estimate (fused block).
    flops = 2 * N * M * (Cin * width + 9 * width * width + width * Cout)
    itemsize_out = jnp.dtype(out_dtype).itemsize
    w_bytes = int((w1.size + w2.size + w3.size) * 2
                  + (b1.size + b2.size + b3.size) * 4)
    bytes_accessed = int(x_flat.size * 2 + N * M * Cout * itemsize_out + w_bytes)
    cost = pl.CostEstimate(flops=int(flops), transcendentals=0,
                           bytes_accessed=bytes_accessed)

    # Right-sized VMEM budget: double-buffered activation blocks + weights
    # (+ their buffers) + the h1 scratch + compiler slack.
    in_blk = M * Cin * 2
    out_blk = M * Cout * itemsize_out
    scr_bytes = Hp * Wp * width * 2
    vmem_limit = int(min(64 * 1024 * 1024,
                         2 * (in_blk + out_blk) + 2 * w_bytes + scr_bytes
                         + 16 * 1024 * 1024))

    out = pl.pallas_call(
        kernel,
        out_shape=jax.ShapeDtypeStruct((N, M, Cout), out_dtype),
        grid_spec=pltpu.PrefetchScalarGridSpec(
            num_scalar_prefetch=0,
            grid=(N,),
            in_specs=[
                pl.BlockSpec((1, M, Cin), lambda n: (n, 0, 0)),
                pl.BlockSpec((Cin, width), lambda n: (0, 0)),
                pl.BlockSpec((1, width), lambda n: (0, 0)),
                pl.BlockSpec((9, width, width), lambda n: (0, 0, 0)),
                pl.BlockSpec((1, width), lambda n: (0, 0)),
                pl.BlockSpec((width, Cout), lambda n: (0, 0)),
                pl.BlockSpec((1, Cout), lambda n: (0, 0)),
            ],
            out_specs=pl.BlockSpec((1, M, Cout), lambda n: (n, 0, 0)),
            scratch_shapes=[pltpu.VMEM((Hp, Wp, width), jnp.bfloat16)],
        ),
        compiler_params=pltpu.CompilerParams(
            dimension_semantics=("parallel",),
            vmem_limit_bytes=vmem_limit,
        ),
        cost_estimate=cost,
    )(x_flat, w1, b1, w2, b2, w3, b3)

    out_nhwc = out.reshape(N, H, W, Cout).astype(jnp.float32)
    return jnp.transpose(out_nhwc, (0, 3, 1, 2))


# --------------------------- pure-JAX f32 reference ---------------------------


def reference_forward(x, conv1_w, conv2_w, conv3_w, bns):
    def bn(y, gamma, beta, mean, var):
        inv = gamma / jnp.sqrt(var + EPS)
        return ((y - mean[None, :, None, None]) * inv[None, :, None, None]
                + beta[None, :, None, None])

    dn = ("NCHW", "OIHW", "NCHW")
    out = lax.conv_general_dilated(x, conv1_w, (1, 1), "VALID",
                                   dimension_numbers=dn)
    out = jnp.maximum(bn(out, *bns[0]), 0.0)
    out = lax.conv_general_dilated(out, conv2_w, (1, 1), ((1, 1), (1, 1)),
                                   dimension_numbers=dn)
    out = jnp.maximum(bn(out, *bns[1]), 0.0)
    out = lax.conv_general_dilated(out, conv3_w, (1, 1), "VALID",
                                   dimension_numbers=dn)
    out = bn(out, *bns[2])
    return jnp.maximum(out + x, 0.0)


# ------------------------------------ main ------------------------------------


if __name__ == "__main__":
    key = jax.random.PRNGKey(0)
    N, H, W = 2, 16, 16
    planes = 4
    inplanes = planes * 4              # identity add valid without downsample
    groups, base_width = 1, 64
    width = int(planes * (base_width / 64.0)) * groups   # 4
    Cout = planes * 4                                    # 16

    keys = jax.random.split(key, 16)
    x = jax.random.normal(keys[0], (N, inplanes, H, W), jnp.float32)

    conv1_w = jax.random.normal(keys[1], (width, inplanes, 1, 1), jnp.float32) * 0.2
    conv2_w = jax.random.normal(keys[2], (width, width, 3, 3), jnp.float32) * 0.2
    conv3_w = jax.random.normal(keys[3], (Cout, width, 1, 1), jnp.float32) * 0.2

    def bn_init(kg, kb, km, kv, c):
        gamma = jax.random.uniform(kg, (c,), jnp.float32, 0.5, 1.5)
        beta = jax.random.normal(kb, (c,), jnp.float32) * 0.1
        mean = jax.random.normal(km, (c,), jnp.float32) * 0.1
        var = jax.random.uniform(kv, (c,), jnp.float32, 0.5, 1.5)
        return gamma, beta, mean, var

    bn1 = bn_init(keys[4], keys[5], keys[6], keys[7], width)
    bn2 = bn_init(keys[8], keys[9], keys[10], keys[11], width)
    bn3 = bn_init(keys[12], keys[13], keys[14], keys[15], Cout)

    def fold(gamma, beta, mean, var):
        s = gamma / jnp.sqrt(var + EPS)
        b = beta - mean * s
        return s[None, :], b[None, :]

    s1, b1 = fold(*bn1)
    s2, b2 = fold(*bn2)
    s3, b3 = fold(*bn3)

    # Offline parameter preprocessing: fold BN scales into the conv weights,
    # leave only biases for the in-kernel epilogues.
    w1 = (conv1_w[:, :, 0, 0].T * s1).astype(jnp.bfloat16)           # (Cin, width)
    w2 = (jnp.stack([conv2_w[:, :, ky, kx].T
                     for ky in range(3) for kx in range(3)], axis=0)
          * s2).astype(jnp.bfloat16)                                  # (9, w, w)
    w3 = (conv3_w[:, :, 0, 0].T * s3).astype(jnp.bfloat16)            # (width, Cout)

    params = dict(w1=w1, w2=w2, w3=w3, b1=b1, b2=b2, b3=b3)

    fwd = jax.jit(functools.partial(bottleneck_forward, out_dtype=jnp.float32))
    out = jax.block_until_ready(fwd(x, params))

    ref = reference_forward(x, conv1_w, conv2_w, conv3_w, (bn1, bn2, bn3))
    # bf16 matmul operands / bf16 skip-add (f32 accumulation) => loose tolerance.
    np.testing.assert_allclose(np.asarray(out), np.asarray(ref),
                               rtol=5e-2, atol=5e-2)
    print("KERNEL_OK")
</pallas_src>

<mosaic_0001>
module attributes {stable_mosaic.version = 11 : i64} {
  func.func @kernel(%arg0: i32, %arg1: memref<1x256x16xbf16, #tpu.memory_space<vmem>>, %arg2: memref<16x4xbf16, #tpu.memory_space<vmem>>, %arg3: memref<1x4xf32, #tpu.memory_space<vmem>>, %arg4: memref<9x4x4xbf16, #tpu.memory_space<vmem>>, %arg5: memref<1x4xf32, #tpu.memory_space<vmem>>, %arg6: memref<4x16xbf16, #tpu.memory_space<vmem>>, %arg7: memref<1x16xf32, #tpu.memory_space<vmem>>, %arg8: memref<1x256x16xf32, #tpu.memory_space<vmem>>, %arg9: memref<18x18x4xbf16, #tpu.memory_space<vmem>>) attributes {dimension_semantics = [#tpu.dimension_semantics<parallel>], iteration_bounds = array<i64: 2>, scalar_prefetch = 0 : i64, scratch_operands = 1 : i64, tpu.core_type = #tpu.core_type<tc>, window_params = [{transform_indices = @transform_0, window_bounds = array<i64: 1, 256, 16>}, {pipeline_mode = #tpu.pipeline_mode<synchronous>, transform_indices = @transform_1, window_bounds = array<i64: 16, 4>}, {pipeline_mode = #tpu.pipeline_mode<synchronous>, transform_indices = @transform_2, window_bounds = array<i64: 1, 4>}, {pipeline_mode = #tpu.pipeline_mode<synchronous>, transform_indices = @transform_3, window_bounds = array<i64: 9, 4, 4>}, {pipeline_mode = #tpu.pipeline_mode<synchronous>, transform_indices = @transform_4, window_bounds = array<i64: 1, 4>}, {pipeline_mode = #tpu.pipeline_mode<synchronous>, transform_indices = @transform_5, window_bounds = array<i64: 4, 16>}, {pipeline_mode = #tpu.pipeline_mode<synchronous>, transform_indices = @transform_6, window_bounds = array<i64: 1, 16>}, {transform_indices = @transform_7, window_bounds = array<i64: 1, 256, 16>}]} {
    %c0 = arith.constant 0 : index
    %c0_0 = arith.constant 0 : index
    %c0_1 = arith.constant 0 : index
    %0 = vector.load %arg1[%c0, %c0_0, %c0_1] : memref<1x256x16xbf16, #tpu.memory_space<vmem>>, vector<1x256x16xbf16>
    %1 = vector.shape_cast %0 : vector<1x256x16xbf16> to vector<256x16xbf16>
    %c0_2 = arith.constant 0 : index
    %c0_3 = arith.constant 0 : index
    %2 = vector.load %arg2[%c0_2, %c0_3] : memref<16x4xbf16, #tpu.memory_space<vmem>>, vector<16x4xbf16>
    %cst = arith.constant dense<0.000000e+00> : vector<256x4xf32>
    %3 = tpu.matmul %1, %2, %cst {dimension_numbers = #tpu.dot_dimension_numbers<[1], [0], [0], [1], [0, 0, 1, 1], [], []>} : vector<256x16xbf16>, vector<16x4xbf16>, vector<256x4xf32> -> vector<256x4xf32>
    %c0_4 = arith.constant 0 : index
    %c0_5 = arith.constant 0 : index
    %4 = vector.load %arg3[%c0_4, %c0_5] : memref<1x4xf32, #tpu.memory_space<vmem>>, vector<1x4xf32>
    %5 = vector.broadcast %4 : vector<1x4xf32> to vector<256x4xf32>
    %6 = arith.addf %3, %5 : vector<256x4xf32>
    %cst_6 = arith.constant 0.000000e+00 : f32
    %7 = vector.broadcast %cst_6 : f32 to vector<256x4xf32>
    %8 = arith.maximumf %6, %7 : vector<256x4xf32>
    %cst_7 = arith.constant 0.000000e+00 : bf16
    %9 = vector.broadcast %cst_7 : bf16 to vector<18x18x4xbf16>
    %c0_8 = arith.constant 0 : index
    %c0_9 = arith.constant 0 : index
    %c0_10 = arith.constant 0 : index
    %10 = vector.load %arg9[%c0_8, %c0_9, %c0_10] : memref<18x18x4xbf16, #tpu.memory_space<vmem>>, vector<18x18x4xbf16>
    tpu.vector_store %arg9[%c0_8, %c0_9, %c0_10], %9 {strides = array<i32>} : memref<18x18x4xbf16, #tpu.memory_space<vmem>>, vector<18x18x4xbf16>,
    %11 = vector.shape_cast %8 : vector<256x4xf32> to vector<16x16x4xf32>
    %12 = arith.truncf %11 : vector<16x16x4xf32> to vector<16x16x4xbf16>
    %c1 = arith.constant 1 : index
    %c1_11 = arith.constant 1 : index
    %c0_12 = arith.constant 0 : index
    %13 = vector.load %arg9[%c1, %c1_11, %c0_12] : memref<18x18x4xbf16, #tpu.memory_space<vmem>>, vector<16x16x4xbf16>
    tpu.vector_store %arg9[%c1, %c1_11, %c0_12], %12 {strides = array<i32>} : memref<18x18x4xbf16, #tpu.memory_space<vmem>>, vector<16x16x4xbf16>,
    %c0_13 = arith.constant 0 : index
    %c0_14 = arith.constant 0 : index
    %c0_15 = arith.constant 0 : index
    %14 = vector.load %arg9[%c0_13, %c0_14, %c0_15] : memref<18x18x4xbf16, #tpu.memory_space<vmem>>, vector<16x16x4xbf16>
    %15 = vector.shape_cast %14 : vector<16x16x4xbf16> to vector<256x4xbf16>
    %c0_16 = arith.constant 0 : index
    %c0_17 = arith.constant 0 : index
    %c0_18 = arith.constant 0 : index
    %16 = vector.load %arg4[%c0_16, %c0_17, %c0_18] : memref<9x4x4xbf16, #tpu.memory_space<vmem>>, vector<1x4x4xbf16>
    %17 = vector.shape_cast %16 : vector<1x4x4xbf16> to vector<4x4xbf16>
    %cst_19 = arith.constant dense<0.000000e+00> : vector<256x4xf32>
    %18 = tpu.matmul %15, %17, %cst_19 {dimension_numbers = #tpu.dot_dimension_numbers<[1], [0], [0], [1], [0, 0, 1, 1], [], []>} : vector<256x4xbf16>, vector<4x4xbf16>, vector<256x4xf32> -> vector<256x4xf32>
    %c0_20 = arith.constant 0 : index
    %c1_21 = arith.constant 1 : index
    %c0_22 = arith.constant 0 : index
    %19 = vector.load %arg9[%c0_20, %c1_21, %c0_22] : memref<18x18x4xbf16, #tpu.memory_space<vmem>>, vector<16x16x4xbf16>
    %20 = vector.shape_cast %19 : vector<16x16x4xbf16> to vector<256x4xbf16>
    %c1_23 = arith.constant 1 : index
    %c0_24 = arith.constant 0 : index
    %c0_25 = arith.constant 0 : index
    %21 = vector.load %arg4[%c1_23, %c0_24, %c0_25] : memref<9x4x4xbf16, #tpu.memory_space<vmem>>, vector<1x4x4xbf16>
    %22 = vector.shape_cast %21 : vector<1x4x4xbf16> to vector<4x4xbf16>
    %cst_26 = arith.constant dense<0.000000e+00> : vector<256x4xf32>
    %23 = tpu.matmul %20, %22, %cst_26 {dimension_numbers = #tpu.dot_dimension_numbers<[1], [0], [0], [1], [0, 0, 1, 1], [], []>} : vector<256x4xbf16>, vector<4x4xbf16>, vector<256x4xf32> -> vector<256x4xf32>
    %24 = arith.addf %18, %23 : vector<256x4xf32>
    %c0_27 = arith.constant 0 : index
    %c2 = arith.constant 2 : index
    %c0_28 = arith.constant 0 : index
    %25 = vector.load %arg9[%c0_27, %c2, %c0_28] : memref<18x18x4xbf16, #tpu.memory_space<vmem>>, vector<16x16x4xbf16>
    %26 = vector.shape_cast %25 : vector<16x16x4xbf16> to vector<256x4xbf16>
    %c2_29 = arith.constant 2 : index
    %c0_30 = arith.constant 0 : index
    %c0_31 = arith.constant 0 : index
    %27 = vector.load %arg4[%c2_29, %c0_30, %c0_31] : memref<9x4x4xbf16, #tpu.memory_space<vmem>>, vector<1x4x4xbf16>
    %28 = vector.shape_cast %27 : vector<1x4x4xbf16> to vector<4x4xbf16>
    %cst_32 = arith.constant dense<0.000000e+00> : vector<256x4xf32>
    %29 = tpu.matmul %26, %28, %cst_32 {dimension_numbers = #tpu.dot_dimension_numbers<[1], [0], [0], [1], [0, 0, 1, 1], [], []>} : vector<256x4xbf16>, vector<4x4xbf16>, vector<256x4xf32> -> vector<256x4xf32>
    %30 = arith.addf %24, %29 : vector<256x4xf32>
    %c1_33 = arith.constant 1 : index
    %c0_34 = arith.constant 0 : index
    %c0_35 = arith.constant 0 : index
    %31 = vector.load %arg9[%c1_33, %c0_34, %c0_35] : memref<18x18x4xbf16, #tpu.memory_space<vmem>>, vector<16x16x4xbf16>
    %32 = vector.shape_cast %31 : vector<16x16x4xbf16> to vector<256x4xbf16>
    %c3 = arith.constant 3 : index
    %c0_36 = arith.constant 0 : index
    %c0_37 = arith.constant 0 : index
    %33 = vector.load %arg4[%c3, %c0_36, %c0_37] : memref<9x4x4xbf16, #tpu.memory_space<vmem>>, vector<1x4x4xbf16>
    %34 = vector.shape_cast %33 : vector<1x4x4xbf16> to vector<4x4xbf16>
    %cst_38 = arith.constant dense<0.000000e+00> : vector<256x4xf32>
    %35 = tpu.matmul %32, %34, %cst_38 {dimension_numbers = #tpu.dot_dimension_numbers<[1], [0], [0], [1], [0, 0, 1, 1], [], []>} : vector<256x4xbf16>, vector<4x4xbf16>, vector<256x4xf32> -> vector<256x4xf32>
    %36 = arith.addf %30, %35 : vector<256x4xf32>
    %c1_39 = arith.constant 1 : index
    %c1_40 = arith.constant 1 : index
    %c0_41 = arith.constant 0 : index
    %37 = vector.load %arg9[%c1_39, %c1_40, %c0_41] : memref<18x18x4xbf16, #tpu.memory_space<vmem>>, vector<16x16x4xbf16>
    %38 = vector.shape_cast %37 : vector<16x16x4xbf16> to vector<256x4xbf16>
    %c4 = arith.constant 4 : index
    %c0_42 = arith.constant 0 : index
    %c0_43 = arith.constant 0 : index
    %39 = vector.load %arg4[%c4, %c0_42, %c0_43] : memref<9x4x4xbf16, #tpu.memory_space<vmem>>, vector<1x4x4xbf16>
    %40 = vector.shape_cast %39 : vector<1x4x4xbf16> to vector<4x4xbf16>
    %cst_44 = arith.constant dense<0.000000e+00> : vector<256x4xf32>
    %41 = tpu.matmul %38, %40, %cst_44 {dimension_numbers = #tpu.dot_dimension_numbers<[1], [0], [0], [1], [0, 0, 1, 1], [], []>} : vector<256x4xbf16>, vector<4x4xbf16>, vector<256x4xf32> -> vector<256x4xf32>
    %42 = arith.addf %36, %41 : vector<256x4xf32>
    %c1_45 = arith.constant 1 : index
    %c2_46 = arith.constant 2 : index
    %c0_47 = arith.constant 0 : index
    %43 = vector.load %arg9[%c1_45, %c2_46, %c0_47] : memref<18x18x4xbf16, #tpu.memory_space<vmem>>, vector<16x16x4xbf16>
    %44 = vector.shape_cast %43 : vector<16x16x4xbf16> to vector<256x4xbf16>
    %c5 = arith.constant 5 : index
    %c0_48 = arith.constant 0 : index
    %c0_49 = arith.constant 0 : index
    %45 = vector.load %arg4[%c5, %c0_48, %c0_49] : memref<9x4x4xbf16, #tpu.memory_space<vmem>>, vector<1x4x4xbf16>
    %46 = vector.shape_cast %45 : vector<1x4x4xbf16> to vector<4x4xbf16>
    %cst_50 = arith.constant dense<0.000000e+00> : vector<256x4xf32>
    %47 = tpu.matmul %44, %46, %cst_50 {dimension_numbers = #tpu.dot_dimension_numbers<[1], [0], [0], [1], [0, 0, 1, 1], [], []>} : vector<256x4xbf16>, vector<4x4xbf16>, vector<256x4xf32> -> vector<256x4xf32>
    %48 = arith.addf %42, %47 : vector<256x4xf32>
    %c2_51 = arith.constant 2 : index
    %c0_52 = arith.constant 0 : index
    %c0_53 = arith.constant 0 : index
    %49 = vector.load %arg9[%c2_51, %c0_52, %c0_53] : memref<18x18x4xbf16, #tpu.memory_space<vmem>>, vector<16x16x4xbf16>
    %50 = vector.shape_cast %49 : vector<16x16x4xbf16> to vector<256x4xbf16>
    %c6 = arith.constant 6 : index
    %c0_54 = arith.constant 0 : index
    %c0_55 = arith.constant 0 : index
    %51 = vector.load %arg4[%c6, %c0_54, %c0_55] : memref<9x4x4xbf16, #tpu.memory_space<vmem>>, vector<1x4x4xbf16>
    %52 = vector.shape_cast %51 : vector<1x4x4xbf16> to vector<4x4xbf16>
    %cst_56 = arith.constant dense<0.000000e+00> : vector<256x4xf32>
    %53 = tpu.matmul %50, %52, %cst_56 {dimension_numbers = #tpu.dot_dimension_numbers<[1], [0], [0], [1], [0, 0, 1, 1], [], []>} : vector<256x4xbf16>, vector<4x4xbf16>, vector<256x4xf32> -> vector<256x4xf32>
    %54 = arith.addf %48, %53 : vector<256x4xf32>
    %c2_57 = arith.constant 2 : index
    %c1_58 = arith.constant 1 : index
    %c0_59 = arith.constant 0 : index
    %55 = vector.load %arg9[%c2_57, %c1_58, %c0_59] : memref<18x18x4xbf16, #tpu.memory_space<vmem>>, vector<16x16x4xbf16>
    %56 = vector.shape_cast %55 : vector<16x16x4xbf16> to vector<256x4xbf16>
    %c7 = arith.constant 7 : index
    %c0_60 = arith.constant 0 : index
    %c0_61 = arith.constant 0 : index
    %57 = vector.load %arg4[%c7, %c0_60, %c0_61] : memref<9x4x4xbf16, #tpu.memory_space<vmem>>, vector<1x4x4xbf16>
    %58 = vector.shape_cast %57 : vector<1x4x4xbf16> to vector<4x4xbf16>
    %cst_62 = arith.constant dense<0.000000e+00> : vector<256x4xf32>
    %59 = tpu.matmul %56, %58, %cst_62 {dimension_numbers = #tpu.dot_dimension_numbers<[1], [0], [0], [1], [0, 0, 1, 1], [], []>} : vector<256x4xbf16>, vector<4x4xbf16>, vector<256x4xf32> -> vector<256x4xf32>
    %60 = arith.addf %54, %59 : vector<256x4xf32>
    %c2_63 = arith.constant 2 : index
    %c2_64 = arith.constant 2 : index
    %c0_65 = arith.constant 0 : index
    %61 = vector.load %arg9[%c2_63, %c2_64, %c0_65] : memref<18x18x4xbf16, #tpu.memory_space<vmem>>, vector<16x16x4xbf16>
    %62 = vector.shape_cast %61 : vector<16x16x4xbf16> to vector<256x4xbf16>
    %c8 = arith.constant 8 : index
    %c0_66 = arith.constant 0 : index
    %c0_67 = arith.constant 0 : index
    %63 = vector.load %arg4[%c8, %c0_66, %c0_67] : memref<9x4x4xbf16, #tpu.memory_space<vmem>>, vector<1x4x4xbf16>
    %64 = vector.shape_cast %63 : vector<1x4x4xbf16> to vector<4x4xbf16>
    %cst_68 = arith.constant dense<0.000000e+00> : vector<256x4xf32>
    %65 = tpu.matmul %62, %64, %cst_68 {dimension_numbers = #tpu.dot_dimension_numbers<[1], [0], [0], [1], [0, 0, 1, 1], [], []>} : vector<256x4xbf16>, vector<4x4xbf16>, vector<256x4xf32> -> vector<256x4xf32>
    %66 = arith.addf %60, %65 : vector<256x4xf32>
    %c0_69 = arith.constant 0 : index
    %c0_70 = arith.constant 0 : index
    %67 = vector.load %arg5[%c0_69, %c0_70] : memref<1x4xf32, #tpu.memory_space<vmem>>, vector<1x4xf32>
    %68 = vector.broadcast %67 : vector<1x4xf32> to vector<256x4xf32>
    %69 = arith.addf %66, %68 : vector<256x4xf32>
    %cst_71 = arith.constant 0.000000e+00 : f32
    %70 = vector.broadcast %cst_71 : f32 to vector<256x4xf32>
    %71 = arith.maximumf %69, %70 : vector<256x4xf32>
    %72 = arith.truncf %71 : vector<256x4xf32> to vector<256x4xbf16>
    %c0_72 = arith.constant 0 : index
    %c0_73 = arith.constant 0 : index
    %73 = vector.load %arg6[%c0_72, %c0_73] : memref<4x16xbf16, #tpu.memory_space<vmem>>, vector<4x16xbf16>
    %cst_74 = arith.constant dense<0.000000e+00> : vector<256x16xf32>
    %74 = tpu.matmul %72, %73, %cst_74 {dimension_numbers = #tpu.dot_dimension_numbers<[1], [0], [0], [1], [0, 0, 1, 1], [], []>} : vector<256x4xbf16>, vector<4x16xbf16>, vector<256x16xf32> -> vector<256x16xf32>
    %c0_75 = arith.constant 0 : index
    %c0_76 = arith.constant 0 : index
    %75 = vector.load %arg7[%c0_75, %c0_76] : memref<1x16xf32, #tpu.memory_space<vmem>>, vector<1x16xf32>
    %76 = vector.broadcast %75 : vector<1x16xf32> to vector<256x16xf32>
    %77 = arith.addf %74, %76 : vector<256x16xf32>
    %78 = arith.extf %1 : vector<256x16xbf16> to vector<256x16xf32>
    %79 = arith.addf %77, %78 : vector<256x16xf32>
    %cst_77 = arith.constant 0.000000e+00 : f32
    %80 = vector.broadcast %cst_77 : f32 to vector<256x16xf32>
    %81 = arith.maximumf %79, %80 : vector<256x16xf32>
    %c0_78 = arith.constant 0 : index
    %c0_79 = arith.constant 0 : index
    %c0_80 = arith.constant 0 : index
    %82 = vector.load %arg8[%c0_78, %c0_79, %c0_80] : memref<1x256x16xf32, #tpu.memory_space<vmem>>, vector<1x256x16xf32>
    %83 = vector.shape_cast %82 : vector<1x256x16xf32> to vector<256x16xf32>
    %84 = vector.shape_cast %81 : vector<256x16xf32> to vector<1x256x16xf32>
    tpu.vector_store %arg8[%c0_78, %c0_79, %c0_80], %84 {strides = array<i32>} : memref<1x256x16xf32, #tpu.memory_space<vmem>>, vector<1x256x16xf32>,
    return
  }
  func.func @transform_0(%arg0: i32) -> (i32, i32, i32) {
    %c0_i32 = arith.constant 0 : i32
    %c0_i32_0 = arith.constant 0 : i32
    %c0_i32_1 = arith.constant 0 : i32
    return %arg0, %c0_i32, %c0_i32_0 : i32, i32, i32
  }
  func.func @transform_1(%arg0: i32) -> (i32, i32) {
    %c0_i32 = arith.constant 0 : i32
    %c0_i32_0 = arith.constant 0 : i32
    %c0_i32_1 = arith.constant 0 : i32
    return %c0_i32, %c0_i32_0 : i32, i32
  }
  func.func @transform_2(%arg0: i32) -> (i32, i32) {
    %c0_i32 = arith.constant 0 : i32
    %c0_i32_0 = arith.constant 0 : i32
    %c0_i32_1 = arith.constant 0 : i32
    return %c0_i32, %c0_i32_0 : i32, i32
  }
  func.func @transform_3(%arg0: i32) -> (i32, i32, i32) {
    %c0_i32 = arith.constant 0 : i32
    %c0_i32_0 = arith.constant 0 : i32
    %c0_i32_1 = arith.constant 0 : i32
    %c0_i32_2 = arith.constant 0 : i32
    return %c0_i32, %c0_i32_0, %c0_i32_1 : i32, i32, i32
  }
  func.func @transform_4(%arg0: i32) -> (i32, i32) {
    %c0_i32 = arith.constant 0 : i32
    %c0_i32_0 = arith.constant 0 : i32
    %c0_i32_1 = arith.constant 0 : i32
    return %c0_i32, %c0_i32_0 : i32, i32
  }
  func.func @transform_5(%arg0: i32) -> (i32, i32) {
    %c0_i32 = arith.constant 0 : i32
    %c0_i32_0 = arith.constant 0 : i32
    %c0_i32_1 = arith.constant 0 : i32
    return %c0_i32, %c0_i32_0 : i32, i32
  }
  func.func @transform_6(%arg0: i32) -> (i32, i32) {
    %c0_i32 = arith.constant 0 : i32
    %c0_i32_0 = arith.constant 0 : i32
    %c0_i32_1 = arith.constant 0 : i32
    return %c0_i32, %c0_i32_0 : i32, i32
  }
  func.func @transform_7(%arg0: i32) -> (i32, i32, i32) {
    %c0_i32 = arith.constant 0 : i32
    %c0_i32_0 = arith.constant 0 : i32
    %c0_i32_1 = arith.constant 0 : i32
    return %arg0, %c0_i32, %c0_i32_0 : i32, i32, i32
  }
}

</mosaic_0001>

<bundles_post_ra>
// kernel: bottleneck_forward.1
= control target key start
LH: loop header
LB: loop body
LE: loop exit
PB: predicated region body
PF: predicated region fallthrough
CT: control target
= control target key end

     0   :  { %s7782_s24 = smov 0   ;;  %s9655_s0 = inlined_call_operand.vmem [shape: bf16[2,256,16], index: 0, kind: input, shape index: {}]   ;;  %s9656_s1 = inlined_call_operand.vmem [shape: bf16[16,4], index: 1, kind: input, shape index: {}]   ;;  %s9657_s2 = inlined_call_operand.vmem [shape: f32[1,4], index: 2, kind: input, shape index: {}]   ;;  %s9658_s3 = inlined_call_operand.vmem [shape: bf16[9,4,4], index: 3, kind: input, shape index: {}]   ;;  %s9659_s4 = inlined_call_operand.vmem [shape: f32[1,4], index: 4, kind: input, shape index: {}]   ;;  %s9660_s5 = inlined_call_operand.vmem [shape: bf16[4,16], index: 5, kind: input, shape index: {}]   ;;  %s9661_s6 = inlined_call_operand.vmem [shape: f32[1,16], index: 6, kind: input, shape index: {}]   ;;  %s9662_s7 = inlined_call_operand.vmem [shape: f32[2,256,16], index: 7, kind: output, shape index: {}]  }
   0x1 LB: > { %s6290_s25 = sadd.s32 4294967295, %s7739_s24   ;;  %p6294_p0 = scmp.ge.s32.totalorder %s7739_s24, 1  ;;  %s7739_s24 = sphi %s7782_s24, %s17_s24  }
   0x2   : > { %p237_p1 = scmp.lt.s32.totalorder %s7739_s24, 3 }
   0x4   : > { %p238_p2 = pnand %p6294_p0, %p237_p1 }
   0x6   : > { %241 = sbr.rel (%p238_p2) target bundleno = 1158 (0x486), region = 48 }
   0xd   : > { %v7602_v0 = vld [vmem:[%s9656_s1] sm:$0xff]   ;;  %p269_p3 = scmp.lt.s32.totalorder %s6290_s25, 1  ;;  %vm407_vm0 = vcmask 130048   ;;  %vm649_vm1 = vcmask 27648   ;;  %v7741_v17 = vmov 0   ;;  %vm652_vm2 = vcmask 24576  }
   0xe   : > { %6950 = vmatprep.subr.bf16.mxu0 %v7602_v0  ;;  %657 = vst.msk [vmem:[#allocation2 + $0x18] sm:$0xf] %vm649_vm1, %v7741_v17  ;;  %650 = vst.msk [vmem:[#allocation2] sm:$0xf] %vm649_vm1, %v7741_v17  ;;  %v6365_v28 = vld [vmem:[%s9658_s3 + $0x2] sm:$0x3] }
   0xf   : > { %s9762_s25 = smov (!%p269_p3, %s6290_s25), 1  ;;  %6951 = vmatpush3.bf16.msra.mxu0 %v7602_v0  ;;  %651 = vst.msk [vmem:[#allocation2 + $0x4] sm:$0xf] %vm649_vm1, %v7741_v17  ;;  %654 = vst.msk [vmem:[#allocation2 + $0xc] sm:$0xf] %vm649_vm1, %v7741_v17  ;;  %vm1777_vm3 = vcmask 1041408  }
  0x10   : > { %s6729_s28 = sshll.u32 %s9762_s25, 7  ;;  %655 = vst.msk [vmem:[#allocation2 + $0x10] sm:$0xf] %vm649_vm1, %v7741_v17  ;;  %658 = vst.msk [vmem:[#allocation2 + $0x1c] sm:$0xf] %vm649_vm1, %v7741_v17  ;;  %7582 = vmatprep.subr.msk.bf16.mxu0 %vm1777_vm3, %v6365_v28  ;;  %v1779_v29 = vsel %vm1777_vm3, %v6365_v28, 0 }
  0x11   : > { %s7799_s8 = scalar_lea.vmem %s9655_s0, %s6729_s28  ;;  %660 = vst.msk [vmem:[#allocation2 + $0x24] sm:$0xf] %vm649_vm1, %v7741_v17  ;;  %661 = vst.msk [vmem:[#allocation2 + $0x28] sm:$0xf] %vm649_vm1, %v7741_v17  ;;  %vm1291_vm4 = vsmask.f32 3328 }
  0x12   : > { %v280_v1 = vld [vmem:[%s7799_s8] sm:$0xff]   ;;  %v282_v2 = vld [vmem:[%s7799_s8 + $0x8] sm:$0xff]   ;;  %v284_v3 = vld [vmem:[%s7799_s8 + $0x10] sm:$0xff]   ;;  %663 = vst.msk [vmem:[#allocation2 + $0x30] sm:$0xf] %vm649_vm1, %v7741_v17  ;;  %vm1728_vm7 = vcmask 31744  }
  0x13   : > { %6952 = vmatprep.mubr.msk.bf16.mxu0 %vm407_vm0, %v280_v1  ;;  %v286_v4 = vld [vmem:[%s7799_s8 + $0x18] sm:$0xff]   ;;  %v288_v5 = vld [vmem:[%s7799_s8 + $0x20] sm:$0xff]   ;;  %v290_v6 = vld [vmem:[%s7799_s8 + $0x28] sm:$0xff]   ;;  %664 = vst.msk [vmem:[#allocation2 + $0x34] sm:$0xf] %vm649_vm1, %v7741_v17  ;;  %vm2282_vm14 = vcmask 1042432  }
  0x14   : > { %6953 = vmatmul.mubr.msk.bf16.vlgmr.msra.gmra.mrb[0].mxu0 %vm407_vm0, %v282_v2  ;;  %v292_v7 = vld [vmem:[%s7799_s8 + $0x30] sm:$0xff]   ;;  %v294_v8 = vld [vmem:[%s7799_s8 + $0x38] sm:$0xff]   ;;  %v296_v9 = vld [vmem:[%s7799_s8 + $0x40] sm:$0xff]   ;;  %666 = vst.msk [vmem:[#allocation2 + $0x3c] sm:$0xf] %vm649_vm1, %v7741_v17  ;;  %vm2283_vm15 = vcmask 1046532  }
  0x15   : > { %6956 = vmatprep.mubr.msk.bf16.mxu0 %vm407_vm0, %v284_v3  ;;  %v298_v10 = vld [vmem:[%s7799_s8 + $0x48] sm:$0xff]   ;;  %v300_v11 = vld [vmem:[%s7799_s8 + $0x50] sm:$0xff]   ;;  %v302_v12 = vld [vmem:[%s7799_s8 + $0x58] sm:$0xff]   ;;  %667 = vst.msk [vmem:[#allocation2 + $0x40] sm:$0xf] %vm649_vm1, %v7741_v17  ;;  %6985 = vmatpush3.bf16.msra.mxu0 %v1779_v29  ;;  %s6730_s21 = sshll.u32 %s9762_s25, 8 }
  0x16   : > { %v304_v13 = vld [vmem:[%s7799_s8 + $0x60] sm:$0xff]   ;;  %v306_v14 = vld [vmem:[%s7799_s8 + $0x68] sm:$0xff]   ;;  %v308_v15 = vld [vmem:[%s7799_s8 + $0x70] sm:$0xff]   ;;  %669 = vst.msk [vmem:[#allocation2 + $0x48] sm:$0xf] %vm649_vm1, %v7741_v17  ;;  %s9543_s26 = scalar_lea.vmem %s9662_s7, %s6730_s21 }
  0x17   : > { %v310_v16 = vld [vmem:[%s7799_s8 + $0x78] sm:$0xff]   ;;  %670 = vst.msk [vmem:[#allocation2 + $0x4c] sm:$0xf] %vm649_vm1, %v7741_v17  ;;  %672 = vst.msk [vmem:[#allocation2 + $0x54] sm:$0xf] %vm649_vm1, %v7741_v17 }
  0x18   : > { %673 = vst.msk [vmem:[#allocation2 + $0x58] sm:$0xf] %vm649_vm1, %v7741_v17  ;;  %675 = vst.msk [vmem:[#allocation2 + $0x60] sm:$0xf] %vm649_vm1, %v7741_v17  ;;  %v1242_v18 = vld [vmem:[#allocation2] sm:$0xf] }
  0x19   : > { %676 = vst.msk [vmem:[#allocation2 + $0x64] sm:$0xf] %vm649_vm1, %v7741_v17  ;;  %678 = vst.msk [vmem:[#allocation2 + $0x6c] sm:$0xf] %vm649_vm1, %v7741_v17  ;;  %v1243_v19 = vld [vmem:[#allocation2 + $0x4] sm:$0xf] }
  0x1a   : > { %679 = vst.msk [vmem:[#allocation2 + $0x70] sm:$0xf] %vm649_vm1, %v7741_v17  ;;  %681 = vst.msk [vmem:[#allocation2 + $0x78] sm:$0xf] %vm649_vm1, %v7741_v17  ;;  %v1295_v20 = vshrl.u32 %v1242_v18, 16  ;;  %v1298_v21 = vshll.u32 %v1242_v18, 16 }
  0x1b   : > { %682 = vst.msk [vmem:[#allocation2 + $0x7c] sm:$0xf] %vm649_vm1, %v7741_v17  ;;  %684 = vst.msk [vmem:[#allocation2 + $0x84] sm:$0xf] %vm649_vm1, %v7741_v17  ;;  %v1304_v22 = vshll.u32 %v1243_v19, 16  ;;  %v1308_v23 = vshrl.u32 %v1243_v19, 16 }
  0x1c   : > { %6957 = vmatmul.mubr.msk.bf16.gmra.mrb[4].mxu0 %vm407_vm0, %v286_v4  ;;  %685 = vst.msk [vmem:[#allocation2 + $0x88] sm:$0xf] %vm649_vm1, %v7741_v17  ;;  %687 = vst.msk [vmem:[#allocation2 + $0x90] sm:$0xf] %vm649_vm1, %v7741_v17  ;;  %v1297_v24 = vrot.slane %v1295_v20, 4  ;;  %v1300_v25 = vrot.slane %v1298_v21, 5 }
  0x1d   : > { %6960 = vmatprep.mubr.msk.bf16.mxu0 %vm407_vm0, %v288_v5  ;;  %688 = vst.msk [vmem:[#allocation2 + $0x94] sm:$0xf] %vm649_vm1, %v7741_v17  ;;  %690 = vst.msk [vmem:[#allocation2 + $0x9c] sm:$0xf] %vm649_vm1, %v7741_v17  ;;  %v1306_v26 = vrot.slane %v1304_v22, 5  ;;  %v1310_v27 = vrot.slane %v1308_v23, 4 }
  0x1e   : > { %691 = vst.msk [vmem:[#allocation2 + $0xa0] sm:$0xf] %vm649_vm1, %v7741_v17  ;;  %693 = vst.msk [vmem:[#allocation2 + $0xa8] sm:$0xf] %vm649_vm1, %v7741_v17  ;;  %v1301_v31 = vor.u32 %v1300_v25, %v1297_v24  ;;  %vm1292_vm5 = vsmask.f32 7440 }
  0x1f   : > { %694 = vst.msk [vmem:[#allocation2 + $0xac] sm:$0xf] %vm649_vm1, %v7741_v17  ;;  %696 = vst.msk [vmem:[#allocation2 + $0xb4] sm:$0xf] %vm649_vm1, %v7741_v17  ;;  %v1311_v32 = vor.u32 %v1310_v27, %v1306_v26  ;;  %v6479_v41 = vld [vmem:[%s9658_s3 + $0x6] sm:$0x3] }
  0x20   : > { %697 = vst.msk [vmem:[#allocation2 + $0xb8] sm:$0xf] %vm649_vm1, %v7741_v17  ;;  %699 = vst.msk [vmem:[#allocation2 + $0xc0] sm:$0xf] %vm649_vm1, %v7741_v17  ;;  %v1302_v34 = vrot.slane %v1301_v31, 4  ;;  %7586 = vmatprep.subr.msk.bf16.mxu1 %vm1777_vm3, %v6479_v41  ;;  %v7906_v42 = vsel %vm1777_vm3, %v6479_v41, 0 }
  0x21   : > { %700 = vst.msk [vmem:[#allocation2 + $0xc4] sm:$0xf] %vm649_vm1, %v7741_v17  ;;  %702 = vst.msk [vmem:[#allocation2 + $0xcc] sm:$0xf] %vm649_vm1, %v7741_v17  ;;  %v1312_v35 = vrot.slane %v1311_v32, 4  ;;  %7325 = vmatpush3.bf16.msra.mxu1 %v7906_v42 }
  0x22   : > { %703 = vst.msk [vmem:[#allocation2 + $0xd0] sm:$0xf] %vm649_vm1, %v7741_v17  ;;  %vm7892_vm6 = vmor %vm1291_vm4, %vm1292_vm5  ;;  %v7912_v43 = vld [vmem:[%s9658_s3 + $0x8] sm:$0x3]  ;;  %v7919_v44 = vld [vmem:[%s9657_s2] ss:$0 sm:$0xff] }
  0x23   : > { %659 = vst.msk [vmem:[#allocation2 + $0x20] sm:$0x1] %vm652_vm2, %v7741_v17  ;;  %653 = vst.msk [vmem:[#allocation2 + $0x8] sm:$0x1] %vm652_vm2, %v7741_v17  ;;  %v1307_v38 = vsel %vm7892_vm6, %v1302_v34, %v1306_v26  ;;  %7587 = vmatprep.subr.msk.bf16.mxu1 %vm1777_vm3, %v7912_v43  ;;  %vm1126_vm8 = vsmask.f32 7938 }
  0x24   : > { %6961 = vmatmul.mubr.msk.bf16.gmra.mrb[8].mxu0 %vm407_vm0, %v290_v6  ;;  %656 = vst.msk [vmem:[#allocation2 + $0x14] sm:$0x1] %vm652_vm2, %v7741_v17  ;;  %662 = vst.msk [vmem:[#allocation2 + $0x2c] sm:$0x1] %vm652_vm2, %v7741_v17  ;;  %vm801_vm9 = vsmask.f32 256 }
  0x25   : > { %6964 = vmatprep.mubr.msk.bf16.mxu0 %vm407_vm0, %v292_v7  ;;  %665 = vst.msk [vmem:[#allocation2 + $0x38] sm:$0x1] %vm652_vm2, %v7741_v17  ;;  %668 = vst.msk [vmem:[#allocation2 + $0x44] sm:$0x1] %vm652_vm2, %v7741_v17  ;;  %vm802_vm10 = vsmask.f32 4368 }
  0x26   : > { %671 = vst.msk [vmem:[#allocation2 + $0x50] sm:$0x1] %vm652_vm2, %v7741_v17  ;;  %674 = vst.msk [vmem:[#allocation2 + $0x5c] sm:$0x1] %vm652_vm2, %v7741_v17 }
  0x27   : > { %677 = vst.msk [vmem:[#allocation2 + $0x68] sm:$0x1] %vm652_vm2, %v7741_v17  ;;  %680 = vst.msk [vmem:[#allocation2 + $0x74] sm:$0x1] %vm652_vm2, %v7741_v17 }
  0x28   : > { %683 = vst.msk [vmem:[#allocation2 + $0x80] sm:$0x1] %vm652_vm2, %v7741_v17  ;;  %686 = vst.msk [vmem:[#allocation2 + $0x8c] sm:$0x1] %vm652_vm2, %v7741_v17 }
  0x29   : > { %689 = vst.msk [vmem:[#allocation2 + $0x98] sm:$0x1] %vm652_vm2, %v7741_v17  ;;  %692 = vst.msk [vmem:[#allocation2 + $0xa4] sm:$0x1] %vm652_vm2, %v7741_v17 }
  0x2a   : > { %695 = vst.msk [vmem:[#allocation2 + $0xb0] sm:$0x1] %vm652_vm2, %v7741_v17  ;;  %698 = vst.msk [vmem:[#allocation2 + $0xbc] sm:$0x1] %vm652_vm2, %v7741_v17  ;;  %v1275_v30 = vld [vmem:[#allocation2 + $0x8] sm:$0x1] }
  0x2b   : > { %701 = vst.msk [vmem:[#allocation2 + $0xc8] sm:$0x1] %vm652_vm2, %v7741_v17  ;;  %704 = vst.msk [vmem:[#allocation2 + $0xd4] sm:$0x1] %vm652_vm2, %v7741_v17  ;;  %v1314_v33 = vshll.u32 %v1275_v30, 16 }
  0x2c   : > { %6965 = vmatmul.mubr.msk.bf16.gmra.mrb[12].mxu0 %vm407_vm0, %v294_v8  ;;  %9687 = vst [vmem:[#allocation3_spill] sm:$0xff] %v7906_v42  ;;  %vm7928_vm11 = vmand %vm649_vm1, %vm1126_vm8  ;;  %v1137_v8 = vld [vmem:[#allocation2 + $0x18] sm:$0xf]  ;;  %v1141_v24 = vld [vmem:[#allocation2 + $0x20] sm:$0x1] }
  0x2d   : > { %6968 = vmatprep.mubr.msk.bf16.mxu0 %vm407_vm0, %v296_v9  ;;  %v1316_v37 = vrot.slane %v1314_v33, 5  ;;  %vm7935_vm12 = vmor %vm801_vm9, %vm802_vm10  ;;  %v1134_v30 = vld [vmem:[#allocation2 + $0x14] sm:$0x1] }
  0x2e   : > { %vm7941_vm13 = vmand %vm652_vm2, %vm801_vm9 }
  0x2f   : > { %v1317_v39 = vsel %vm7892_vm6, %v1312_v35, %v1316_v37 }
  0x30   : > { %v6366_v40 = vcombine.low %v1307_v38, %v1317_v39 }
  0x34   : > { %6969 = vmatmul.mubr.msk.bf16.gmra.mrb[16].mxu0 %vm407_vm0, %v298_v10 }
  0x35   : > { %6972 = vmatprep.mubr.msk.bf16.mxu0 %vm407_vm0, %v300_v11 }
  0x3c   : > { %6973 = vmatmul.mubr.msk.bf16.gmra.mrb[20].mxu0 %vm407_vm0, %v302_v12 }
  0x3d   : > { %6976 = vmatprep.mubr.msk.bf16.mxu0 %vm407_vm0, %v304_v13 }
  0x44   : > { %6977 = vmatmul.mubr.msk.bf16.gmra.mrb[24].mxu0 %vm407_vm0, %v306_v14 }
  0x45   : > { %6980 = vmatprep.mubr.msk.bf16.mxu0 %vm407_vm0, %v308_v15 }
  0x4c   : > { %6981 = vmatmul.mubr.msk.bf16.gmra.mrb[28].mxu0 %vm407_vm0, %v310_v16  ;;  %v1128_v16 = vld [vmem:[#allocation2 + $0xc] sm:$0xf] }
  0x4d   : > { %6986 = vmatprep.mubr.msk.bf16.mxu0 %vm1728_vm7, %v6366_v40 }
  0xe7   : > { %v6954_v45 = vpop.f32.mrb[0].mxu0 }
  0xe8   : > { %v499_v46 = vadd.f32 %v6954_v45, %v7919_v44  ;;  %v490_v47 = vpop.f32.mrb[1].mxu0 }
  0xe9   : > { %v491_v48 = vadd.f32 %v7919_v44, %v490_v47  ;;  %v6955_v49 = vpop.f32.mrb[2].mxu0 }
  0xea   : > { %v619_v50 = vmax.f32 %v499_v46, 0.0  ;;  %v502_v51 = vadd.f32 %v6955_v49, %v7919_v44  ;;  %v493_v52 = vpop.f32.mrb[3].mxu0 }
  0xeb   : > { %v617_v53 = vmax.f32 %v491_v48, 0.0  ;;  %v494_v54 = vadd.f32 %v7919_v44, %v493_v52 }
  0xec   : > { %v6733_v55 = vpack.c.bf16 %v619_v50, %v619_v50  ;;  %v620_v56 = vmax.f32 %v502_v51, 0.0 }
  0xed   : > { %v6731_v57 = vpack.c.bf16 %v617_v53, %v617_v53  ;;  %v618_v58 = vmax.f32 %v494_v54, 0.0  ;;  %v1151_v53 = vld [vmem:[#allocation2 + $0x30] sm:$0xf] }
  0xee   : > { %v822_v59 = vshrl.u32 %v6733_v55, 16  ;;  %v6734_v60 = vpack.c.bf16 %v620_v56, %v620_v56  ;;  %v825_v61 = vshll.u32 %v6733_v55, 16 }
  0xef   : > { %v805_v62 = vshrl.u32 %v6731_v57, 16  ;;  %v808_v63 = vshll.u32 %v6731_v57, 16  ;;  %v6732_v0 = vpack.c.bf16 %v618_v58, %v618_v58  ;;  %v6958_v1 = vpop.f32.mrb[4].mxu0  ;;  %v7967_v58 = vsel %vm1777_vm3, %v7912_v43, 0 }
  0xf0   : > { %v824_v2 = vrot.slane %v822_v59, 7  ;;  %v830_v3 = vshrl.u32 %v6734_v60, 16  ;;  %v833_v4 = vshll.u32 %v6734_v60, 16  ;;  %v515_v5 = vadd.f32 %v6958_v1, %v7919_v44  ;;  %v506_v6 = vpop.f32.mrb[5].mxu0 }
  0xf1   : > { %v807_v9 = vrot.slane %v805_v62, 7  ;;  %v813_v10 = vshrl.u32 %v6732_v0, 16  ;;  %v816_v11 = vshll.u32 %v6732_v0, 16  ;;  %v507_v12 = vadd.f32 %v7919_v44, %v506_v6  ;;  %v6959_v13 = vpop.f32.mrb[6].mxu0 }
  0xf2   : > { %v827_v14 = vor.u32 %v825_v61, %v824_v2  ;;  %v828_v15 = vrot.slane %v824_v2, 4  ;;  %v832_v18 = vrot.slane %v830_v3, 7  ;;  %v623_v19 = vmax.f32 %v515_v5, 0.0  ;;  %v509_v20 = vpop.f32.mrb[7].mxu0  ;;  %v1144_v61 = vld [vmem:[#allocation2 + $0x24] sm:$0xf] }
  0xf3   : > { %v810_v21 = vor.u32 %v808_v63, %v807_v9  ;;  %v811_v22 = vrot.slane %v807_v9, 4  ;;  %v815_v25 = vrot.slane %v813_v10, 7  ;;  %v621_v26 = vmax.f32 %v507_v12, 0.0 }
  0xf4   : > { %v1138_v27 = vsel %vm7928_vm11, %v827_v14, %v1137_v8  ;;  %v835_v28 = vor.u32 %v833_v4, %v832_v18  ;;  %v837_v29 = vrot.slane %v832_v18, 4  ;;  %v6737_v31 = vpack.c.bf16 %v623_v19, %v623_v19  ;;  %v1155_v18 = vld [vmem:[#allocation2 + $0x38] sm:$0x1]  ;;  %v1148_v19 = vld [vmem:[#allocation2 + $0x2c] sm:$0x1] }
  0xf5   : > { %1139 = vst [vmem:[#allocation2 + $0x18] sm:$0xf] %v1138_v27  ;;  %v1129_v32 = vsel %vm7928_vm11, %v810_v21, %v1128_v16  ;;  %v818_v33 = vor.u32 %v816_v11, %v815_v25  ;;  %v820_v34 = vrot.slane %v815_v25, 4  ;;  %v6735_v35 = vpack.c.bf16 %v621_v26, %v621_v26 }
  0xf6   : > { %1130 = vst [vmem:[#allocation2 + $0xc] sm:$0xf] %v1129_v32  ;;  %v836_v37 = vsel %vm7935_vm12, %v828_v15, %v835_v28  ;;  %v1142_v38 = vsel %vm7941_vm13, %v837_v29, %v1141_v24  ;;  %v856_v39 = vshrl.u32 %v6737_v31, 16  ;;  %v859_v45 = vshll.u32 %v6737_v31, 16  ;;  %v1165_v32 = vld [vmem:[#allocation2 + $0x48] sm:$0xf] }
  0xf7   : > { %1140 = vst.msk [vmem:[#allocation2 + $0x1c] sm:$0xf] %vm649_vm1, %v836_v37  ;;  %1143 = vst [vmem:[#allocation2 + $0x20] sm:$0x1] %v1142_v38  ;;  %v819_v40 = vsel %vm7935_vm12, %v811_v22, %v818_v33  ;;  %v1135_v41 = vsel %vm7941_vm13, %v820_v34, %v1134_v30  ;;  %v839_v46 = vshrl.u32 %v6735_v35, 16  ;;  %v6962_v47 = vpop.f32.mrb[8].mxu0  ;;  %v518_v49 = vadd.f32 %v6959_v13, %v7919_v44 }
  0xf8   : > { %1131 = vst.msk [vmem:[#allocation2 + $0x10] sm:$0xf] %vm649_vm1, %v819_v40  ;;  %1136 = vst [vmem:[#allocation2 + $0x14] sm:$0x1] %v1135_v41  ;;  %v7959_v48 = vrot.slane %v856_v39, 7  ;;  %v510_v50 = vadd.f32 %v7919_v44, %v509_v20  ;;  %v531_v51 = vadd.f32 %v6962_v47, %v7919_v44  ;;  %v522_v52 = vpop.f32.mrb[9].mxu0 }
  0xf9   : > { %v841_v54 = vrot.slane %v839_v46, 7  ;;  %v842_v55 = vshll.u32 %v6735_v35, 16  ;;  %v523_v56 = vadd.f32 %v7919_v44, %v522_v52  ;;  %v6963_v57 = vpop.f32.mrb[10].mxu0  ;;  %v624_v62 = vmax.f32 %v518_v49, 0.0 }
  0xfa   : > { %v861_v59 = vor.u32 %v859_v45, %v7959_v48  ;;  %v862_v60 = vrot.slane %v7959_v48, 4  ;;  %v622_v63 = vmax.f32 %v510_v50, 0.0  ;;  %v525_v0 = vpop.f32.mrb[11].mxu0  ;;  %v627_v3 = vmax.f32 %v531_v51, 0.0  ;;  %v1158_v45 = vld [vmem:[#allocation2 + $0x3c] sm:$0xf] }
  0xfb   : > { %v844_v1 = vor.u32 %v842_v55, %v841_v54  ;;  %v845_v2 = vrot.slane %v841_v54, 4  ;;  %v625_v4 = vmax.f32 %v523_v56, 0.0  ;;  %v6738_v6 = vpack.c.bf16 %v624_v62, %v624_v62 }
  0xfc   : > { %v1152_v5 = vsel %vm7928_vm11, %v861_v59, %v1151_v53  ;;  %v6736_v8 = vpack.c.bf16 %v622_v63, %v622_v63  ;;  %v534_v43 = vadd.f32 %v6963_v57, %v7919_v44  ;;  %v6741_v10 = vpack.c.bf16 %v627_v3, %v627_v3 }
  0xfd   : > { %1153 = vst [vmem:[#allocation2 + $0x30] sm:$0xf] %v1152_v5  ;;  %v1145_v9 = vsel %vm7928_vm11, %v844_v1, %v1144_v61  ;;  %v6739_v11 = vpack.c.bf16 %v625_v4, %v625_v4  ;;  %v526_v12 = vadd.f32 %v7919_v44, %v525_v0  ;;  %v864_v13 = vshrl.u32 %v6738_v6, 16  ;;  %v1169_v5 = vld [vmem:[#allocation2 + $0x50] sm:$0x1] }
  0xfe   : > { %1146 = vst [vmem:[#allocation2 + $0x24] sm:$0xf] %v1145_v9  ;;  %v867_v14 = vshll.u32 %v6738_v6, 16  ;;  %v847_v15 = vshrl.u32 %v6736_v8, 16  ;;  %v850_v16 = vshll.u32 %v6736_v8, 16  ;;  %v890_v20 = vshrl.u32 %v6741_v10, 16 }
  0xff   : > { %v893_v21 = vshll.u32 %v6741_v10, 16  ;;  %v873_v22 = vshrl.u32 %v6739_v11, 16  ;;  %v876_v24 = vshll.u32 %v6739_v11, 16  ;;  %v6966_v25 = vpop.f32.mrb[12].mxu0  ;;  %v866_v26 = vrot.slane %v864_v13, 7 }
 0x100   : > { %v849_v27 = vrot.slane %v847_v15, 7  ;;  %v628_v28 = vmax.f32 %v534_v43, 0.0  ;;  %v626_v29 = vmax.f32 %v526_v12, 0.0  ;;  %v538_v30 = vpop.f32.mrb[13].mxu0  ;;  %v7977_v31 = vrot.slane %v890_v20, 7 }
 0x101   : > { %v7979_v33 = vrot.slane %v873_v22, 7  ;;  %v547_v34 = vadd.f32 %v6966_v25, %v7919_v44  ;;  %v539_v35 = vadd.f32 %v7919_v44, %v538_v30  ;;  %v6967_v37 = vpop.f32.mrb[14].mxu0  ;;  %v869_v38 = vor.u32 %v867_v14, %v866_v26  ;;  %v1162_v6 = vld [vmem:[#allocation2 + $0x44] sm:$0x1] }
 0x102   : > { %v871_v39 = vrot.slane %v866_v26, 4  ;;  %v852_v40 = vor.u32 %v850_v16, %v849_v27  ;;  %v854_v41 = vrot.slane %v849_v27, 4  ;;  %v541_v46 = vpop.f32.mrb[15].mxu0  ;;  %v895_v47 = vor.u32 %v893_v21, %v7977_v31 }
 0x103   : > { %v896_v48 = vrot.slane %v7977_v31, 4  ;;  %v878_v49 = vor.u32 %v876_v24, %v7979_v33  ;;  %v879_v50 = vrot.slane %v7979_v33, 4  ;;  %v870_v51 = vsel %vm7935_vm12, %v862_v60, %v869_v38  ;;  %v1179_v38 = vld [vmem:[#allocation2 + $0x60] sm:$0xf] }
 0x104   : > { %v1156_v52 = vsel %vm7941_vm13, %v871_v39, %v1155_v18  ;;  %v853_v53 = vsel %vm7935_vm12, %v845_v2, %v852_v40  ;;  %v1149_v54 = vsel %vm7941_vm13, %v854_v41, %v1148_v19  ;;  %1154 = vst.msk [vmem:[#allocation2 + $0x34] sm:$0xf] %vm649_vm1, %v870_v51  ;;  %v1166_v55 = vsel %vm7928_vm11, %v895_v47, %v1165_v32  ;;  %v1172_v39 = vld [vmem:[#allocation2 + $0x54] sm:$0xf]  ;;  %v1244_v47 = vld [vmem:[#allocation2 + $0xc] sm:$0xf] }
 0x105   : > { %1157 = vst [vmem:[#allocation2 + $0x38] sm:$0x1] %v1156_v52  ;;  %1147 = vst.msk [vmem:[#allocation2 + $0x28] sm:$0xf] %vm649_vm1, %v853_v53  ;;  %v1159_v56 = vsel %vm7928_vm11, %v878_v49, %v1158_v45  ;;  %v6742_v57 = vpack.c.bf16 %v628_v28, %v628_v28  ;;  %v6740_v59 = vpack.c.bf16 %v626_v29, %v626_v29  ;;  %v631_v60 = vmax.f32 %v547_v34, 0.0 }
 0x106   : > { %1150 = vst [vmem:[#allocation2 + $0x2c] sm:$0x1] %v1149_v54  ;;  %1167 = vst [vmem:[#allocation2 + $0x48] sm:$0xf] %v1166_v55  ;;  %v629_v61 = vmax.f32 %v539_v35, 0.0  ;;  %v550_v62 = vadd.f32 %v6967_v37, %v7919_v44  ;;  %v542_v63 = vadd.f32 %v7919_v44, %v541_v46 }
 0x107   : > { %1160 = vst [vmem:[#allocation2 + $0x3c] sm:$0xf] %v1159_v56  ;;  %v898_v0 = vshrl.u32 %v6742_v57, 16  ;;  %v901_v1 = vshll.u32 %v6742_v57, 16  ;;  %v881_v2 = vshrl.u32 %v6740_v59, 16  ;;  %v884_v3 = vshll.u32 %v6740_v59, 16 }
 0x108   : > { %v6970_v4 = vpop.f32.mrb[16].mxu0  ;;  %v6745_v8 = vpack.c.bf16 %v631_v60, %v631_v60  ;;  %v6743_v43 = vpack.c.bf16 %v629_v61, %v629_v61  ;;  %v632_v9 = vmax.f32 %v550_v62, 0.0  ;;  %v630_v10 = vmax.f32 %v542_v63, 0.0  ;;  %v1274_v28 = vld [vmem:[%s9658_s3] sm:$0x3] }
 0x109   : > { %v554_v11 = vpop.f32.mrb[17].mxu0  ;;  %v900_v12 = vrot.slane %v898_v0, 7  ;;  %v883_v13 = vrot.slane %v881_v2, 7  ;;  %v563_v14 = vadd.f32 %v6970_v4, %v7919_v44  ;;  %7583 = vmatprep.subr.msk.bf16.mxu0 %vm1777_vm3, %v1274_v28  ;;  %v1183_v60 = vld [vmem:[#allocation2 + $0x68] sm:$0x1]  ;;  %v1319_v4 = vshrl.u32 %v1244_v47, 16 }
 0x10a   : > { %v555_v15 = vadd.f32 %v7919_v44, %v554_v11  ;;  %v6971_v16 = vpop.f32.mrb[18].mxu0  ;;  %v924_v18 = vshrl.u32 %v6745_v8, 16  ;;  %v927_v19 = vshll.u32 %v6745_v8, 16  ;;  %v907_v20 = vshrl.u32 %v6743_v43, 16  ;;  %v1245_v11 = vld [vmem:[#allocation2 + $0x10] sm:$0xf] }
 0x10b   : > { %v910_v21 = vshll.u32 %v6743_v43, 16  ;;  %v557_v22 = vpop.f32.mrb[19].mxu0  ;;  %v903_v24 = vor.u32 %v901_v1, %v900_v12  ;;  %v905_v25 = vrot.slane %v900_v12, 4  ;;  %v886_v26 = vor.u32 %v884_v3, %v883_v13  ;;  %v1176_v1 = vld [vmem:[#allocation2 + $0x5c] sm:$0x1] }
 0x10c   : > { %v888_v27 = vrot.slane %v883_v13, 4  ;;  %v926_v29 = vrot.slane %v924_v18, 7  ;;  %v909_v30 = vrot.slane %v907_v20, 7  ;;  %v6746_v31 = vpack.c.bf16 %v632_v9, %v632_v9  ;;  %v1276_v28 = vld [vmem:[#allocation2 + $0x14] sm:$0x1] }
 0x10d   : > { %v6744_v32 = vpack.c.bf16 %v630_v10, %v630_v10  ;;  %v904_v33 = vsel %vm7935_vm12, %v896_v48, %v903_v24  ;;  %v1170_v34 = vsel %vm7941_vm13, %v905_v25, %v1169_v5  ;;  %v887_v35 = vsel %vm7935_vm12, %v879_v50, %v886_v26 }
 0x10e   : > { %v1163_v37 = vsel %vm7941_vm13, %v888_v27, %v1162_v6  ;;  %1168 = vst.msk [vmem:[#allocation2 + $0x4c] sm:$0xf] %vm649_vm1, %v904_v33  ;;  %1171 = vst [vmem:[#allocation2 + $0x50] sm:$0x1] %v1170_v34  ;;  %v929_v40 = vor.u32 %v927_v19, %v926_v29  ;;  %v930_v41 = vrot.slane %v926_v29, 4  ;;  %v912_v45 = vor.u32 %v910_v21, %v909_v30 }
 0x10f   : > { %1161 = vst.msk [vmem:[#allocation2 + $0x40] sm:$0xf] %vm649_vm1, %v887_v35  ;;  %1164 = vst [vmem:[#allocation2 + $0x44] sm:$0x1] %v1163_v37  ;;  %v913_v46 = vrot.slane %v909_v30, 4  ;;  %v932_v48 = vshrl.u32 %v6746_v31, 16  ;;  %v566_v62 = vadd.f32 %v6971_v16, %v7919_v44  ;;  %v558_v63 = vadd.f32 %v7919_v44, %v557_v22 }
 0x110   : > { %v935_v49 = vshll.u32 %v6746_v31, 16  ;;  %v915_v51 = vshrl.u32 %v6744_v32, 16  ;;  %v918_v50 = vshll.u32 %v6744_v32, 16  ;;  %v8019_v52 = vpop.f32.mrb[20].mxu0  ;;  %v1180_v53 = vsel %vm7928_vm11, %v929_v40, %v1179_v38  ;;  %v1193_v21 = vld [vmem:[#allocation2 + $0x78] sm:$0xf] }
 0x111   : > { %v1173_v54 = vsel %vm7928_vm11, %v912_v45, %v1172_v39  ;;  %v635_v55 = vmax.f32 %v563_v14, 0.0  ;;  %v633_v56 = vmax.f32 %v555_v15, 0.0  ;;  %v8025_v57 = vpop.f32.mrb[21].mxu0  ;;  %1181 = vst [vmem:[#allocation2 + $0x60] sm:$0xf] %v1180_v53  ;;  %v934_v59 = vrot.slane %v932_v48, 7 }
 0x112   : > { %1174 = vst [vmem:[#allocation2 + $0x54] sm:$0xf] %v1173_v54  ;;  %v917_v61 = vrot.slane %v915_v51, 7  ;;  %v8029_v0 = vpop.f32.mrb[22].mxu0  ;;  %v1322_v5 = vshll.u32 %v1244_v47, 16  ;;  %v636_v26 = vmax.f32 %v566_v62, 0.0 }
 0x113   : > { %v6749_v2 = vpack.c.bf16 %v635_v55, %v635_v55  ;;  %v6747_v3 = vpack.c.bf16 %v633_v56, %v633_v56  ;;  %v8031_v6 = vpop.f32.mrb[23].mxu0  ;;  %v937_v8 = vor.u32 %v935_v49, %v934_v59  ;;  %v939_v43 = vrot.slane %v934_v59, 4  ;;  %v1186_v22 = vld [vmem:[#allocation2 + $0x6c] sm:$0xf]  ;;  %v1246_v47 = vld [vmem:[#allocation2 + $0x18] sm:$0xf] }
 0x114   : > { %v920_v9 = vor.u32 %v918_v50, %v917_v61  ;;  %v922_v10 = vrot.slane %v917_v61, 4  ;;  %v634_v27 = vmax.f32 %v558_v63, 0.0  ;;  %v1321_v29 = vrot.slane %v1319_v4, 4  ;;  %v1247_v54 = vld [vmem:[#allocation2 + $0x1c] sm:$0xf] }
 0x115   : > { %v958_v12 = vshrl.u32 %v6749_v2, 16  ;;  %v961_v13 = vshll.u32 %v6749_v2, 16  ;;  %v941_v14 = vshrl.u32 %v6747_v3, 16  ;;  %v944_v15 = vshll.u32 %v6747_v3, 16  ;;  %v1197_v4 = vld [vmem:[#allocation2 + $0x80] sm:$0x1] }
 0x116   : > { %v938_v16 = vsel %vm7935_vm12, %v930_v41, %v937_v8  ;;  %v1184_v18 = vsel %vm7941_vm13, %v939_v43, %v1183_v60  ;;  %v921_v19 = vsel %vm7935_vm12, %v913_v46, %v920_v9  ;;  %v1177_v20 = vsel %vm7941_vm13, %v922_v10, %v1176_v1  ;;  %v1190_v9 = vld [vmem:[#allocation2 + $0x74] sm:$0x1] }
 0x117   : > { %1182 = vst.msk [vmem:[#allocation2 + $0x64] sm:$0xf] %vm649_vm1, %v938_v16  ;;  %1185 = vst [vmem:[#allocation2 + $0x68] sm:$0x1] %v1184_v18  ;;  %v960_v24 = vrot.slane %v958_v12, 7  ;;  %v943_v25 = vrot.slane %v941_v14, 7  ;;  %v6750_v40 = vpack.c.bf16 %v636_v26, %v636_v26  ;;  %v6748_v41 = vpack.c.bf16 %v634_v27, %v634_v27 }
 0x118   : > { %1175 = vst.msk [vmem:[#allocation2 + $0x58] sm:$0xf] %vm649_vm1, %v921_v19  ;;  %1178 = vst [vmem:[#allocation2 + $0x5c] sm:$0x1] %v1177_v20  ;;  %v1324_v30 = vrot.slane %v1322_v5, 5  ;;  %v1328_v31 = vshll.u32 %v1245_v11, 16 }
 0x119   : > { %v1332_v32 = vshrl.u32 %v1245_v11, 16  ;;  %v8043_v33 = vpop.f32.mrb[24].mxu0  ;;  %v963_v34 = vor.u32 %v961_v13, %v960_v24  ;;  %v964_v35 = vrot.slane %v960_v24, 4  ;;  %v946_v37 = vor.u32 %v944_v15, %v943_v25  ;;  %v1277_v19 = vld [vmem:[#allocation2 + $0x20] sm:$0x1] }
 0x11a   : > { %v947_v38 = vrot.slane %v943_v25, 4  ;;  %v8045_v39 = vpop.f32.mrb[25].mxu0  ;;  %v1325_v45 = vor.u32 %v1324_v30, %v1321_v29  ;;  %v1330_v46 = vrot.slane %v1328_v31, 5  ;;  %v1338_v53 = vshll.u32 %v1276_v28, 16  ;;  %v1248_v31 = vld [vmem:[#allocation2 + $0x24] sm:$0xf] }
 0x11b   : > { %v8047_v48 = vpop.f32.mrb[26].mxu0  ;;  %v1194_v49 = vsel %vm7928_vm11, %v963_v34, %v1193_v21  ;;  %v1187_v51 = vsel %vm7928_vm11, %v946_v37, %v1186_v22  ;;  %v1334_v50 = vrot.slane %v1332_v32, 4  ;;  %v966_v56 = vshrl.u32 %v6750_v40, 16 }
 0x11c   : > { %v8053_v55 = vpop.f32.mrb[27].mxu0  ;;  %1195 = vst [vmem:[#allocation2 + $0x78] sm:$0xf] %v1194_v49  ;;  %1188 = vst [vmem:[#allocation2 + $0x6c] sm:$0xf] %v1187_v51  ;;  %v969_v59 = vshll.u32 %v6750_v40, 16 }
 0x11d   : > { %v949_v60 = vshrl.u32 %v6748_v41, 16  ;;  %v952_v61 = vshll.u32 %v6748_v41, 16  ;;  %v1326_v62 = vrot.slane %v1325_v45, 4  ;;  %v1335_v63 = vor.u32 %v1334_v50, %v1330_v46 }
 0x11e   : > { %v1340_v1 = vrot.slane %v1338_v53, 5  ;;  %v1343_v2 = vshrl.u32 %v1246_v47, 16  ;;  %v968_v3 = vrot.slane %v966_v56, 7  ;;  %v1346_v8 = vshll.u32 %v1246_v47, 16 }
 0x11f   : > { %v951_v5 = vrot.slane %v949_v60, 7  ;;  %v1352_v43 = vshll.u32 %v1247_v54, 16  ;;  %v1331_v10 = vsel %vm7892_vm6, %v1326_v62, %v1330_v46  ;;  %v1336_v11 = vrot.slane %v1335_v63, 4  ;;  %v8057_v20 = vpop.f32.mrb[28].mxu0 }
 0x120   : > { %v1345_v12 = vrot.slane %v1343_v2, 4  ;;  %v1356_v13 = vshrl.u32 %v1247_v54, 16  ;;  %v971_v14 = vor.u32 %v969_v59, %v968_v3  ;;  %v973_v15 = vrot.slane %v968_v3, 4  ;;  %v8061_v26 = vpop.f32.mrb[29].mxu0  ;;  %v1278_v3 = vld [vmem:[#allocation2 + $0x2c] sm:$0x1] }
 0x121   : > { %v954_v16 = vor.u32 %v952_v61, %v951_v5  ;;  %v956_v18 = vrot.slane %v951_v5, 4  ;;  %v1341_v21 = vsel %vm7892_vm6, %v1336_v11, %v1340_v1  ;;  %v1348_v22 = vrot.slane %v1346_v8, 5  ;;  %v8071_v32 = vpop.f32.mrb[30].mxu0 }
 0x122   : > { %v1354_v24 = vrot.slane %v1352_v43, 5  ;;  %v1358_v25 = vrot.slane %v1356_v13, 4  ;;  %v972_v27 = vsel %vm7935_vm12, %v964_v35, %v971_v14  ;;  %v1198_v28 = vsel %vm7941_vm13, %v973_v15, %v1197_v4  ;;  %v8075_v41 = vpop.f32.mrb[31].mxu0  ;;  %v1207_v13 = vld [vmem:[#allocation2 + $0x90] sm:$0xf] }
 0x123   : > { %v955_v29 = vsel %vm7935_vm12, %v947_v38, %v954_v16  ;;  %v1191_v30 = vsel %vm7941_vm13, %v956_v18, %v1190_v9  ;;  %1196 = vst.msk [vmem:[#allocation2 + $0x7c] sm:$0xf] %vm649_vm1, %v972_v27  ;;  %1199 = vst [vmem:[#allocation2 + $0x80] sm:$0x1] %v1198_v28  ;;  %v6367_v34 = vcombine.low %v1331_v10, %v1341_v21  ;;  %v1362_v40 = vshll.u32 %v1277_v19, 16 }
 0x124   : > { %1189 = vst.msk [vmem:[#allocation2 + $0x70] sm:$0xf] %vm649_vm1, %v955_v29  ;;  %1192 = vst [vmem:[#allocation2 + $0x74] sm:$0x1] %v1191_v30  ;;  %v1349_v35 = vor.u32 %v1348_v22, %v1345_v12  ;;  %v1359_v37 = vor.u32 %v1358_v25, %v1354_v24  ;;  %v579_v38 = vadd.f32 %v8019_v52, %v7919_v44  ;;  %v1367_v53 = vshrl.u32 %v1248_v31, 16 }
 0x125   : > { %v571_v45 = vadd.f32 %v7919_v44, %v8025_v57  ;;  %v582_v46 = vadd.f32 %v8029_v0, %v7919_v44  ;;  %v574_v47 = vadd.f32 %v7919_v44, %v8031_v6  ;;  %6987 = vmatmul.mubr.msk.bf16.vlgmr.msra.gmra.mrb[32].mxu0 %vm1728_vm7, %v6367_v34  ;;  %v1364_v50 = vrot.slane %v1362_v40, 5  ;;  %v1249_v52 = vld [vmem:[#allocation2 + $0x28] sm:$0xf]  ;;  %v1200_v14 = vld [vmem:[#allocation2 + $0x84] sm:$0xf] }
 0x126   : > { %v1350_v49 = vrot.slane %v1349_v35, 4  ;;  %v1360_v51 = vrot.slane %v1359_v37, 4  ;;  %v639_v54 = vmax.f32 %v579_v38, 0.0  ;;  %v1369_v61 = vrot.slane %v1367_v53, 4  ;;  %v8095_v35 = vld [vmem:[%s9658_s3 + $0xa] sm:$0x3] }
 0x127   : > { %v637_v56 = vmax.f32 %v571_v45, 0.0  ;;  %v640_v59 = vmax.f32 %v582_v46, 0.0  ;;  %v638_v60 = vmax.f32 %v574_v47, 0.0  ;;  %v1370_v62 = vshll.u32 %v1248_v31, 16  ;;  %v1211_v46 = vld [vmem:[#allocation2 + $0x98] sm:$0x1] }
 0x128   : > { %v1355_v57 = vsel %vm7892_vm6, %v1350_v49, %v1354_v24  ;;  %v1365_v0 = vsel %vm7892_vm6, %v1360_v51, %v1364_v50  ;;  %v6753_v63 = vpack.c.bf16 %v639_v54, %v639_v54  ;;  %v1376_v8 = vshll.u32 %v1249_v52, 16  ;;  %v1204_v47 = vld [vmem:[#allocation2 + $0x8c] sm:$0x1]  ;;  %v1250_v54 = vld [vmem:[#allocation2 + $0x30] sm:$0xf] }
 0x129   : > { %v6368_v6 = vcombine.low %v1355_v57, %v1365_v0  ;;  %v6751_v1 = vpack.c.bf16 %v637_v56, %v637_v56  ;;  %v6754_v2 = vpack.c.bf16 %v640_v59, %v640_v59  ;;  %v6752_v4 = vpack.c.bf16 %v638_v60, %v638_v60  ;;  %v1251_v57 = vld [vmem:[#allocation2 + $0x34] sm:$0xf]  ;;  %v1279_v0 = vld [vmem:[#allocation2 + $0x38] sm:$0x1] }
 0x12a   : > { %v1372_v5 = vrot.slane %v1370_v62, 5  ;;  %v1380_v43 = vshrl.u32 %v1249_v52, 16  ;;  %v992_v9 = vshrl.u32 %v6753_v63, 16  ;;  %v995_v10 = vshll.u32 %v6753_v63, 16  ;;  %v7620_v28 = vld [vmem:[#allocation2 + $0x78] sm:$0xff]  }
 0x12b   : > { %6990 = vmatprep.mubr.msk.bf16.mxu0 %vm1728_vm7, %v6368_v6  ;;  %v975_v11 = vshrl.u32 %v6751_v1, 16  ;;  %v978_v12 = vshll.u32 %v6751_v1, 16  ;;  %v1000_v15 = vshrl.u32 %v6754_v2, 16  ;;  %v1003_v16 = vshll.u32 %v6754_v2, 16  ;;  %v7619_v21 = vld [vmem:[#allocation2 + $0x6c] sm:$0xff]  }
 0x12c   : > { %v983_v18 = vshrl.u32 %v6752_v4, 16  ;;  %v986_v19 = vshll.u32 %v6752_v4, 16  ;;  %v994_v22 = vrot.slane %v992_v9, 7  ;;  %v1373_v25 = vor.u32 %v1372_v5, %v1369_v61  ;;  %7104 = vmatprep.mubr.msk.bf16.mxu1 %vm1728_vm7, %v7619_v21  ;;  %v1252_v4 = vld [vmem:[#allocation2 + $0x3c] sm:$0xf] }
 0x12d   : > { %v977_v24 = vrot.slane %v975_v11, 7  ;;  %v1378_v27 = vrot.slane %v1376_v8, 5  ;;  %v1002_v29 = vrot.slane %v1000_v15, 7  ;;  %v1382_v31 = vrot.slane %v1380_v43, 4  ;;  %7105 = vmatmul.mubr.msk.bf16.vlgmr.msra.gmra.mrb[0].mxu1 %vm1728_vm7, %v7620_v28 }
 0x12e   : > { %v985_v30 = vrot.slane %v983_v18, 7  ;;  %v1386_v34 = vshll.u32 %v1278_v3, 16  ;;  %v997_v37 = vor.u32 %v995_v10, %v994_v22  ;;  %v998_v40 = vrot.slane %v994_v22, 4  ;;  %7121 = vmatpush3.bf16.msra.mxu1 %v7967_v58 }
 0x12f   : > { %v980_v38 = vor.u32 %v978_v12, %v977_v24  ;;  %v981_v45 = vrot.slane %v977_v24, 4  ;;  %v1005_v49 = vor.u32 %v1003_v16, %v1002_v29  ;;  %v1007_v51 = vrot.slane %v1002_v29, 4  ;;  %7588 = vmatprep.subr.msk.bf16.mxu1 %vm1777_vm3, %v8095_v35 }
 0x130   : > { %v988_v50 = vor.u32 %v986_v19, %v985_v30  ;;  %v990_v53 = vrot.slane %v985_v30, 4  ;;  %v1208_v56 = vsel %vm7928_vm11, %v997_v37, %v1207_v13  ;;  %v1374_v60 = vrot.slane %v1373_v25, 4 }
 0x131   : > { %v1201_v59 = vsel %vm7928_vm11, %v980_v38, %v1200_v14  ;;  %v1383_v52 = vor.u32 %v1382_v31, %v1378_v27  ;;  %1209 = vst [vmem:[#allocation2 + $0x90] sm:$0xf] %v1208_v56  ;;  %v1006_v61 = vsel %vm7935_vm12, %v998_v40, %v1005_v49  ;;  %v1212_v58 = vsel %vm7941_vm13, %v1007_v51, %v1211_v46 }
 0x132   : > { %1202 = vst [vmem:[#allocation2 + $0x84] sm:$0xf] %v1201_v59  ;;  %v989_v62 = vsel %vm7935_vm12, %v981_v45, %v988_v50  ;;  %v1205_v6 = vsel %vm7941_vm13, %v990_v53, %v1204_v47  ;;  %1210 = vst.msk [vmem:[#allocation2 + $0x94] sm:$0xf] %vm649_vm1, %v1006_v61  ;;  %v1379_v63 = vsel %vm7892_vm6, %v1374_v60, %v1378_v27  ;;  %v1388_v2 = vrot.slane %v1386_v34, 5 }
 0x133   : > { %1213 = vst [vmem:[#allocation2 + $0x98] sm:$0x1] %v1212_v58  ;;  %1203 = vst.msk [vmem:[#allocation2 + $0x88] sm:$0xf] %vm649_vm1, %v989_v62  ;;  %v1384_v1 = vrot.slane %v1383_v52, 4  ;;  %v1391_v3 = vshrl.u32 %v1250_v54, 16  ;;  %v595_v12 = vadd.f32 %v8043_v33, %v7919_v44  ;;  %v587_v13 = vadd.f32 %v7919_v44, %v8045_v39 }
 0x134   : > { %1206 = vst [vmem:[#allocation2 + $0x8c] sm:$0x1] %v1205_v6  ;;  %v1394_v5 = vshll.u32 %v1250_v54, 16  ;;  %v1400_v8 = vshll.u32 %v1251_v57, 16  ;;  %v1404_v43 = vshrl.u32 %v1251_v57, 16  ;;  %v1410_v9 = vshll.u32 %v1279_v0, 16 }
 0x135   : > { %v1389_v10 = vsel %vm7892_vm6, %v1384_v1, %v1388_v2  ;;  %v1393_v11 = vrot.slane %v1391_v3, 4  ;;  %v643_v21 = vmax.f32 %v595_v12, 0.0  ;;  %v641_v22 = vmax.f32 %v587_v13, 0.0  ;;  %v1214_v50 = vld [vmem:[#allocation2 + $0x9c] sm:$0xf] }
 0x136   : > { %v6369_v14 = vcombine.low %v1379_v63, %v1389_v10  ;;  %v1396_v15 = vrot.slane %v1394_v5, 5  ;;  %v1402_v16 = vrot.slane %v1400_v8, 5  ;;  %v1406_v18 = vrot.slane %v1404_v43, 4  ;;  %v8132_v57 = vld [vmem:[#allocation2 + $0x40] sm:$0xf] }
 0x137   : > { %v1412_v19 = vrot.slane %v1410_v9, 5  ;;  %v598_v24 = vadd.f32 %v8047_v48, %v7919_v44  ;;  %v590_v33 = vadd.f32 %v7919_v44, %v8053_v55  ;;  %v1415_v28 = vshrl.u32 %v1252_v4, 16  ;;  %v1221_v55 = vld [vmem:[#allocation2 + $0xa8] sm:$0xf]  ;;  %v1280_v63 = vld [vmem:[#allocation2 + $0x44] sm:$0x1] }
 0x138   : > { %6991 = vmatmul.mubr.msk.bf16.gmra.mrb[36].mxu0 %vm1728_vm7, %v6369_v14  ;;  %v1397_v25 = vor.u32 %v1396_v15, %v1393_v11  ;;  %v1407_v27 = vor.u32 %v1406_v18, %v1402_v16  ;;  %v6757_v29 = vpack.c.bf16 %v643_v21, %v643_v21  ;;  %v6755_v39 = vpack.c.bf16 %v641_v22, %v641_v22  ;;  %v1225_v12 = vld [vmem:[#allocation2 + $0xb0] sm:$0x1]  ;;  %v1218_v13 = vld [vmem:[#allocation2 + $0xa4] sm:$0x1]  ;;  %v8143_v22 = vld [vmem:[#allocation2 + $0x48] sm:$0xf] }
 0x139   : > { %v644_v30 = vmax.f32 %v598_v24, 0.0  ;;  %v1418_v31 = vshll.u32 %v1252_v4, 16  ;;  %v642_v40 = vmax.f32 %v590_v33, 0.0  ;;  %v1417_v38 = vrot.slane %v1415_v28, 4  ;;  %v7622_v56 = vld [vmem:[#allocation2 + $0x90] sm:$0xff]  }
 0x13a   : > { %v1398_v34 = vrot.slane %v1397_v25, 4  ;;  %v1408_v37 = vrot.slane %v1407_v27, 4  ;;  %v1026_v45 = vshrl.u32 %v6757_v29, 16  ;;  %v1029_v46 = vshll.u32 %v6757_v29, 16  ;;  %v7621_v49 = vld [vmem:[#allocation2 + $0x84] sm:$0xff]  }
 0x13b   : > { %v1009_v47 = vshrl.u32 %v6755_v39, 16  ;;  %v1012_v48 = vshll.u32 %v6755_v39, 16  ;;  %v6758_v53 = vpack.c.bf16 %v644_v30, %v644_v30  ;;  %v6756_v54 = vpack.c.bf16 %v642_v40, %v642_v40  ;;  %7108 = vmatprep.mubr.msk.bf16.mxu1 %vm1728_vm7, %v7621_v49  ;;  %v8145_v24 = vld [vmem:[#allocation2 + $0x4c] sm:$0xf]  ;;  %v1281_v29 = vld [vmem:[#allocation2 + $0x50] sm:$0x1] }
 0x13c   : > { %v1403_v51 = vsel %vm7892_vm6, %v1398_v34, %v1402_v16  ;;  %v1413_v44 = vsel %vm7892_vm6, %v1408_v37, %v1412_v19  ;;  %v1028_v60 = vrot.slane %v1026_v45, 7  ;;  %v1420_v0 = vrot.slane %v1418_v31, 5  ;;  %7109 = vmatmul.mubr.msk.bf16.gmra.mrb[4].mxu1 %vm1728_vm7, %v7622_v56  ;;  %v7676_v49 = vld [vmem:[%s9657_s2] ss:$0 sm:$0xff] }
 0x13d   : > { %v6370_v59 = vcombine.low %v1403_v51, %v1413_v44  ;;  %v1011_v52 = vrot.slane %v1009_v47, 7  ;;  %v1034_v61 = vshrl.u32 %v6758_v53, 16  ;;  %v1037_v58 = vshll.u32 %v6758_v53, 16 }
 0x13e   : > { %v1017_v62 = vshrl.u32 %v6756_v54, 16  ;;  %v1020_v6 = vshll.u32 %v6756_v54, 16  ;;  %v1031_v1 = vor.u32 %v1029_v46, %v1028_v60  ;;  %v1032_v2 = vrot.slane %v1028_v60, 4  ;;  %v8168_v54 = vld [vmem:[#allocation2 + $0x54] sm:$0xf] }
 0x13f   : > { %6994 = vmatprep.mubr.msk.bf16.mxu0 %vm1728_vm7, %v6370_v59  ;;  %v1014_v3 = vor.u32 %v1012_v48, %v1011_v52  ;;  %v1015_v4 = vrot.slane %v1011_v52, 4  ;;  %v1036_v5 = vrot.slane %v1034_v61, 7  ;;  %v1421_v43 = vor.u32 %v1420_v0, %v1417_v38 }
 0x140   : > { %v1019_v8 = vrot.slane %v1017_v62, 7  ;;  %v1424_v9 = vshll.u32 %v8132_v57, 16  ;;  %v1222_v10 = vsel %vm7928_vm11, %v1031_v1, %v1221_v55  ;;  %v1428_v14 = vshrl.u32 %v8132_v57, 16 }
 0x141   : > { %v1215_v11 = vsel %vm7928_vm11, %v1014_v3, %v1214_v50  ;;  %v1434_v15 = vshll.u32 %v1280_v63, 16  ;;  %1223 = vst [vmem:[#allocation2 + $0xa8] sm:$0xf] %v1222_v10  ;;  %v1039_v16 = vor.u32 %v1037_v58, %v1036_v5  ;;  %v1041_v18 = vrot.slane %v1036_v5, 4 }
 0x142   : > { %1216 = vst [vmem:[#allocation2 + $0x9c] sm:$0xf] %v1215_v11  ;;  %v1022_v19 = vor.u32 %v1020_v6, %v1019_v8  ;;  %v1024_v21 = vrot.slane %v1019_v8, 4  ;;  %v1422_v25 = vrot.slane %v1421_v43, 4  ;;  %v1426_v27 = vrot.slane %v1424_v9, 5 }
 0x143   : > { %v1430_v33 = vrot.slane %v1428_v14, 4  ;;  %v1436_v28 = vrot.slane %v1434_v15, 5  ;;  %v1040_v39 = vsel %vm7935_vm12, %v1032_v2, %v1039_v16  ;;  %v1226_v30 = vsel %vm7941_vm13, %v1041_v18, %v1225_v12  ;;  %v1235_v15 = vld [vmem:[#allocation2 + $0xc0] sm:$0xf] }
 0x144   : > { %v1023_v31 = vsel %vm7935_vm12, %v1015_v4, %v1022_v19  ;;  %v1219_v34 = vsel %vm7941_vm13, %v1024_v21, %v1218_v13  ;;  %1224 = vst.msk [vmem:[#allocation2 + $0xac] sm:$0xf] %vm649_vm1, %v1040_v39  ;;  %1227 = vst [vmem:[#allocation2 + $0xb0] sm:$0x1] %v1226_v30  ;;  %v1427_v37 = vsel %vm7892_vm6, %v1422_v25, %v1426_v27  ;;  %v1439_v38 = vshrl.u32 %v8143_v22, 16 }
 0x145   : > { %1217 = vst.msk [vmem:[#allocation2 + $0xa0] sm:$0xf] %vm649_vm1, %v1023_v31  ;;  %1220 = vst [vmem:[#allocation2 + $0xa4] sm:$0x1] %v1219_v34  ;;  %v1431_v40 = vor.u32 %v1430_v33, %v1426_v27  ;;  %v1442_v45 = vshll.u32 %v8143_v22, 16  ;;  %v1448_v46 = vshll.u32 %v8145_v24, 16  ;;  %v611_v51 = vadd.f32 %v7676_v49, %v8057_v20 }
 0x146   : > { %v1452_v47 = vshrl.u32 %v8145_v24, 16  ;;  %v1458_v48 = vshll.u32 %v1281_v29, 16  ;;  %v1441_v55 = vrot.slane %v1439_v38, 4  ;;  %v603_v53 = vadd.f32 %v7676_v49, %v8061_v26  ;;  %v1228_v30 = vld [vmem:[#allocation2 + $0xb4] sm:$0xf] }
 0x147   : > { %v1432_v44 = vrot.slane %v1431_v40, 4  ;;  %v1444_v50 = vrot.slane %v1442_v45, 5  ;;  %v1450_v56 = vrot.slane %v1448_v46, 5  ;;  %v647_v52 = vmax.f32 %v611_v51, 0.0  ;;  %v1239_v45 = vld [vmem:[#allocation2 + $0xc8] sm:$0x1] }
 0x148   : > { %v1454_v59 = vrot.slane %v1452_v47, 4  ;;  %v1460_v60 = vrot.slane %v1458_v48, 5  ;;  %v645_v58 = vmax.f32 %v603_v53, 0.0  ;;  %v614_v62 = vadd.f32 %v7676_v49, %v8071_v32 }
 0x149   : > { %v1437_v0 = vsel %vm7892_vm6, %v1432_v44, %v1436_v28  ;;  %v1445_v61 = vor.u32 %v1444_v50, %v1441_v55  ;;  %v6761_v63 = vpack.c.bf16 %v647_v52, %v647_v52  ;;  %v606_v1 = vadd.f32 %v7676_v49, %v8075_v41  ;;  %v8180_v28 = vld [vmem:[#allocation2 + $0x58] sm:$0xf]  ;;  %v1282_v49 = vld [vmem:[#allocation2 + $0x5c] sm:$0x1] }
 0x14a   : > { %v6371_v6 = vcombine.low %v1427_v37, %v1437_v0  ;;  %v1455_v20 = vor.u32 %v1454_v59, %v1450_v56  ;;  %v6759_v26 = vpack.c.bf16 %v645_v58, %v645_v58  ;;  %v648_v3 = vmax.f32 %v614_v62, 0.0  ;;  %v8194_v62 = vld [vmem:[#allocation2 + $0x64] sm:$0xf] }
 0x14b   : > { %v1446_v2 = vrot.slane %v1445_v61, 4  ;;  %v1463_v4 = vshrl.u32 %v8168_v54, 16  ;;  %v1060_v8 = vshrl.u32 %v6761_v63, 16  ;;  %v1063_v43 = vshll.u32 %v6761_v63, 16  ;;  %v7624_v19 = vld [vmem:[#allocation2 + $0xa8] sm:$0xff]  }
 0x14c   : > { %6995 = vmatmul.mubr.msk.bf16.gmra.mrb[40].mxu0 %vm1728_vm7, %v6371_v6  ;;  %v1456_v5 = vrot.slane %v1455_v20, 4  ;;  %v646_v9 = vmax.f32 %v606_v1, 0.0  ;;  %v1043_v32 = vshrl.u32 %v6759_v26, 16  ;;  %v1046_v11 = vshll.u32 %v6759_v26, 16  ;;  %v7623_v13 = vld [vmem:[#allocation2 + $0x9c] sm:$0xff]  }
 0x14d   : > { %v1451_v10 = vsel %vm7892_vm6, %v1446_v2, %v1450_v56  ;;  %v6762_v12 = vpack.c.bf16 %v648_v3, %v648_v3  ;;  %v1062_v14 = vrot.slane %v1060_v8, 7  ;;  %v1465_v18 = vrot.slane %v1463_v4, 4  ;;  %7112 = vmatprep.mubr.msk.bf16.mxu1 %vm1728_vm7, %v7623_v13  ;;  %v1232_v56 = vld [vmem:[#allocation2 + $0xbc] sm:$0x1]  ;;  %v1283_v1 = vld [vmem:[#allocation2 + $0x68] sm:$0x1] }
 0x14e   : > { %v1461_v41 = vsel %vm7892_vm6, %v1456_v5, %v1460_v60  ;;  %v6760_v16 = vpack.c.bf16 %v646_v9, %v646_v9  ;;  %v1045_v25 = vrot.slane %v1043_v32, 7  ;;  %7113 = vmatmul.mubr.msk.bf16.gmra.mrb[8].mxu1 %vm1728_vm7, %v7624_v19  ;;  %v1466_v46 = vshll.u32 %v8168_v54, 16  ;;  %v8192_v60 = vld [vmem:[#allocation2 + $0x60] sm:$0xf]  ;;  %v8206_v5 = vld [vmem:[#allocation2 + $0x6c] sm:$0xf] }
 0x14f   : > { %v6372_v21 = vcombine.low %v1451_v10, %v1461_v41  ;;  %v1068_v27 = vshrl.u32 %v6762_v12, 16  ;;  %v1071_v33 = vshll.u32 %v6762_v12, 16  ;;  %v1065_v29 = vor.u32 %v1063_v43, %v1062_v14  ;;  %v8212_v12 = vld [vmem:[#allocation2 + $0x70] sm:$0xf]  ;;  %v8214_v13 = vld [vmem:[#allocation2 + $0x78] sm:$0xf] }
 0x150   : > { %v1066_v39 = vrot.slane %v1062_v14, 4  ;;  %v1051_v31 = vshrl.u32 %v6760_v16, 16  ;;  %v1054_v34 = vshll.u32 %v6760_v16, 16  ;;  %v1048_v37 = vor.u32 %v1046_v11, %v1045_v25  ;;  %v1284_v16 = vld [vmem:[#allocation2 + $0x74] sm:$0x1] }
 0x151   : > { %6998 = vmatprep.mubr.msk.bf16.mxu0 %vm1728_vm7, %v6372_v21  ;;  %v1049_v40 = vrot.slane %v1045_v25, 4  ;;  %v1070_v38 = vrot.slane %v1068_v27, 7  ;;  %v1236_v47 = vsel %vm7928_vm11, %v1065_v29, %v1235_v15  ;;  %v1472_v51 = vshll.u32 %v8180_v28, 16 }
 0x152   : > { %v1053_v48 = vrot.slane %v1051_v31, 7  ;;  %v1476_v44 = vshrl.u32 %v8180_v28, 16  ;;  %1237 = vst [vmem:[#allocation2 + $0xc0] sm:$0xf] %v1236_v47  ;;  %v1229_v55 = vsel %vm7928_vm11, %v1048_v37, %v1228_v30  ;;  %v1468_v59 = vrot.slane %v1466_v46, 5 }
 0x153   : > { %v1073_v50 = vor.u32 %v1071_v33, %v1070_v38  ;;  %v1075_v53 = vrot.slane %v1070_v38, 4  ;;  %1230 = vst [vmem:[#allocation2 + $0xb4] sm:$0xf] %v1229_v55  ;;  %v1474_v61 = vrot.slane %v1472_v51, 5  ;;  %v1482_v63 = vshll.u32 %v1282_v49, 16 }
 0x154   : > { %v1056_v52 = vor.u32 %v1054_v34, %v1053_v48  ;;  %v1058_v0 = vrot.slane %v1053_v48, 4  ;;  %v1478_v58 = vrot.slane %v1476_v44, 4  ;;  %v1469_v20 = vor.u32 %v1468_v59, %v1465_v18  ;;  %v8223_v31 = vld [vmem:[#allocation2 + $0x7c] sm:$0xf] }
 0x155   : > { %v1074_v6 = vsel %vm7935_vm12, %v1066_v39, %v1073_v50  ;;  %v1240_v7 = vsel %vm7941_vm13, %v1075_v53, %v1239_v45  ;;  %v1487_v4 = vshrl.u32 %v8192_v60, 16  ;;  %v1484_v43 = vrot.slane %v1482_v63, 5  ;;  %v1285_v45 = vld [vmem:[#allocation2 + $0x80] sm:$0x1] }
 0x156   : > { %1238 = vst.msk [vmem:[#allocation2 + $0xc4] sm:$0xf] %vm649_vm1, %v1074_v6  ;;  %1241 = vst [vmem:[#allocation2 + $0xc8] sm:$0x1] %v1240_v7  ;;  %v1057_v2 = vsel %vm7935_vm12, %v1049_v40, %v1056_v52  ;;  %v1233_v26 = vsel %vm7941_vm13, %v1058_v0, %v1232_v56  ;;  %v1479_v3 = vor.u32 %v1478_v58, %v1474_v61  ;;  %v1470_v8 = vrot.slane %v1469_v20, 4 }
 0x157   : > { %1231 = vst.msk [vmem:[#allocation2 + $0xb8] sm:$0xf] %vm649_vm1, %v1057_v2  ;;  %1234 = vst [vmem:[#allocation2 + $0xbc] sm:$0x1] %v1233_v26  ;;  %v1490_v9 = vshll.u32 %v8192_v60, 16  ;;  %v1496_v10 = vshll.u32 %v8194_v62, 16 }
 0x158   : > { %v1480_v32 = vrot.slane %v1479_v3, 4  ;;  %v1489_v17 = vrot.slane %v1487_v4, 4  ;;  %v1500_v11 = vshrl.u32 %v8194_v62, 16  ;;  %v1506_v23 = vshll.u32 %v1283_v1, 16  ;;  %v8237_v1 = vld [vmem:[#allocation2 + $0x88] sm:$0xf]  ;;  %vm8568_vm1 = vmor %vm2282_vm14, %vm2283_vm15 }
 0x159   : > { %v1475_v41 = vsel %vm7892_vm6, %v1470_v8, %v1474_v61  ;;  %v1492_v14 = vrot.slane %v1490_v9, 5  ;;  %v1498_v15 = vrot.slane %v1496_v10, 5  ;;  %v1511_v18 = vshrl.u32 %v8206_v5, 16  ;;  %v8232_v61 = vld [vmem:[#allocation2 + $0x84] sm:$0xf] }
 0x15a   : > { %v1485_v19 = vsel %vm7892_vm6, %v1480_v32, %v1484_v43  ;;  %v1502_v21 = vrot.slane %v1500_v11, 4  ;;  %v1508_v25 = vrot.slane %v1506_v23, 5  ;;  %v1514_v27 = vshll.u32 %v8206_v5, 16  ;;  %v1286_v10 = vld [vmem:[#allocation2 + $0x8c] sm:$0x1] }
 0x15b   : > { %v6373_v33 = vcombine.low %v1475_v41, %v1485_v19  ;;  %v1493_v29 = vor.u32 %v1492_v14, %v1489_v17  ;;  %v1513_v39 = vrot.slane %v1511_v18, 4  ;;  %v1520_v30 = vshll.u32 %v8212_v12, 16  ;;  %v8247_v14 = vld [vmem:[#allocation2 + $0x90] sm:$0xf] }
 0x15c   : > { %v1503_v34 = vor.u32 %v1502_v21, %v1498_v15  ;;  %v1516_v37 = vrot.slane %v1514_v27, 5  ;;  %v1524_v40 = vshrl.u32 %v8212_v12, 16  ;;  %v1530_v38 = vshll.u32 %v1284_v16, 16  ;;  %v8252_v21 = vld [vmem:[#allocation2 + $0x94] sm:$0xf] }
 0x15d   : > { %6999 = vmatmul.mubr.msk.bf16.gmra.mrb[44].mxu0 %vm1728_vm7, %v6373_v33  ;;  %v1494_v46 = vrot.slane %v1493_v29, 4  ;;  %v1522_v47 = vrot.slane %v1520_v30, 5  ;;  %v1535_v48 = vshrl.u32 %v8214_v13, 16  ;;  %v1538_v49 = vshll.u32 %v8214_v13, 16  ;;  %v7626_v58 = vld [vmem:[#allocation2 + $0xc0] sm:$0xff]  }
 0x15e   : > { %v1504_v51 = vrot.slane %v1503_v34, 4  ;;  %v1517_v44 = vor.u32 %v1516_v37, %v1513_v39  ;;  %v1526_v55 = vrot.slane %v1524_v40, 4  ;;  %v1532_v50 = vrot.slane %v1530_v38, 5  ;;  %v7625_v53 = vld [vmem:[#allocation2 + $0xb4] sm:$0xff]  }
 0x15f   : > { %v1499_v56 = vsel %vm7892_vm6, %v1494_v46, %v1498_v15  ;;  %v1537_v59 = vrot.slane %v1535_v48, 4  ;;  %v1540_v52 = vrot.slane %v1538_v49, 5  ;;  %v1544_v0 = vshll.u32 %v8223_v31, 16  ;;  %7116 = vmatprep.mubr.msk.bf16.mxu1 %vm1728_vm7, %v7625_v53  ;;  %v1287_v37 = vld [vmem:[#allocation2 + $0x98] sm:$0x1] }
 0x160   : > { %v1509_v6 = vsel %vm7892_vm6, %v1504_v51, %v1508_v25  ;;  %v1518_v7 = vrot.slane %v1517_v44, 4  ;;  %v1527_v20 = vor.u32 %v1526_v55, %v1522_v47  ;;  %v1548_v63 = vshrl.u32 %v8223_v31, 16  ;;  %7117 = vmatmul.mubr.msk.bf16.gmra.mrb[12].mxu1 %vm1728_vm7, %v7626_v58  ;;  %v8261_v48 = vld [vmem:[#allocation2 + $0x9c] sm:$0xf] }
 0x161   : > { %v6374_v2 = vcombine.low %v1499_v56, %v1509_v6  ;;  %v1541_v26 = vor.u32 %v1540_v52, %v1537_v59  ;;  %v1546_v3 = vrot.slane %v1544_v0, 5  ;;  %v1554_v4 = vshll.u32 %v1285_v45, 16 }
 0x162   : > { %v1523_v8 = vsel %vm7892_vm6, %v1518_v7, %v1522_v47  ;;  %v1528_v43 = vrot.slane %v1527_v20, 4  ;;  %v1550_v9 = vrot.slane %v1548_v63, 4  ;;  %v1559_v32 = vshrl.u32 %v8232_v61, 16  ;;  %v8268_v20 = vld [vmem:[#allocation2 + $0xa8] sm:$0xf] }
 0x163   : > { %7002 = vmatprep.mubr.msk.bf16.mxu0 %vm1728_vm7, %v6374_v2  ;;  %v1542_v17 = vrot.slane %v1541_v26, 4  ;;  %v1556_v11 = vrot.slane %v1554_v4, 5  ;;  %v1562_v23 = vshll.u32 %v8232_v61, 16  ;;  %v1568_v41 = vshll.u32 %v8237_v1, 16  ;;  %v1288_v26 = vld [vmem:[#allocation2 + $0xa4] sm:$0x1] }
 0x164   : > { %v1533_v15 = vsel %vm7892_vm6, %v1528_v43, %v1532_v50  ;;  %v1551_v16 = vor.u32 %v1550_v9, %v1546_v3  ;;  %v1561_v18 = vrot.slane %v1559_v32, 4  ;;  %v1572_v19 = vshrl.u32 %v8237_v1, 16  ;;  %v8265_v50 = vld [vmem:[#allocation2 + $0xa0] sm:$0xf]  ;;  %v8277_v32 = vld [vmem:[#allocation2 + $0xac] sm:$0xf] }
 0x165   : > { %v6375_v25 = vcombine.low %v1523_v8, %v1533_v15  ;;  %v1547_v27 = vsel %vm7892_vm6, %v1542_v17, %v1546_v3  ;;  %v1564_v33 = vrot.slane %v1562_v23, 5  ;;  %v1570_v29 = vrot.slane %v1568_v41, 5  ;;  %v3049_v15 = vld [vmem:[#allocation2 + $0xc] sm:$0xf] }
 0x166   : > { %v1552_v39 = vrot.slane %v1551_v16, 4  ;;  %v1574_v30 = vrot.slane %v1572_v19, 4  ;;  %v1578_v34 = vshll.u32 %v1286_v10, 16  ;;  %v1583_v40 = vshrl.u32 %v8247_v14, 16 }
 0x167   : > { %7003 = vmatmul.mubr.msk.bf16.gmra.mrb[48].mxu0 %vm1728_vm7, %v6375_v25  ;;  %v1565_v38 = vor.u32 %v1564_v33, %v1561_v18  ;;  %v1586_v45 = vshll.u32 %v8247_v14, 16  ;;  %v1592_v46 = vshll.u32 %v8252_v21, 16  ;;  %v1596_v47 = vshrl.u32 %v8252_v21, 16 }
 0x168   : > { %v1557_v49 = vsel %vm7892_vm6, %v1552_v39, %v1556_v11  ;;  %v1575_v51 = vor.u32 %v1574_v30, %v1570_v29  ;;  %v1580_v44 = vrot.slane %v1578_v34, 5  ;;  %v1585_v55 = vrot.slane %v1583_v40, 4 }
 0x169   : > { %v6376_v53 = vcombine.low %v1547_v27, %v1557_v49  ;;  %v1566_v56 = vrot.slane %v1565_v38, 4  ;;  %v1588_v59 = vrot.slane %v1586_v45, 5  ;;  %v1594_v52 = vrot.slane %v1592_v46, 5  ;;  %v8288_v45 = vld [vmem:[#allocation2 + $0x10] sm:$0xf] }
 0x16a   : > { %v1576_v0 = vrot.slane %v1575_v51, 4  ;;  %v1598_v58 = vrot.slane %v1596_v47, 4  ;;  %v1602_v6 = vshll.u32 %v1287_v37, 16  ;;  %v1607_v7 = vshrl.u32 %v8261_v48, 16 }
 0x16b   : > { %7006 = vmatprep.mubr.msk.bf16.mxu0 %vm1728_vm7, %v6376_v53  ;;  %v1571_v63 = vsel %vm7892_vm6, %v1566_v56, %v1570_v29  ;;  %v1589_v2 = vor.u32 %v1588_v59, %v1585_v55  ;;  %v1610_v3 = vshll.u32 %v8261_v48, 16  ;;  %v1616_v4 = vshll.u32 %v8265_v50, 16  ;;  %v1289_v29 = vld [vmem:[#allocation2 + $0xb0] sm:$0x1] }
 0x16c   : > { %v1581_v8 = vsel %vm7892_vm6, %v1576_v0, %v1580_v44  ;;  %v1599_v43 = vor.u32 %v1598_v58, %v1594_v52  ;;  %v1604_v9 = vrot.slane %v1602_v6, 5  ;;  %v1609_v10 = vrot.slane %v1607_v7, 4  ;;  %v8290_v44 = vld [vmem:[#allocation2 + $0x14] sm:$0x1] }
 0x16d   : > { %v6377_v17 = vcombine.low %v1571_v63, %v1581_v8  ;;  %v1590_v11 = vrot.slane %v1589_v2, 4  ;;  %v1612_v23 = vrot.slane %v1610_v3, 5  ;;  %v1618_v41 = vrot.slane %v1616_v4, 5  ;;  %v8297_v7 = vld [vmem:[#allocation2 + $0xb4] sm:$0xf] }
 0x16e   : > { %v1600_v16 = vrot.slane %v1599_v43, 4  ;;  %v1620_v18 = vshrl.u32 %v8265_v50, 16  ;;  %v1626_v19 = vshll.u32 %v1288_v26, 16  ;;  %v1631_v25 = vshrl.u32 %v8268_v20, 16  ;;  %v8299_v4 = vld [vmem:[#allocation2 + $0xb8] sm:$0xf] }
 0x16f   : > { %7007 = vmatmul.mubr.msk.bf16.gmra.mrb[52].mxu0 %vm1728_vm7, %v6377_v17  ;;  %v1595_v27 = vsel %vm7892_vm6, %v1590_v11, %v1594_v52  ;;  %v1613_v33 = vor.u32 %v1612_v23, %v1609_v10  ;;  %v1634_v39 = vshll.u32 %v8268_v20, 16  ;;  %v1640_v30 = vshll.u32 %v8277_v32, 16  ;;  %v1290_v17 = vld [vmem:[#allocation2 + $0xbc] sm:$0x1]  ;;  %v3052_v11 = vld [vmem:[#allocation2 + $0x18] sm:$0xf] }
 0x170   : > { %v1605_v34 = vsel %vm7892_vm6, %v1600_v16, %v1604_v9  ;;  %v1622_v37 = vrot.slane %v1620_v18, 4  ;;  %v1628_v40 = vrot.slane %v1626_v19, 5  ;;  %v1633_v38 = vrot.slane %v1631_v25, 4 }
 0x171   : > { %v6378_v46 = vcombine.low %v1595_v27, %v1605_v34  ;;  %v1614_v47 = vrot.slane %v1613_v33, 4  ;;  %v1636_v49 = vrot.slane %v1634_v39, 5  ;;  %v1642_v51 = vrot.slane %v1640_v30, 5  ;;  %v8309_v34 = vld [vmem:[#allocation2 + $0x1c] sm:$0xf] }
 0x172   : > { %v1623_v55 = vor.u32 %v1622_v37, %v1618_v41  ;;  %v1644_v53 = vshrl.u32 %v8277_v32, 16  ;;  %v1650_v56 = vshll.u32 %v1289_v29, 16  ;;  %v3098_v59 = vshrl.u32 %v3049_v15, 16 }
 0x173   : > { %7010 = vmatprep.mubr.msk.bf16.mxu0 %vm1728_vm7, %v6378_v46  ;;  %v1619_v52 = vsel %vm7892_vm6, %v1614_v47, %v1618_v41  ;;  %v1637_v0 = vor.u32 %v1636_v49, %v1633_v38  ;;  %v3101_v58 = vshll.u32 %v3049_v15, 16  ;;  %v3107_v6 = vshll.u32 %v8288_v45, 16  ;;  %v8314_v47 = vld [vmem:[#allocation2 + $0x20] sm:$0x1] }
 0x174   : > { %v1624_v63 = vrot.slane %v1623_v55, 4  ;;  %v1646_v2 = vrot.slane %v1644_v53, 4  ;;  %v1652_v26 = vrot.slane %v1650_v56, 5  ;;  %v3100_v3 = vrot.slane %v3098_v59, 4 }
 0x175   : > { %v1638_v8 = vrot.slane %v1637_v0, 4  ;;  %v3103_v43 = vrot.slane %v3101_v58, 5  ;;  %v3109_v9 = vrot.slane %v3107_v6, 5  ;;  %v3111_v10 = vshrl.u32 %v8288_v45, 16  ;;  %v3055_v58 = vld [vmem:[#allocation2 + $0x24] sm:$0xf] }
 0x176   : > { %v1629_v23 = vsel %vm7892_vm6, %v1624_v63, %v1628_v40  ;;  %v1647_v41 = vor.u32 %v1646_v2, %v1642_v51  ;;  %v3117_v15 = vshll.u32 %v8290_v44, 16  ;;  %v1655_v16 = vshrl.u32 %v8297_v7, 16 }
 0x177   : > { %v6379_v18 = vcombine.low %v1619_v52, %v1629_v23  ;;  %v1643_v19 = vsel %vm7892_vm6, %v1638_v8, %v1642_v51  ;;  %v3104_v25 = vor.u32 %v3103_v43, %v3100_v3  ;;  %v3113_v27 = vrot.slane %v3111_v10, 4  ;;  %v8320_v8 = vld [vmem:[#allocation2 + $0x28] sm:$0xf] }
 0x178   : > { %v1648_v33 = vrot.slane %v1647_v41, 4  ;;  %v3119_v29 = vrot.slane %v3117_v15, 5  ;;  %v1657_v39 = vrot.slane %v1655_v16, 4  ;;  %v1658_v30 = vshll.u32 %v8297_v7, 16 }
 0x179   : > { %7011 = vmatmul.mubr.msk.bf16.gmra.mrb[56].mxu0 %vm1728_vm7, %v6379_v18  ;;  %v3105_v37 = vrot.slane %v3104_v25, 4  ;;  %v3114_v40 = vor.u32 %v3113_v27, %v3109_v9  ;;  %v1664_v38 = vshll.u32 %v8299_v4, 16  ;;  %v1668_v46 = vshrl.u32 %v8299_v4, 16  ;;  %v8330_v27 = vld [vmem:[#allocation2 + $0x2c] sm:$0x1] }
 0x17a   : > { %v1653_v49 = vsel %vm7892_vm6, %v1648_v33, %v1652_v26  ;;  %v1660_v51 = vrot.slane %v1658_v30, 5  ;;  %v1674_v55 = vshll.u32 %v1290_v17, 16  ;;  %v3122_v53 = vshrl.u32 %v3052_v11, 16 }
 0x17b   : > { %v6380_v56 = vcombine.low %v1643_v19, %v1653_v49  ;;  %v3110_v59 = vsel %vm7892_vm6, %v3105_v37, %v3109_v9  ;;  %v3115_v52 = vrot.slane %v3114_v40, 4  ;;  %v1666_v0 = vrot.slane %v1664_v38, 5 }
 0x17c   : > { %v1661_v6 = vor.u32 %v1660_v51, %v1657_v39  ;;  %v1670_v63 = vrot.slane %v1668_v46, 4  ;;  %v1676_v2 = vrot.slane %v1674_v55, 5  ;;  %v3124_v3 = vrot.slane %v3122_v53, 4  ;;  %v3058_v46 = vld [vmem:[#allocation2 + $0x30] sm:$0xf] }
 0x17d   : > { %7014 = vmatprep.mubr.msk.bf16.mxu0 %vm1728_vm7, %v6380_v56  ;;  %v3120_v26 = vsel %vm7892_vm6, %v3115_v52, %v3119_v29  ;;  %v3125_v43 = vshll.u32 %v3052_v11, 16  ;;  %v3131_v10 = vshll.u32 %v8309_v34, 16  ;;  %v3135_v17 = vshrl.u32 %v8309_v34, 16  ;;  %v8340_v53 = vld [vmem:[#allocation2 + $0x34] sm:$0xf] }
 0x17e   : > { %v6513_v9 = vcombine.low %v3110_v59, %v3120_v26  ;;  %v1662_v23 = vrot.slane %v1661_v6, 4  ;;  %v1671_v41 = vor.u32 %v1670_v63, %v1666_v0  ;;  %v3141_v15 = vshll.u32 %v8314_v47, 16  ;;  %v8342_v6 = vld [vmem:[#allocation2 + $0x38] sm:$0x1] }
 0x17f   : > { %v3127_v16 = vrot.slane %v3125_v43, 5  ;;  %v3133_v18 = vrot.slane %v3131_v10, 5  ;;  %v3137_v19 = vrot.slane %v3135_v17, 4  ;;  %v4050_v25 = vsel %vm1777_vm3, %v8095_v35, 0  ;;  %v8351_v43 = vld [vmem:[%s9658_s3 + $0x4] sm:$0x3] }
 0x180   : > { %7122 = vmatprep.mubr.msk.bf16.mxu1 %vm1728_vm7, %v6513_v9  ;;  %v1667_v11 = vsel %vm7892_vm6, %v1662_v23, %v1666_v0  ;;  %v1672_v33 = vrot.slane %v1671_v41, 4  ;;  %v3143_v29 = vrot.slane %v3141_v15, 5  ;;  %v3146_v39 = vshrl.u32 %v3055_v58, 16  ;;  %v7678_v23 = vld [vmem:[#allocation2] sm:$0xf] }
 0x181   : > { %v3128_v30 = vor.u32 %v3127_v16, %v3124_v3  ;;  %v3138_v37 = vor.u32 %v3137_v19, %v3133_v18  ;;  %v3149_v40 = vshll.u32 %v3055_v58, 16  ;;  %v3155_v38 = vshll.u32 %v8320_v8, 16  ;;  %v8358_v41 = vld [vmem:[#allocation2 + $0x4] sm:$0xf] }
 0x182   : > { %v1677_v49 = vsel %vm7892_vm6, %v1672_v33, %v1676_v2  ;;  %v3148_v35 = vrot.slane %v3146_v39, 4  ;;  %v3159_v51 = vshrl.u32 %v8320_v8, 16  ;;  %v3165_v55 = vshll.u32 %v8330_v27, 16  ;;  %v7677_v2 = vld [vmem:[%s9658_s3] sm:$0x3] }
 0x183   : > { %v6381_v56 = vcombine.low %v1667_v11, %v1677_v49  ;;  %v3129_v59 = vrot.slane %v3128_v30, 4  ;;  %v3139_v52 = vrot.slane %v3138_v37, 4  ;;  %v3151_v0 = vrot.slane %v3149_v40, 5  ;;  %v7680_v11 = vld [vmem:[#allocation2 + $0xc] sm:$0xf] }
 0x184   : > { %v3157_v58 = vrot.slane %v3155_v38, 5  ;;  %v3161_v63 = vrot.slane %v3159_v51, 4  ;;  %v3167_v3 = vrot.slane %v3165_v55, 5  ;;  %v2071_v26 = vsel %vm1777_vm3, %v7677_v2, 0  ;;  %v8361_v33 = vld [vmem:[#allocation2 + $0x10] sm:$0xf] }
 0x185   : > { %7015 = vmatmul.mubr.msk.bf16.gmra.mrb[60].mxu0 %vm1728_vm7, %v6381_v56  ;;  %v3134_v10 = vsel %vm7892_vm6, %v3129_v59, %v3133_v18  ;;  %v3144_v17 = vsel %vm7892_vm6, %v3139_v52, %v3143_v29  ;;  %v3152_v9 = vor.u32 %v3151_v0, %v3148_v35  ;;  %v6398_v15 = vcombine.low %v7678_v23, %v8358_v41  ;;  %v3061_v37 = vld [vmem:[#allocation2 + $0x3c] sm:$0xf]  ;;  %v8370_v49 = vld [vmem:[%s9658_s3 + $0xc] sm:$0x3]  ;;  %v7682_v56 = vld [vmem:[#allocation2 + $0x18] sm:$0xf] }
 0x186   : > { %v6514_v16 = vcombine.low %v3134_v10, %v3144_v17  ;;  %v3162_v19 = vor.u32 %v3161_v63, %v3157_v58  ;;  %7019 = vmatpush3.bf16.msra.mxu0 %v2071_v26  ;;  %v6399_v39 = vcombine.low %v7680_v11, %v8361_v33  ;;  %v3170_v30 = vshrl.u32 %v3058_v46, 16  ;;  %v8379_v52 = vld [vmem:[#allocation2 + $0x40] sm:$0xf]  ;;  %v8383_v10 = vld [vmem:[#allocation2 + $0x44] sm:$0x1] }
 0x187   : > { %v3153_v18 = vrot.slane %v3152_v9, 4  ;;  %7020 = vmatprep.mubr.msk.bf16.mxu0 %vm1728_vm7, %v6398_v15  ;;  %v3173_v29 = vshll.u32 %v3058_v46, 16  ;;  %v3179_v40 = vshll.u32 %v8340_v53, 16  ;;  %v3183_v38 = vshrl.u32 %v8340_v53, 16  ;;  %7584 = vmatprep.subr.msk.bf16.mxu0 %vm1777_vm3, %v8351_v43  ;;  %v8376_v46 = vld [vmem:[#allocation2 + $0x1c] sm:$0xf] }
 0x188   : > { %7123 = vmatmul.mubr.msk.bf16.vlgmr.msra.gmra.mrb[16].mxu1 %vm1728_vm7, %v6514_v16  ;;  %v3163_v35 = vrot.slane %v3162_v19, 4  ;;  %v3172_v51 = vrot.slane %v3170_v30, 4  ;;  %v3189_v55 = vshll.u32 %v8342_v6, 16  ;;  %v6400_v59 = vcombine.low %v7682_v56, %v8376_v46  ;;  %9694 = vst [vmem:[#allocation4_spill] sm:$0xff] %v8383_v10 }
 0x189   : > { %7155 = vmatpush3.bf16.msra.mxu1 %v4050_v25  ;;  %v3158_v0 = vsel %vm7892_vm6, %v3153_v18, %v3157_v58  ;;  %v3175_v63 = vrot.slane %v3173_v29, 5  ;;  %v3181_v2 = vrot.slane %v3179_v40, 5  ;;  %v3185_v26 = vrot.slane %v3183_v38, 4  ;;  %v3064_v58 = vld [vmem:[#allocation2 + $0x48] sm:$0xf] }
 0x18a   : > { %v3168_v17 = vsel %vm7892_vm6, %v3163_v35, %v3167_v3  ;;  %v3191_v9 = vrot.slane %v3189_v55, 5  ;;  %v3194_v23 = vshrl.u32 %v3061_v37, 16  ;;  %v3197_v15 = vshll.u32 %v3061_v37, 16  ;;  %7589 = vmatprep.subr.msk.bf16.mxu1 %vm1777_vm3, %v8370_v49  ;;  %v8392_v38 = vld [vmem:[#allocation2 + $0x4c] sm:$0xf] }
 0x18b   : > { %v6515_v16 = vcombine.low %v3158_v0, %v3168_v17  ;;  %v3176_v19 = vor.u32 %v3175_v63, %v3172_v51  ;;  %v3186_v25 = vor.u32 %v3185_v26, %v3181_v2  ;;  %v3203_v11 = vshll.u32 %v8379_v52, 16  ;;  %v7684_v51 = vld [vmem:[#allocation2 + $0x24] sm:$0xf]  ;;  %v8396_v55 = vld [vmem:[#allocation2 + $0x28] sm:$0xf] }
 0x18c   : > { %v3196_v30 = vrot.slane %v3194_v23, 4  ;;  %v3199_v18 = vrot.slane %v3197_v15, 5  ;;  %v3207_v29 = vshrl.u32 %v8379_v52, 16  ;;  %v3213_v40 = vshll.u32 %v8383_v10, 16  ;;  %v8400_v17 = vld [vmem:[#allocation2 + $0x50] sm:$0x1] }
 0x18d   : > { %7126 = vmatprep.mubr.msk.bf16.mxu1 %vm1728_vm7, %v6515_v16  ;;  %7021 = vmatmul.mubr.msk.bf16.vlgmr.msra.gmra.mrb[32].mxu0 %vm1728_vm7, %v6399_v39  ;;  %v3177_v3 = vrot.slane %v3176_v19, 4  ;;  %v3187_v37 = vrot.slane %v3186_v25, 4  ;;  %v3205_v35 = vrot.slane %v3203_v11, 5  ;;  %v6401_v56 = vcombine.low %v7684_v51, %v8396_v55  ;;  %9695 = vst [vmem:[#allocation5_spill] sm:$0xff] %v8400_v17  ;;  %v3067_v25 = vld [vmem:[#allocation2 + $0x54] sm:$0xf] }
 0x18e   : > { %7024 = vmatprep.mubr.msk.bf16.mxu0 %vm1728_vm7, %v6400_v59  ;;  %v3200_v0 = vor.u32 %v3199_v18, %v3196_v30  ;;  %v3209_v63 = vrot.slane %v3207_v29, 4  ;;  %v3215_v26 = vrot.slane %v3213_v40, 5  ;;  %v3218_v23 = vshrl.u32 %v3064_v58, 16  ;;  %v8409_v10 = vld [vmem:[#allocation2 + $0x58] sm:$0xf] }
 0x18f   : > { %v3182_v15 = vsel %vm7892_vm6, %v3177_v3, %v3181_v2  ;;  %v3192_v39 = vsel %vm7892_vm6, %v3187_v37, %v3191_v9  ;;  %v3221_v16 = vshll.u32 %v3064_v58, 16  ;;  %v3227_v19 = vshll.u32 %v8392_v38, 16  ;;  %9696 = vst [vmem:[#allocation6_spill] sm:$0xff] %v8409_v10  ;;  %v7686_v58 = vld [vmem:[#allocation2 + $0x30] sm:$0xf] }
 0x190   : > { %v6516_v11 = vcombine.low %v3182_v15, %v3192_v39  ;;  %v3201_v51 = vrot.slane %v3200_v0, 4  ;;  %v3210_v42 = vor.u32 %v3209_v63, %v3205_v35  ;;  %v3220_v59 = vrot.slane %v3218_v23, 4  ;;  %v8414_v3 = vld [vmem:[#allocation2 + $0x34] sm:$0xf]  ;;  %v8417_v39 = vld [vmem:[#allocation2 + $0x5c] sm:$0x1] }
 0x191   : > { %v3223_v30 = vrot.slane %v3221_v16, 5  ;;  %v3229_v18 = vrot.slane %v3227_v19, 5  ;;  %v3231_v29 = vshrl.u32 %v8392_v38, 16  ;;  %v3237_v40 = vshll.u32 %v8400_v17, 16  ;;  %9697 = vst [vmem:[#allocation7_spill] sm:$0xff] %v8414_v3  ;;  %9698 = vst [vmem:[#allocation8_spill] sm:$0xff] %v8417_v39 }
 0x192   : > { %7127 = vmatmul.mubr.msk.bf16.gmra.mrb[20].mxu1 %vm1728_vm7, %v6516_v11  ;;  %v3206_v2 = vsel %vm7892_vm6, %v3201_v51, %v3205_v35  ;;  %v3211_v9 = vrot.slane %v3210_v42, 4  ;;  %v6402_v37 = vcombine.low %v7686_v58, %v8414_v3  ;;  %v3242_v0 = vshrl.u32 %v3067_v25, 16  ;;  %v3070_v35 = vld [vmem:[#allocation2 + $0x60] sm:$0xf] }
 0x193   : > { %v3224_v63 = vor.u32 %v3223_v30, %v3220_v59  ;;  %v3233_v23 = vrot.slane %v3231_v29, 4  ;;  %v3239_v15 = vrot.slane %v3237_v40, 5  ;;  %v3245_v16 = vshll.u32 %v3067_v25, 16  ;;  %v8424_v30 = vld [vmem:[#allocation2 + $0x64] sm:$0xf] }
 0x194   : > { %v3216_v19 = vsel %vm7892_vm6, %v3211_v9, %v3215_v26  ;;  %v3244_v11 = vrot.slane %v3242_v0, 4  ;;  %v3251_v17 = vshll.u32 %v8409_v10, 16  ;;  %v3255_v42 = vshrl.u32 %v8409_v10, 16  ;;  %v7688_v40 = vld [vmem:[#allocation2 + $0x3c] sm:$0xf] }
 0x195   : > { %v6517_v51 = vcombine.low %v3206_v2, %v3216_v19  ;;  %7025 = vmatmul.mubr.msk.bf16.gmra.mrb[36].mxu0 %vm1728_vm7, %v6401_v56  ;;  %v3225_v58 = vrot.slane %v3224_v63, 4  ;;  %v3234_v3 = vor.u32 %v3233_v23, %v3229_v18  ;;  %v3247_v59 = vrot.slane %v3245_v16, 5  ;;  %v8432_v19 = vld [vmem:[#allocation2 + $0x68] sm:$0x1] }
 0x196   : > { %7028 = vmatprep.mubr.msk.bf16.mxu0 %vm1728_vm7, %v6402_v37  ;;  %v3253_v25 = vrot.slane %v3251_v17, 5  ;;  %v3257_v29 = vrot.slane %v3255_v42, 4  ;;  %v3261_v26 = vshll.u32 %v8417_v39, 16  ;;  %v6403_v9 = vcombine.low %v7688_v40, %v8132_v57  ;;  %v3073_v40 = vld [vmem:[#allocation2 + $0x6c] sm:$0xf] }
 0x197   : > { %7130 = vmatprep.mubr.msk.bf16.mxu1 %vm1728_vm7, %v6517_v51  ;;  %v3230_v2 = vsel %vm7892_vm6, %v3225_v58, %v3229_v18  ;;  %v3235_v56 = vrot.slane %v3234_v3, 4  ;;  %v3248_v0 = vor.u32 %v3247_v59, %v3244_v11  ;;  %v3266_v63 = vshrl.u32 %v3070_v35, 16  ;;  %v8438_v58 = vld [vmem:[#allocation2 + $0x70] sm:$0xf] }
 0x198   : > { %v3258_v23 = vor.u32 %v3257_v29, %v3253_v25  ;;  %v3263_v16 = vrot.slane %v3261_v26, 5  ;;  %v3269_v37 = vshll.u32 %v3070_v35, 16  ;;  %v3275_v17 = vshll.u32 %v8424_v30, 16 }
 0x199   : > { %v3240_v42 = vsel %vm7892_vm6, %v3235_v56, %v3239_v15  ;;  %v3249_v39 = vrot.slane %v3248_v0, 4  ;;  %v3268_v57 = vrot.slane %v3266_v63, 4  ;;  %v3279_v51 = vshrl.u32 %v8424_v30, 16  ;;  %v8448_v56 = vld [vmem:[#allocation2 + $0x74] sm:$0x1] }
 0x19a   : > { %v6518_v10 = vcombine.low %v3230_v2, %v3240_v42  ;;  %v3259_v18 = vrot.slane %v3258_v23, 4  ;;  %v3271_v3 = vrot.slane %v3269_v37, 5  ;;  %v3277_v11 = vrot.slane %v3275_v17, 5  ;;  %9699 = vst [vmem:[#allocation9_spill] sm:$0xff] %v8448_v56  ;;  %v3076_v17 = vld [vmem:[#allocation2 + $0x78] sm:$0xf] }
 0x19b   : > { %v3254_v59 = vsel %vm7892_vm6, %v3249_v39, %v3253_v25  ;;  %v3281_v35 = vrot.slane %v3279_v51, 4  ;;  %v3285_v29 = vshll.u32 %v8432_v19, 16  ;;  %v6404_v15 = vcombine.low %v8143_v22, %v8145_v24 }
 0x19c   : > { %7131 = vmatmul.mubr.msk.bf16.gmra.mrb[24].mxu1 %vm1728_vm7, %v6518_v10  ;;  %v3264_v26 = vsel %vm7892_vm6, %v3259_v18, %v3263_v16  ;;  %v3272_v2 = vor.u32 %v3271_v3, %v3268_v57  ;;  %v3290_v0 = vshrl.u32 %v3073_v40, 16  ;;  %v3293_v63 = vshll.u32 %v3073_v40, 16  ;;  %v8454_v16 = vld [vmem:[#allocation2 + $0x7c] sm:$0xf] }
 0x19d   : > { %v6519_v23 = vcombine.low %v3254_v59, %v3264_v26  ;;  %7029 = vmatmul.mubr.msk.bf16.gmra.mrb[40].mxu0 %vm1728_vm7, %v6403_v9  ;;  %v3282_v39 = vor.u32 %v3281_v35, %v3277_v11  ;;  %v3287_v25 = vrot.slane %v3285_v29, 5  ;;  %v3299_v37 = vshll.u32 %v8438_v58, 16  ;;  %v8462_v35 = vld [vmem:[#allocation2 + $0x80] sm:$0x1] }
 0x19e   : > { %v3273_v42 = vrot.slane %v3272_v2, 4  ;;  %7032 = vmatprep.mubr.msk.bf16.mxu0 %vm1728_vm7, %v6404_v15  ;;  %v3292_v22 = vrot.slane %v3290_v0, 4  ;;  %v3295_v24 = vrot.slane %v3293_v63, 5  ;;  %v3303_v10 = vshrl.u32 %v8438_v58, 16  ;;  %v3079_v63 = vld [vmem:[#allocation2 + $0x84] sm:$0xf] }
 0x19f   : > { %7134 = vmatprep.mubr.msk.bf16.mxu1 %vm1728_vm7, %v6519_v23  ;;  %v3283_v57 = vrot.slane %v3282_v39, 4  ;;  %v3301_v51 = vrot.slane %v3299_v37, 5  ;;  %v3309_v9 = vshll.u32 %v8448_v56, 16  ;;  %v6405_v40 = vcombine.low %v8168_v54, %v8180_v28 }
 0x1a0   : > { %v3278_v18 = vsel %vm7892_vm6, %v3273_v42, %v3277_v11  ;;  %v3296_v3 = vor.u32 %v3295_v24, %v3292_v22  ;;  %v3305_v59 = vrot.slane %v3303_v10, 4  ;;  %v3314_v29 = vshrl.u32 %v3076_v17, 16  ;;  %v8469_v22 = vld [vmem:[#allocation2 + $0x88] sm:$0xf] }
 0x1a1   : > { %v3288_v15 = vsel %vm7892_vm6, %v3283_v57, %v3287_v25  ;;  %v3311_v26 = vrot.slane %v3309_v9, 5  ;;  %v3317_v2 = vshll.u32 %v3076_v17, 16  ;;  %v3323_v0 = vshll.u32 %v8454_v16, 16 }
 0x1a2   : > { %v6520_v23 = vcombine.low %v3278_v18, %v3288_v15  ;;  %v3297_v39 = vrot.slane %v3296_v3, 4  ;;  %v3306_v37 = vor.u32 %v3305_v59, %v3301_v51  ;;  %v3316_v54 = vrot.slane %v3314_v29, 4  ;;  %v8477_v3 = vld [vmem:[#allocation2 + $0x8c] sm:$0x1] }
 0x1a3   : > { %v3319_v28 = vrot.slane %v3317_v2, 5  ;;  %v3325_v56 = vrot.slane %v3323_v0, 5  ;;  %v3327_v11 = vshrl.u32 %v8454_v16, 16  ;;  %v3333_v42 = vshll.u32 %v8462_v35, 16 }
 0x1a4   : > { %7135 = vmatmul.mubr.msk.bf16.gmra.mrb[28].mxu1 %vm1728_vm7, %v6520_v23  ;;  %v3302_v25 = vsel %vm7892_vm6, %v3297_v39, %v3301_v51  ;;  %v3307_v17 = vrot.slane %v3306_v37, 4  ;;  %v6406_v24 = vcombine.low %v8192_v60, %v8194_v62  ;;  %v3338_v10 = vshrl.u32 %v3079_v63, 16  ;;  %v3082_v60 = vld [vmem:[#allocation2 + $0x90] sm:$0xf]  ;;  %v8484_v39 = vld [vmem:[#allocation2 + $0x94] sm:$0xf] }
 0x1a5   : > { %7033 = vmatmul.mubr.msk.bf16.gmra.mrb[44].mxu0 %vm1728_vm7, %v6405_v40  ;;  %v3320_v57 = vor.u32 %v3319_v28, %v3316_v54  ;;  %v3329_v9 = vrot.slane %v3327_v11, 4  ;;  %v3335_v18 = vrot.slane %v3333_v42, 5  ;;  %v3341_v59 = vshll.u32 %v3079_v63, 16 }
 0x1a6   : > { %v3312_v29 = vsel %vm7892_vm6, %v3307_v17, %v3311_v26  ;;  %7036 = vmatprep.mubr.msk.bf16.mxu0 %vm1728_vm7, %v6406_v24  ;;  %v3340_v15 = vrot.slane %v3338_v10, 4  ;;  %v3347_v51 = vshll.u32 %v8469_v22, 16  ;;  %v3351_v2 = vshrl.u32 %v8469_v22, 16  ;;  %v8492_v10 = vld [vmem:[#allocation2 + $0x98] sm:$0x1] }
 0x1a7   : > { %v6521_v62 = vcombine.low %v3302_v25, %v3312_v29  ;;  %v3321_v0 = vrot.slane %v3320_v57, 4  ;;  %v3330_v40 = vor.u32 %v3329_v9, %v3325_v56  ;;  %v3343_v23 = vrot.slane %v3341_v59, 5 }
 0x1a8   : > { %v3349_v37 = vrot.slane %v3347_v51, 5  ;;  %v3353_v54 = vrot.slane %v3351_v2, 4  ;;  %v3357_v63 = vshll.u32 %v8477_v3, 16  ;;  %v6407_v26 = vcombine.low %v8206_v5, %v8212_v12  ;;  %v3085_v51 = vld [vmem:[#allocation2 + $0x9c] sm:$0xf] }
 0x1a9   : > { %7138 = vmatprep.mubr.msk.bf16.mxu1 %vm1728_vm7, %v6521_v62  ;;  %v3326_v28 = vsel %vm7892_vm6, %v3321_v0, %v3325_v56  ;;  %v3331_v11 = vrot.slane %v3330_v40, 4  ;;  %v3344_v42 = vor.u32 %v3343_v23, %v3340_v15  ;;  %v3362_v25 = vshrl.u32 %v3082_v60, 16  ;;  %v8498_v0 = vld [vmem:[#allocation2 + $0xa0] sm:$0xf] }
 0x1aa   : > { %v3354_v17 = vor.u32 %v3353_v54, %v3349_v37  ;;  %v3359_v24 = vrot.slane %v3357_v63, 5  ;;  %v3365_v57 = vshll.u32 %v3082_v60, 16  ;;  %v3371_v9 = vshll.u32 %v8484_v39, 16 }
 0x1ab   : > { %v3336_v59 = vsel %vm7892_vm6, %v3331_v11, %v3335_v18  ;;  %v3345_v29 = vrot.slane %v3344_v42, 4  ;;  %v3364_v5 = vrot.slane %v3362_v25, 4  ;;  %v3375_v12 = vshrl.u32 %v8484_v39, 16 }
 0x1ac   : > { %v6522_v2 = vcombine.low %v3326_v28, %v3336_v59  ;;  %v3355_v56 = vrot.slane %v3354_v17, 4  ;;  %v3367_v62 = vrot.slane %v3365_v57, 5  ;;  %v3373_v15 = vrot.slane %v3371_v9, 5  ;;  %v8509_v28 = vld [vmem:[#allocation2 + $0xa4] sm:$0x1] }
 0x1ad   : > { %v3350_v40 = vsel %vm7892_vm6, %v3345_v29, %v3349_v37  ;;  %7037 = vmatmul.mubr.msk.bf16.gmra.mrb[48].mxu0 %vm1728_vm7, %v6407_v26  ;;  %v3377_v60 = vrot.slane %v3375_v12, 4  ;;  %v3381_v23 = vshll.u32 %v8492_v10, 16  ;;  %v6408_v18 = vcombine.low %v8214_v13, %v8223_v31  ;;  %v3088_v57 = vld [vmem:[#allocation2 + $0xa8] sm:$0xf]  ;;  %v8514_v29 = vld [vmem:[#allocation2 + $0xac] sm:$0xf] }
 0x1ae   : > { %7139 = vmatmul.mubr.msk.bf16.gmra.mrb[0].mxu1 %vm1728_vm7, %v6522_v2  ;;  %v3360_v54 = vsel %vm7892_vm6, %v3355_v56, %v3359_v24  ;;  %v3368_v63 = vor.u32 %v3367_v62, %v3364_v5  ;;  %v3386_v11 = vshrl.u32 %v3085_v51, 16  ;;  %v3389_v42 = vshll.u32 %v3085_v51, 16 }
 0x1af   : > { %v6523_v25 = vcombine.low %v3350_v40, %v3360_v54  ;;  %v3378_v37 = vor.u32 %v3377_v60, %v3373_v15  ;;  %v3383_v17 = vrot.slane %v3381_v23, 5  ;;  %7040 = vmatprep.mubr.msk.bf16.mxu0 %vm1728_vm7, %v6408_v18  ;;  %v3395_v26 = vshll.u32 %v8498_v0, 16  ;;  %v8522_v40 = vld [vmem:[#allocation2 + $0xb0] sm:$0x1] }
 0x1b0   : > { %v3369_v9 = vrot.slane %v3368_v63, 4  ;;  %v3388_v13 = vrot.slane %v3386_v11, 4  ;;  %v3391_v31 = vrot.slane %v3389_v42, 5  ;;  %v3399_v59 = vshrl.u32 %v8498_v0, 16  ;;  %v3091_v11 = vld [vmem:[#allocation2 + $0xb4] sm:$0xf] }
 0x1b1   : > { %7142 = vmatprep.mubr.msk.bf16.mxu1 %vm1728_vm7, %v6523_v25  ;;  %v3379_v24 = vrot.slane %v3378_v37, 4  ;;  %v3397_v5 = vrot.slane %v3395_v26, 5  ;;  %v3405_v12 = vshll.u32 %v8509_v28, 16  ;;  %v6409_v51 = vcombine.low %v8232_v61, %v8237_v1 }
 0x1b2   : > { %v3374_v2 = vsel %vm7892_vm6, %v3369_v9, %v3373_v15  ;;  %v3392_v56 = vor.u32 %v3391_v31, %v3388_v13  ;;  %v3401_v62 = vrot.slane %v3399_v59, 4  ;;  %v3410_v60 = vshrl.u32 %v3088_v57, 16  ;;  %v8530_v13 = vld [vmem:[#allocation2 + $0xb8] sm:$0xf] }
 0x1b3   : > { %v3384_v23 = vsel %vm7892_vm6, %v3379_v24, %v3383_v17  ;;  %v3407_v18 = vrot.slane %v3405_v12, 5  ;;  %v3413_v54 = vshll.u32 %v3088_v57, 16  ;;  %v3419_v63 = vshll.u32 %v8514_v29, 16 }
 0x1b4   : > { %v6524_v42 = vcombine.low %v3374_v2, %v3384_v23  ;;  %v3393_v25 = vrot.slane %v3392_v56, 4  ;;  %v3402_v37 = vor.u32 %v3401_v62, %v3397_v5  ;;  %v3412_v61 = vrot.slane %v3410_v60, 4  ;;  %v8537_v2 = vld [vmem:[#allocation2 + $0xbc] sm:$0x1] }
 0x1b5   : > { %7041 = vmatmul.mubr.msk.bf16.gmra.mrb[52].mxu0 %vm1728_vm7, %v6409_v51  ;;  %v3415_v1 = vrot.slane %v3413_v54, 5  ;;  %v3421_v15 = vrot.slane %v3419_v63, 5  ;;  %v3423_v26 = vshrl.u32 %v8514_v29, 16  ;;  %v3429_v9 = vshll.u32 %v8522_v40, 16  ;;  %v3094_v54 = vld [vmem:[#allocation2 + $0xc0] sm:$0xf] }
 0x1b6   : > { %7143 = vmatmul.mubr.msk.bf16.gmra.mrb[4].mxu1 %vm1728_vm7, %v6524_v42  ;;  %v3398_v17 = vsel %vm7892_vm6, %v3393_v25, %v3397_v5  ;;  %v3403_v57 = vrot.slane %v3402_v37, 4  ;;  %v6410_v31 = vcombine.low %v8247_v14, %v8252_v21  ;;  %v3434_v59 = vshrl.u32 %v3091_v11, 16  ;;  %v8544_v25 = vld [vmem:[#allocation2 + $0xc4] sm:$0xf] }
 0x1b7   : > { %v3416_v24 = vor.u32 %v3415_v1, %v3412_v61  ;;  %v3425_v12 = vrot.slane %v3423_v26, 4  ;;  %v3431_v51 = vrot.slane %v3429_v9, 5  ;;  %v3437_v56 = vshll.u32 %v3091_v11, 16 }
 0x1b8   : > { %v3408_v62 = vsel %vm7892_vm6, %v3403_v57, %v3407_v18  ;;  %7044 = vmatprep.mubr.msk.bf16.mxu0 %vm1728_vm7, %v6410_v31  ;;  %v3436_v60 = vrot.slane %v3434_v59, 4  ;;  %v3443_v23 = vshll.u32 %v8530_v13, 16  ;;  %v3447_v5 = vshrl.u32 %v8530_v13, 16  ;;  %v8552_v59 = vld [vmem:[#allocation2 + $0xc8] sm:$0x1] }
 0x1b9   : > { %v6525_v63 = vcombine.low %v3398_v17, %v3408_v62  ;;  %v3417_v14 = vrot.slane %v3416_v24, 4  ;;  %v3426_v21 = vor.u32 %v3425_v12, %v3421_v15  ;;  %v3439_v42 = vrot.slane %v3437_v56, 5 }
 0x1ba   : > { %v3445_v37 = vrot.slane %v3443_v23, 5  ;;  %v3449_v61 = vrot.slane %v3447_v5, 4  ;;  %v3453_v11 = vshll.u32 %v8537_v2, 16  ;;  %v6411_v18 = vcombine.low %v8261_v48, %v8265_v50 }
 0x1bb   : > { %7146 = vmatprep.mubr.msk.bf16.mxu1 %vm1728_vm7, %v6525_v63  ;;  %v3422_v1 = vsel %vm7892_vm6, %v3417_v14, %v3421_v15  ;;  %v3427_v26 = vrot.slane %v3426_v21, 4  ;;  %v3440_v9 = vor.u32 %v3439_v42, %v3436_v60  ;;  %v3458_v17 = vshrl.u32 %v3094_v54, 16 }
 0x1bc   : > { %v3450_v57 = vor.u32 %v3449_v61, %v3445_v37  ;;  %v3455_v31 = vrot.slane %v3453_v11, 5  ;;  %v3461_v24 = vshll.u32 %v3094_v54, 16  ;;  %v3467_v12 = vshll.u32 %v8544_v25, 16  ;;  %v3775_v61 = vld [vmem:[#allocation2 + $0xc] sm:$0xe] }
 0x1bd   : > { %v3432_v56 = vsel %vm7892_vm6, %v3427_v26, %v3431_v51  ;;  %v3441_v62 = vrot.slane %v3440_v9, 4  ;;  %7045 = vmatmul.mubr.msk.bf16.gmra.mrb[56].mxu0 %vm1728_vm7, %v6411_v18  ;;  %v3460_v48 = vrot.slane %v3458_v17, 4  ;;  %v3471_v50 = vshrl.u32 %v8544_v25, 16 }
 0x1be   : > { %v6526_v15 = vcombine.low %v3422_v1, %v3432_v56  ;;  %v3451_v23 = vrot.slane %v3450_v57, 4  ;;  %v3463_v60 = vrot.slane %v3461_v24, 5  ;;  %v3469_v5 = vrot.slane %v3467_v12, 5 }
 0x1bf   : > { %v3446_v63 = vsel %vm7892_vm6, %v3441_v62, %v3445_v37  ;;  %v3473_v14 = vrot.slane %v3471_v50, 4  ;;  %v3477_v54 = vshll.u32 %v8552_v59, 16  ;;  %v6412_v21 = vcombine.low %v8268_v20, %v8277_v32  ;;  %v3776_v37 = vld [vmem:[#allocation2 + $0x18] sm:$0xe] }
 0x1c0   : > { %7147 = vmatmul.mubr.msk.bf16.gmra.mrb[8].mxu1 %vm1728_vm7, %v6526_v15  ;;  %v3456_v51 = vsel %vm7892_vm6, %v3451_v23, %v3455_v31  ;;  %v3464_v42 = vor.u32 %v3463_v60, %v3460_v48  ;;  %v3841_v20 = vrot.slane %v8288_v45, 5  ;;  %v6545_v17 = vrot.slane %v3775_v61, 9  ;;  %v2234_v48 = vld [vmem:[#allocation2] sm:$0xe] }
 0x1c1   : > { %v6527_v11 = vcombine.low %v3446_v63, %v3456_v51  ;;  %v3474_v18 = vor.u32 %v3473_v14, %v3469_v5  ;;  %7048 = vmatprep.mubr.msk.bf16.mxu0 %vm1728_vm7, %v6412_v21  ;;  %v3479_v26 = vrot.slane %v3477_v54, 5  ;;  %v6413_v57 = vcombine.low %v8297_v7, %v8299_v4  ;;  %v3777_v4 = vld [vmem:[#allocation2 + $0x24] sm:$0xe]  ;;  %v2235_v54 = vld [vmem:[#allocation2 + $0xc] sm:$0xe] }
 0x1c2   : > { %v3465_v1 = vrot.slane %v3464_v42, 4  ;;  %v3848_v31 = vrot.slane %v8309_v34, 5  ;;  %v3843_v24 = vrot.slane %v3841_v20, 4  ;;  %v3844_v12 = vrot.slane %v8290_v44, 5 }
 0x1c3   : > { %7150 = vmatprep.mubr.msk.bf16.mxu1 %vm1728_vm7, %v6527_v11  ;;  %v3475_v32 = vrot.slane %v3474_v18, 4  ;;  %v6546_v56 = vrot.slane %v3776_v37, 9  ;;  %v3851_v62 = vrot.slane %v8314_v47, 5  ;;  %v3842_v15 = vsel %vm8568_vm1, %v6545_v17, %v3841_v20  ;;  %v7689_v11 = vld [vmem:[#allocation2 + $0x8] sm:$0x1] }
 0x1c4   : > { %v3470_v50 = vsel %vm7892_vm6, %v3465_v1, %v3469_v5  ;;  %v3850_v7 = vrot.slane %v3848_v31, 4  ;;  %v3845_v44 = vsel %vm8568_vm1, %v3843_v24, %v3844_v12  ;;  %v4409_v47 = vsel %vm1777_vm3, %v8370_v49, 0  ;;  %v3778_v37 = vld [vmem:[#allocation2 + $0x30] sm:$0xe]  ;;  %v7690_v1 = vld [vmem:[%s9658_s3 + $0x6] sm:$0x3] }
 0x1c5   : > { %v3480_v45 = vsel %vm7892_vm6, %v3475_v32, %v3479_v26  ;;  %7049 = vmatmul.mubr.msk.bf16.gmra.mrb[60].mxu0 %vm1728_vm7, %v6413_v57  ;;  %v3855_v23 = vrot.slane %v8320_v8, 5  ;;  %v6562_v60 = vcombine.low %v3842_v15, %v3845_v44  ;;  %v2496_v63 = vsel %vm1777_vm3, %v8351_v43, 0  ;;  %v2236_v24 = vld [vmem:[#allocation2 + $0x18] sm:$0xe]  ;;  %v7692_v44 = vld [vmem:[#allocation2 + $0x20] sm:$0x1] }
 0x1c6   : > { %v6528_v34 = vcombine.low %v3470_v50, %v3480_v45  ;;  %v3852_v5 = vsel %vm8568_vm1, %v3850_v7, %v3851_v62  ;;  %v6430_v14 = vrot.slane %v2234_v48, 9  ;;  %v3849_v21 = vsel %vm8568_vm1, %v6546_v56, %v3848_v31  ;;  %7053 = vmatpush3.bf16.msra.mxu0 %v2496_v63 }
 0x1c7   : > { %v6547_v51 = vrot.slane %v3777_v4, 9  ;;  %v3857_v42 = vrot.slane %v3855_v23, 4  ;;  %v2287_v49 = vrot.slane %v8358_v41, 5  ;;  %v6563_v8 = vcombine.low %v3849_v21, %v3852_v5  ;;  %7585 = vmatprep.subr.msk.bf16.mxu0 %vm1777_vm3, %v7690_v1  ;;  %v7693_v1 = vld [vmem:[#allocation2 + $0x2c] sm:$0x1] }
 0x1c8   : > { %7151 = vmatmul.mubr.msk.bf16.gmra.mrb[12].mxu1 %vm1728_vm7, %v6528_v34  ;;  %v3858_v61 = vrot.slane %v8330_v27, 5  ;;  %v2290_v18 = vrot.slane %v7689_v11, 5  ;;  %v2294_v43 = vrot.slane %v8361_v33, 5  ;;  %v6431_v32 = vrot.slane %v2235_v54, 9  ;;  %v7691_v33 = vld [vmem:[#allocation2 + $0x14] sm:$0x1] }
 0x1c9   : > { %7156 = vmatprep.mubr.msk.bf16.mxu1 %vm1728_vm7, %v6562_v60  ;;  %v3856_v26 = vsel %vm8568_vm1, %v6547_v51, %v3855_v23  ;;  %v2288_v41 = vsel %vm8568_vm1, %v6430_v14, %v2287_v49  ;;  %v2289_v20 = vrot.slane %v2287_v49, 4  ;;  %v2297_v57 = vrot.slane %v7691_v33, 5  ;;  %v3779_v60 = vld [vmem:[#allocation2 + $0x3c] sm:$0xe]  ;;  %v2237_v14 = vld [vmem:[#allocation2 + $0x24] sm:$0xe] }
 0x1ca   : > { %v3859_v27 = vsel %vm8568_vm1, %v3857_v42, %v3858_v61  ;;  %v2296_v17 = vrot.slane %v2294_v43, 4  ;;  %v3862_v31 = vrot.slane %v8340_v53, 5  ;;  %v2295_v56 = vsel %vm8568_vm1, %v6431_v32, %v2294_v43  ;;  %v8628_v54 = vld [vmem:[%s9658_s3 + $0xe] sm:$0x3] }
 0x1cb   : > { %v2291_v12 = vsel %vm8568_vm1, %v2289_v20, %v2290_v18  ;;  %v6548_v62 = vrot.slane %v3778_v37, 9  ;;  %v2301_v48 = vrot.slane %v8376_v46, 5  ;;  %v3865_v7 = vrot.slane %v8342_v6, 5  ;;  %v3780_v18 = vld [vmem:[#allocation2 + $0x48] sm:$0xe] }
 0x1cc   : > { %v6447_v50 = vcombine.low %v2288_v41, %v2291_v12  ;;  %v2298_v45 = vsel %vm8568_vm1, %v2296_v17, %v2297_v57  ;;  %v3864_v15 = vrot.slane %v3862_v31, 4  ;;  %v6432_v34 = vrot.slane %v2236_v24, 9  ;;  %v2238_v20 = vld [vmem:[#allocation2 + $0x30] sm:$0xe]  ;;  %v9704_v17 = vld [vmem:[#allocation7_spill] sm:$0xff]  ;;  %v9705_v12 = vld [vmem:[#allocation5_spill] sm:$0xff] }
 0x1cd   : > { %v6448_v4 = vcombine.low %v2295_v56, %v2298_v45  ;;  %v2303_v53 = vrot.slane %v2301_v48, 4  ;;  %v2304_v23 = vrot.slane %v7692_v44, 5  ;;  %v6564_v5 = vcombine.low %v3856_v26, %v3859_v27 }
 0x1ce   : > { %7054 = vmatprep.mubr.msk.bf16.mxu0 %vm1728_vm7, %v6447_v50  ;;  %v3863_v63 = vsel %vm8568_vm1, %v6548_v62, %v3862_v31  ;;  %v3869_v46 = vrot.slane %v8379_v52, 5  ;;  %v3866_v6 = vsel %vm8568_vm1, %v3864_v15, %v3865_v7  ;;  %v2302_v21 = vsel %vm8568_vm1, %v6432_v34, %v2301_v48  ;;  %v7694_v50 = vld [vmem:[#allocation2 + $0x38] sm:$0x1]  ;;  %v3781_v15 = vld [vmem:[#allocation2 + $0x54] sm:$0xe] }
 0x1cf   : > { %7055 = vmatmul.mubr.msk.bf16.vlgmr.msra.gmra.mrb[32].mxu0 %vm1728_vm7, %v6448_v4  ;;  %v2305_v51 = vsel %vm8568_vm1, %v2303_v53, %v2304_v23  ;;  %v2308_v52 = vrot.slane %v8396_v55, 5  ;;  %v6549_v49 = vrot.slane %v3779_v60, 9  ;;  %v6433_v43 = vrot.slane %v2237_v14, 9  ;;  %v9703_v55 = vld [vmem:[#allocation3_spill] sm:$0xff]  ;;  %v9706_v53 = vld [vmem:[#allocation6_spill] sm:$0xff] }
 0x1d0   : > { %7157 = vmatmul.mubr.msk.bf16.vlgmr.msra.gmra.mrb[16].mxu1 %vm1728_vm7, %v6563_v8  ;;  %v6449_v42 = vcombine.low %v2302_v21, %v2305_v51  ;;  %v3871_v61 = vrot.slane %v3869_v46, 4  ;;  %v9702_v8 = vld [vmem:[#allocation4_spill] sm:$0xff]  ;;  %v2311_v26 = vrot.slane %v7693_v1, 5  ;;  %v3876_v41 = vrot.slane %v8392_v38, 5  ;;  %7087 = vmatpush3.bf16.msra.mxu0 %v9703_v55  ;;  %v2239_v23 = vld [vmem:[#allocation2 + $0x3c] sm:$0xe] }
 0x1d1   : > { %7189 = vmatpush3.bf16.msra.mxu1 %v4409_v47  ;;  %7160 = vmatprep.mubr.msk.bf16.mxu1 %vm1728_vm7, %v6564_v5  ;;  %v3872_v11 = vrot.slane %v9702_v8, 5  ;;  %v2310_v37 = vrot.slane %v2308_v52, 4  ;;  %v6565_v47 = vcombine.low %v3863_v63, %v3866_v6  ;;  %v3870_v32 = vsel %vm8568_vm1, %v6549_v49, %v3869_v46  ;;  %v7695_v46 = vld [vmem:[#allocation2 + $0x40] sm:$0xf] }
 0x1d2   : > { %7590 = vmatprep.subr.msk.bf16.mxu1 %vm1777_vm3, %v8628_v54  ;;  %7058 = vmatprep.mubr.msk.bf16.mxu0 %vm1728_vm7, %v6449_v42  ;;  %v2315_v33 = vrot.slane %v9704_v17, 5  ;;  %v2309_v38 = vsel %vm8568_vm1, %v6433_v43, %v2308_v52  ;;  %v6550_v31 = vrot.slane %v3780_v18, 9  ;;  %v3878_v24 = vrot.slane %v3876_v41, 4  ;;  %v9707_v52 = vld [vmem:[#allocation8_spill] sm:$0xff] }
 0x1d3   : > { %v3873_v27 = vsel %vm8568_vm1, %v3871_v61, %v3872_v11  ;;  %v2312_v57 = vsel %vm8568_vm1, %v2310_v37, %v2311_v26  ;;  %v3879_v56 = vrot.slane %v9705_v12, 5  ;;  %v6434_v62 = vrot.slane %v2238_v20, 9  ;;  %v3782_v49 = vld [vmem:[#allocation2 + $0x60] sm:$0xe]  ;;  %v7696_v11 = vld [vmem:[#allocation2 + $0x44] sm:$0x1] }
 0x1d4   : > { %v2317_v48 = vrot.slane %v2315_v33, 4  ;;  %v2318_v45 = vrot.slane %v7694_v50, 5  ;;  %v6566_v7 = vcombine.low %v3870_v32, %v3873_v27  ;;  %v6450_v4 = vcombine.low %v2309_v38, %v2312_v57  ;;  %v2240_v37 = vld [vmem:[#allocation2 + $0x48] sm:$0xe]  ;;  %v7697_v20 = vld [vmem:[#allocation2 + $0x4c] sm:$0xf] }
 0x1d5   : > { %v3877_v34 = vsel %vm8568_vm1, %v6550_v31, %v3876_v41  ;;  %v3883_v44 = vrot.slane %v9706_v53, 5  ;;  %v3880_v60 = vsel %vm8568_vm1, %v3878_v24, %v3879_v56  ;;  %v2316_v5 = vsel %vm8568_vm1, %v6434_v62, %v2315_v33  ;;  %v7698_v57 = vld [vmem:[#allocation2 + $0x50] sm:$0x1]  ;;  %v3783_v24 = vld [vmem:[#allocation2 + $0x6c] sm:$0xe] }
 0x1d6   : > { %v2319_v63 = vsel %vm8568_vm1, %v2317_v48, %v2318_v45  ;;  %v2322_v14 = vrot.slane %v7695_v46, 5  ;;  %v6551_v21 = vrot.slane %v3781_v15, 9  ;;  %v3886_v42 = vrot.slane %v9707_v52, 5  ;;  %v2241_v50 = vld [vmem:[#allocation2 + $0x54] sm:$0xe] }
 0x1d7   : > { %7059 = vmatmul.mubr.msk.bf16.gmra.mrb[36].mxu0 %vm1728_vm7, %v6450_v4  ;;  %v6451_v6 = vcombine.low %v2316_v5, %v2319_v63  ;;  %v3885_v51 = vrot.slane %v3883_v44, 4  ;;  %v6435_v61 = vrot.slane %v2239_v23, 9  ;;  %v2325_v18 = vrot.slane %v7696_v11, 5  ;;  %v7700_v46 = vld [vmem:[#allocation2 + $0x5c] sm:$0x1] }
 0x1d8   : > { %7161 = vmatmul.mubr.msk.bf16.gmra.mrb[20].mxu1 %vm1728_vm7, %v6565_v47  ;;  %v2324_v8 = vrot.slane %v2322_v14, 4  ;;  %v3890_v43 = vrot.slane %v8424_v30, 5  ;;  %v6567_v1 = vcombine.low %v3877_v34, %v3880_v60  ;;  %v3884_v26 = vsel %vm8568_vm1, %v6551_v21, %v3883_v44  ;;  %v3784_v34 = vld [vmem:[#allocation2 + $0x78] sm:$0xe]  ;;  %v9708_v60 = vld [vmem:[#allocation9_spill] sm:$0xff] }
 0x1d9   : > { %7164 = vmatprep.mubr.msk.bf16.mxu1 %vm1728_vm7, %v6566_v7  ;;  %7062 = vmatprep.mubr.msk.bf16.mxu0 %vm1728_vm7, %v6451_v6  ;;  %v3887_v41 = vsel %vm8568_vm1, %v3885_v51, %v3886_v42  ;;  %v2329_v55 = vrot.slane %v7697_v20, 5  ;;  %v2323_v47 = vsel %vm8568_vm1, %v6435_v61, %v2322_v14  ;;  %v6552_v27 = vrot.slane %v3782_v49, 9  ;;  %v7699_v7 = vld [vmem:[#allocation2 + $0x58] sm:$0xf]  ;;  %v2242_v42 = vld [vmem:[#allocation2 + $0x60] sm:$0xe] }
 0x1da   : > { %v2326_v32 = vsel %vm8568_vm1, %v2324_v8, %v2325_v18  ;;  %v3892_v30 = vrot.slane %v3890_v43, 4  ;;  %v3893_v17 = vrot.slane %v8432_v19, 5  ;;  %v6436_v33 = vrot.slane %v2240_v37, 9  ;;  %v7701_v49 = vld [vmem:[#allocation2 + $0x64] sm:$0xf] }
 0x1db   : > { %v2331_v38 = vrot.slane %v2329_v55, 4  ;;  %v2332_v31 = vrot.slane %v7698_v57, 5  ;;  %v6568_v12 = vcombine.low %v3884_v26, %v3887_v41  ;;  %v6452_v56 = vcombine.low %v2323_v47, %v2326_v32  ;;  %v7702_v26 = vld [vmem:[#allocation2 + $0x68] sm:$0x1]  ;;  %v3785_v20 = vld [vmem:[#allocation2 + $0x84] sm:$0xe] }
 0x1dc   : > { %v3891_v62 = vsel %vm8568_vm1, %v6552_v27, %v3890_v43  ;;  %v3897_v48 = vrot.slane %v8438_v58, 5  ;;  %v3894_v45 = vsel %vm8568_vm1, %v3892_v30, %v3893_v17  ;;  %v2330_v15 = vsel %vm8568_vm1, %v6436_v33, %v2329_v55  ;;  %v7703_v33 = vld [vmem:[#allocation2 + $0x70] sm:$0xf] }
 0x1dd   : > { %v2333_v19 = vsel %vm8568_vm1, %v2331_v38, %v2332_v31  ;;  %v2336_v4 = vrot.slane %v7699_v7, 5  ;;  %v6553_v44 = vrot.slane %v3783_v24, 9  ;;  %v3900_v5 = vrot.slane %v9708_v60, 5  ;;  %v7704_v7 = vld [vmem:[#allocation2 + $0x74] sm:$0x1] }
 0x1de   : > { %v6453_v53 = vcombine.low %v2330_v15, %v2333_v19  ;;  %v3899_v23 = vrot.slane %v3897_v48, 4  ;;  %v6437_v58 = vrot.slane %v2241_v50, 9  ;;  %v2339_v14 = vrot.slane %v7700_v46, 5 }
 0x1df   : > { %7063 = vmatmul.mubr.msk.bf16.gmra.mrb[40].mxu0 %vm1728_vm7, %v6452_v56  ;;  %v2338_v63 = vrot.slane %v2336_v4, 4  ;;  %v3904_v6 = vrot.slane %v8454_v16, 5  ;;  %v3898_v21 = vsel %vm8568_vm1, %v6553_v44, %v3897_v48  ;;  %v6554_v52 = vrot.slane %v3784_v34, 9  ;;  %v3786_v56 = vld [vmem:[#allocation2 + $0x90] sm:$0xe] }
 0x1e0   : > { %7165 = vmatmul.mubr.msk.bf16.gmra.mrb[24].mxu1 %vm1728_vm7, %v6567_v1  ;;  %7066 = vmatprep.mubr.msk.bf16.mxu0 %vm1728_vm7, %v6453_v53  ;;  %v3901_v51 = vsel %vm8568_vm1, %v3899_v23, %v3900_v5  ;;  %v2343_v61 = vrot.slane %v7701_v49, 5  ;;  %v3907_v16 = vrot.slane %v8462_v35, 5  ;;  %v6569_v43 = vcombine.low %v3891_v62, %v3894_v45  ;;  %v2243_v48 = vld [vmem:[#allocation2 + $0x6c] sm:$0xe]  ;;  %v2244_v45 = vld [vmem:[#allocation2 + $0x78] sm:$0xe] }
 0x1e1   : > { %7168 = vmatprep.mubr.msk.bf16.mxu1 %vm1728_vm7, %v6568_v12  ;;  %v6570_v8 = vcombine.low %v3898_v21, %v3901_v51  ;;  %v2340_v11 = vsel %vm8568_vm1, %v2338_v63, %v2339_v14  ;;  %v3906_v18 = vrot.slane %v3904_v6, 4  ;;  %v2337_v37 = vsel %vm8568_vm1, %v6437_v58, %v2336_v4  ;;  %v7706_v63 = vld [vmem:[#allocation2 + $0x80] sm:$0x1]  ;;  %v3787_v14 = vld [vmem:[#allocation2 + $0x9c] sm:$0xe] }
 0x1e2   : > { %v2345_v1 = vrot.slane %v2343_v61, 4  ;;  %v2346_v41 = vrot.slane %v7702_v26, 5  ;;  %v8706_v55 = vsel %vm8568_vm1, %v6554_v52, %v3904_v6  ;;  %v6438_v32 = vrot.slane %v2242_v42, 9  ;;  %v2245_v26 = vld [vmem:[#allocation2 + $0x84] sm:$0xe] }
 0x1e3   : > { %v8710_v47 = vsel %vm8568_vm1, %v3906_v18, %v3907_v16  ;;  %v3911_v27 = vrot.slane %v8469_v22, 5  ;;  %v6454_v35 = vcombine.low %v2337_v37, %v2340_v11  ;;  %v2350_v38 = vrot.slane %v7703_v33, 5  ;;  %v3788_v37 = vld [vmem:[#allocation2 + $0xa8] sm:$0xe] }
 0x1e4   : > { %v6571_v30 = vcombine.low %v8706_v55, %v8710_v47  ;;  %v2347_v17 = vsel %vm8568_vm1, %v2345_v1, %v2346_v41  ;;  %v2344_v57 = vsel %vm8568_vm1, %v6438_v32, %v2343_v61  ;;  %v6555_v31 = vrot.slane %v3785_v20, 9  ;;  %v7707_v61 = vld [vmem:[#allocation2 + $0x88] sm:$0xf]  ;;  %v2246_v55 = vld [vmem:[#allocation2 + $0x90] sm:$0xe] }
 0x1e5   : > { %v3913_v24 = vrot.slane %v3911_v27, 4  ;;  %v3914_v12 = vrot.slane %v8477_v3, 5  ;;  %v6455_v62 = vcombine.low %v2344_v57, %v2347_v17  ;;  %v2352_v22 = vrot.slane %v2350_v38, 4  ;;  %v7705_v3 = vld [vmem:[#allocation2 + $0x7c] sm:$0xf] }
 0x1e6   : > { %v3918_v50 = vrot.slane %v8484_v39, 5  ;;  %v3912_v15 = vsel %vm8568_vm1, %v6555_v31, %v3911_v27  ;;  %v2353_v4 = vrot.slane %v7704_v7, 5  ;;  %v2357_v34 = vrot.slane %v7705_v3, 5  ;;  %v7708_v27 = vld [vmem:[#allocation2 + $0x8c] sm:$0x1] }
 0x1e7   : > { %7067 = vmatmul.mubr.msk.bf16.gmra.mrb[44].mxu0 %vm1728_vm7, %v6454_v35  ;;  %v3915_v19 = vsel %vm8568_vm1, %v3913_v24, %v3914_v12  ;;  %v6556_v53 = vrot.slane %v3786_v56, 9  ;;  %v3921_v23 = vrot.slane %v8492_v10, 5  ;;  %v6439_v60 = vrot.slane %v2243_v48, 9  ;;  %v7709_v17 = vld [vmem:[#allocation2 + $0x94] sm:$0xf] }
 0x1e8   : > { %7169 = vmatmul.mubr.msk.bf16.gmra.mrb[28].mxu1 %vm1728_vm7, %v6569_v43  ;;  %7070 = vmatprep.mubr.msk.bf16.mxu0 %vm1728_vm7, %v6455_v62  ;;  %v6572_v39 = vcombine.low %v3912_v15, %v3915_v19  ;;  %v3920_v44 = vrot.slane %v3918_v50, 4  ;;  %v6440_v5 = vrot.slane %v2244_v45, 9  ;;  %v2359_v58 = vrot.slane %v2357_v34, 4  ;;  %v7710_v56 = vld [vmem:[#allocation2 + $0x98] sm:$0x1] }
 0x1e9   : > { %7172 = vmatprep.mubr.msk.bf16.mxu1 %vm1728_vm7, %v6570_v8  ;;  %v2360_v46 = vrot.slane %v7706_v63, 5  ;;  %v2354_v6 = vsel %vm8568_vm1, %v2352_v22, %v2353_v4  ;;  %v8734_v21 = vsel %vm8568_vm1, %v6556_v53, %v3918_v50  ;;  %v3925_v52 = vrot.slane %v8498_v0, 5  ;;  %v3789_v48 = vld [vmem:[#allocation2 + $0xb4] sm:$0xe]  ;;  %v7711_v7 = vld [vmem:[#allocation2 + $0xa0] sm:$0xf] }
 0x1ea   : > { %v8738_v51 = vsel %vm8568_vm1, %v3920_v44, %v3921_v23  ;;  %v2351_v10 = vsel %vm8568_vm1, %v6439_v60, %v2350_v38  ;;  %v2364_v8 = vrot.slane %v7707_v61, 5  ;;  %v2358_v11 = vsel %vm8568_vm1, %v6440_v5, %v2357_v34  ;;  %v3790_v44 = vld [vmem:[#allocation2 + $0xc0] sm:$0xe] }
 0x1eb   : > { %v6573_v42 = vcombine.low %v8734_v21, %v8738_v51  ;;  %v2361_v49 = vsel %vm8568_vm1, %v2359_v58, %v2360_v46  ;;  %v6557_v18 = vrot.slane %v3787_v14, 9  ;;  %v3927_v16 = vrot.slane %v3925_v52, 4  ;;  %v7712_v46 = vld [vmem:[#allocation2 + $0xac] sm:$0xf] }
 0x1ec   : > { %v3928_v43 = vrot.slane %v8509_v28, 5  ;;  %v6456_v0 = vcombine.low %v2351_v10, %v2354_v6  ;;  %v6457_v1 = vcombine.low %v2358_v11, %v2361_v49  ;;  %v2366_v41 = vrot.slane %v2364_v8, 4  ;;  %v7713_v10 = vld [vmem:[#allocation2 + $0xa4] sm:$0x1]  ;;  %v2248_v11 = vld [vmem:[#allocation2 + $0xa8] sm:$0xe] }
 0x1ed   : > { %v3932_v20 = vrot.slane %v8514_v29, 5  ;;  %v3926_v47 = vsel %vm8568_vm1, %v6557_v18, %v3925_v52  ;;  %v2367_v35 = vrot.slane %v7708_v27, 5  ;;  %v2371_v33 = vrot.slane %v7709_v17, 5  ;;  %v7714_v18 = vld [vmem:[#allocation2 + $0xb0] sm:$0x1] }
 0x1ee   : > { %v3929_v32 = vsel %vm8568_vm1, %v3927_v16, %v3928_v43  ;;  %v6558_v38 = vrot.slane %v3788_v37, 9  ;;  %v3935_v29 = vrot.slane %v8522_v40, 5  ;;  %v6441_v31 = vrot.slane %v2245_v26, 9  ;;  %v7715_v37 = vld [vmem:[#allocation2 + $0xb8] sm:$0xf] }
 0x1ef   : > { %7071 = vmatmul.mubr.msk.bf16.gmra.mrb[48].mxu0 %vm1728_vm7, %v6456_v0  ;;  %v6574_v28 = vcombine.low %v3926_v47, %v3929_v32  ;;  %v3934_v57 = vrot.slane %v3932_v20, 4  ;;  %v6442_v24 = vrot.slane %v2246_v55, 9  ;;  %v2373_v12 = vrot.slane %v2371_v33, 4  ;;  %v2249_v27 = vld [vmem:[#allocation2 + $0xb4] sm:$0xe] }
 0x1f0   : > { %7173 = vmatmul.mubr.msk.bf16.gmra.mrb[0].mxu1 %vm1728_vm7, %v6571_v30  ;;  %7074 = vmatprep.mubr.msk.bf16.mxu0 %vm1728_vm7, %v6457_v1  ;;  %v2374_v62 = vrot.slane %v7710_v56, 5  ;;  %v2368_v30 = vsel %vm8568_vm1, %v2366_v41, %v2367_v35  ;;  %v3933_v22 = vsel %vm8568_vm1, %v6558_v38, %v3932_v20  ;;  %v3939_v40 = vrot.slane %v8530_v13, 5  ;;  %v7716_v35 = vld [vmem:[#allocation2 + $0xbc] sm:$0x1] }
 0x1f1   : > { %7176 = vmatprep.mubr.msk.bf16.mxu1 %vm1728_vm7, %v6572_v39  ;;  %v3936_v50 = vsel %vm8568_vm1, %v3934_v57, %v3935_v29  ;;  %v2365_v45 = vsel %vm8568_vm1, %v6441_v31, %v2364_v8  ;;  %v2378_v4 = vrot.slane %v7711_v7, 5  ;;  %v2372_v3 = vsel %vm8568_vm1, %v6442_v24, %v2371_v33  ;;  %v7636_v29 = vld [vmem:[#allocation2 + $0x18] sm:$0xff]   ;;  %v7638_v31 = vld [vmem:[#allocation2 + $0xc] sm:$0xff]   ;;  %v7637_v24 = vld [vmem:[#allocation2 + $0x24] sm:$0xff]  }
 0x1f2   : > { %v6575_v15 = vcombine.low %v3933_v22, %v3936_v50  ;;  %v2375_v19 = vsel %vm8568_vm1, %v2373_v12, %v2374_v62  ;;  %v6559_v34 = vrot.slane %v3789_v48, 9  ;;  %v3941_v39 = vrot.slane %v3939_v40, 4  ;;  %v7640_v56 = vld [vmem:[#allocation2 + $0x18] sm:$0xff]   ;;  %v7639_v62 = vld [vmem:[#allocation2 + $0x30] sm:$0xff]  }
 0x1f3   : > { %v3942_v53 = vrot.slane %v8537_v2, 5  ;;  %v6458_v23 = vcombine.low %v2365_v45, %v2368_v30  ;;  %v6459_v60 = vcombine.low %v2372_v3, %v2375_v19  ;;  %v3946_v13 = vrot.slane %v8544_v25, 5  ;;  %v2247_v2 = vld [vmem:[#allocation2 + $0x9c] sm:$0xe]  ;;  %v8813_v48 = vld [vmem:[%s9658_s3 + $0x10] sm:$0x3] }
 0x1f4   : > { %v3940_v5 = vsel %vm8568_vm1, %v6559_v34, %v3939_v40  ;;  %v2380_v63 = vrot.slane %v2378_v4, 4  ;;  %v2385_v14 = vrot.slane %v7712_v46, 5  ;;  %v6560_v21 = vrot.slane %v3790_v44, 9  ;;  %v7642_v30 = vld [vmem:[#allocation2 + $0x24] sm:$0xff]   ;;  %v8821_v22 = vld [vmem:[#allocation2 + $0x1c] sm:$0xf] }
 0x1f5   : > { %v3943_v58 = vsel %vm8568_vm1, %v3941_v39, %v3942_v53  ;;  %v3948_v51 = vrot.slane %v3946_v13, 4  ;;  %v3949_v52 = vrot.slane %v8552_v59, 5  ;;  %v2381_v49 = vrot.slane %v7713_v10, 5  ;;  %v7641_v50 = vld [vmem:[#allocation2 + $0x3c] sm:$0xff]   ;;  %v7644_v40 = vld [vmem:[#allocation2 + $0x30] sm:$0xff]   ;;  %v7643_v45 = vld [vmem:[#allocation2 + $0x48] sm:$0xff]  }
 0x1f6   : > { %v6576_v6 = vcombine.low %v3940_v5, %v3943_v58  ;;  %v2387_v25 = vrot.slane %v2385_v14, 4  ;;  %v3947_v61 = vsel %vm8568_vm1, %v6560_v21, %v3946_v13  ;;  %v6443_v16 = vrot.slane %v2247_v2, 9  ;;  %v4607_v34 = vld [vmem:[#allocation2 + $0x24] sm:$0xf]  ;;  %v8829_v39 = vld [vmem:[#allocation2 + $0x28] sm:$0xf] }
 0x1f7   : > { %7075 = vmatmul.mubr.msk.bf16.gmra.mrb[52].mxu0 %vm1728_vm7, %v6458_v23  ;;  %v3950_v8 = vsel %vm8568_vm1, %v3948_v51, %v3949_v52  ;;  %v2382_v43 = vsel %vm8568_vm1, %v2380_v63, %v2381_v49  ;;  %v2392_v0 = vrot.slane %v7715_v37, 5  ;;  %v6444_v1 = vrot.slane %v2248_v11, 9  ;;  %v7645_v46 = vld [vmem:[#allocation2 + $0x54] sm:$0xff]   ;;  %v7647_v21 = vld [vmem:[#allocation2 + $0x60] sm:$0xff]  }
 0x1f8   : > { %7177 = vmatmul.mubr.msk.bf16.gmra.mrb[4].mxu1 %vm1728_vm7, %v6573_v42  ;;  %7078 = vmatprep.mubr.msk.bf16.mxu0 %vm1728_vm7, %v6459_v60  ;;  %v6577_v59 = vcombine.low %v3947_v61, %v3950_v8  ;;  %v2388_v42 = vrot.slane %v7714_v18, 5  ;;  %v2379_v41 = vsel %vm8568_vm1, %v6443_v16, %v2378_v4  ;;  %v2395_v17 = vrot.slane %v7716_v35, 5  ;;  %v7650_v51 = vld [vmem:[#allocation2 + $0x54] sm:$0xff]   ;;  %v8835_v52 = vld [vmem:[#allocation2 + $0x20] sm:$0x1] }
 0x1f9   : > { %7180 = vmatprep.mubr.msk.bf16.mxu1 %vm1728_vm7, %v6574_v28  ;;  %v6460_v20 = vcombine.low %v2379_v41, %v2382_v43  ;;  %v2386_v55 = vsel %vm8568_vm1, %v6444_v1, %v2385_v14  ;;  %v2394_v32 = vrot.slane %v2392_v0, 4  ;;  %v6445_v33 = vrot.slane %v2249_v27, 9  ;;  %v7648_v14 = vld [vmem:[#allocation2 + $0x48] sm:$0xff]   ;;  %v8844_v11 = vld [vmem:[#allocation2 + $0x34] sm:$0xf]  ;;  %v7652_v35 = vld [vmem:[#allocation2 + $0x60] sm:$0xff]  }
 0x1fa   : > { %v2389_v26 = vsel %vm8568_vm1, %v2387_v25, %v2388_v42  ;;  %v5135_v12 = vsel %vm1777_vm3, %v8628_v54, 0  ;;  %v4604_v54 = vld [vmem:[#allocation2 + $0x18] sm:$0xf]  ;;  %v4662_v4 = vshll.u32 %v8821_v22, 16  ;;  %v4666_v3 = vshrl.u32 %v8821_v22, 16 }
 0x1fb   : > { %v6461_v47 = vcombine.low %v2386_v55, %v2389_v26  ;;  %v2396_v28 = vsel %vm8568_vm1, %v2394_v32, %v2395_v17  ;;  %v2393_v38 = vsel %vm8568_vm1, %v6445_v33, %v2392_v0  ;;  %v4653_v19 = vshrl.u32 %v4604_v54, 16  ;;  %v8847_v37 = vld [vmem:[#allocation2 + $0x40] sm:$0xf]  ;;  %v8849_v1 = vld [vmem:[#allocation2 + $0x2c] sm:$0x1] }
 0x1fc   : > { %v6462_v57 = vcombine.low %v2393_v38, %v2396_v28  ;;  %v4656_v7 = vshll.u32 %v4604_v54, 16  ;;  %v4677_v23 = vshrl.u32 %v4607_v34, 16  ;;  %v4680_v60 = vshll.u32 %v4607_v34, 16  ;;  %v8853_v55 = vld [vmem:[#allocation2 + $0x38] sm:$0x1] }
 0x1fd   : > { %v4655_v53 = vrot.slane %v4653_v19, 4  ;;  %v8831_v13 = vrot.slane %v4662_v4, 5  ;;  %v4668_v5 = vrot.slane %v4666_v3, 4  ;;  %v4686_v58 = vshll.u32 %v8829_v39, 16  ;;  %v4613_v33 = vld [vmem:[#allocation2 + $0x3c] sm:$0xf] }
 0x1fe   : > { %v4658_v44 = vrot.slane %v4656_v7, 5  ;;  %v4690_v63 = vshrl.u32 %v8829_v39, 16  ;;  %v4679_v25 = vrot.slane %v4677_v23, 4  ;;  %v4682_v10 = vrot.slane %v4680_v60, 5  ;;  %v8876_v7 = vld [vmem:[#allocation2 + $0x58] sm:$0xf] }
 0x1ff   : > { %7079 = vmatmul.mubr.msk.bf16.gmra.mrb[56].mxu0 %vm1728_vm7, %v6460_v20  ;;  %v4669_v49 = vor.u32 %v4668_v5, %v8831_v13  ;;  %v8840_v61 = vrot.slane %v4686_v58, 5  ;;  %v4672_v42 = vshll.u32 %v8835_v52, 16  ;;  %v4710_v41 = vshll.u32 %v8844_v11, 16  ;;  %v7649_v20 = vld [vmem:[#allocation2 + $0x6c] sm:$0xff]  }
 0x200   : > { %7181 = vmatmul.mubr.msk.bf16.gmra.mrb[8].mxu1 %vm1728_vm7, %v6575_v15  ;;  %7082 = vmatprep.mubr.msk.bf16.mxu0 %vm1728_vm7, %v6461_v47  ;;  %v7646_v15 = vld [vmem:[#allocation2 + $0x3c] sm:$0xff]   ;;  %v4659_v2 = vor.u32 %v4658_v44, %v4655_v53  ;;  %v4692_v8 = vrot.slane %v4690_v63, 4  ;;  %v4683_v43 = vor.u32 %v4682_v10, %v4679_v25  ;;  %v4714_v27 = vshrl.u32 %v8844_v11, 16  ;;  %v4619_v63 = vld [vmem:[#allocation2 + $0x54] sm:$0xf] }
 0x201   : > { %7184 = vmatprep.mubr.msk.bf16.mxu1 %vm1728_vm7, %v6576_v6  ;;  %v4610_v6 = vld [vmem:[#allocation2 + $0x30] sm:$0xf]  ;;  %v4670_v0 = vrot.slane %v4669_v49, 4  ;;  %v4674_v17 = vrot.slane %v4672_v42, 5  ;;  %v4734_v28 = vshll.u32 %v8847_v37, 16  ;;  %v4738_v38 = vshrl.u32 %v8847_v37, 16 }
 0x202   : > { %v4704_v18 = vshll.u32 %v4610_v6, 16  ;;  %v4660_v16 = vrot.slane %v4659_v2, 4  ;;  %v4693_v26 = vor.u32 %v4692_v8, %v8840_v61  ;;  %v8872_v54 = vrot.slane %v4710_v41, 5  ;;  %v4622_v10 = vld [vmem:[#allocation2 + $0x60] sm:$0xf]  ;;  %v7654_v49 = vld [vmem:[#allocation2 + $0x90] sm:$0xff]  }
 0x203   : > { %v4728_v19 = vshll.u32 %v4613_v33, 16  ;;  %v8878_v4 = vrot.slane %v4734_v28, 5  ;;  %v4740_v3 = vrot.slane %v4738_v38, 4  ;;  %v8899_v42 = vld [vmem:[#allocation2 + $0x64] sm:$0xf]  ;;  %v4776_v41 = vshll.u32 %v4619_v63, 16 }
 0x204   : > { %v4706_v32 = vrot.slane %v4704_v18, 5  ;;  %v4806_v28 = vshll.u32 %v8899_v42, 16  ;;  %v4810_v38 = vshrl.u32 %v8899_v42, 16  ;;  %v5406_v36 = vrot.slane %v8849_v1, 5 }
 0x205   : > { %v4730_v8 = vrot.slane %v4728_v19, 5 }
 0x207   : > { %7083 = vmatmul.mubr.msk.bf16.gmra.mrb[60].mxu0 %vm1728_vm7, %v6462_v57  ;;  %v7651_v57 = vld [vmem:[#allocation2 + $0x78] sm:$0xff]  }
 0x208   : > { %7185 = vmatmul.mubr.msk.bf16.gmra.mrb[12].mxu1 %vm1728_vm7, %v6577_v59  ;;  %7088 = vmatprep.mubr.msk.bf16.mxu0 %vm1728_vm7, %v7638_v31  ;;  %v4701_v59 = vshrl.u32 %v4610_v6, 16  ;;  %v4684_v31 = vrot.slane %v4683_v43, 4  ;;  %v7653_v6 = vld [vmem:[#allocation2 + $0x84] sm:$0xff]  }
 0x209   : > { %7190 = vmatprep.mubr.msk.bf16.mxu1 %vm1728_vm7, %v7636_v29  ;;  %v4665_v29 = vsel %vm7892_vm6, %v4660_v16, %v8831_v13  ;;  %v8901_v16 = vld [vmem:[#allocation2 + $0x44] sm:$0x1] }
 0x20a   : > { %v4703_v47 = vrot.slane %v4701_v59, 4  ;;  %v4689_v5 = vsel %vm7892_vm6, %v4684_v31, %v8840_v61  ;;  %v4741_v61 = vor.u32 %v4740_v3, %v8878_v4  ;;  %v4744_v31 = vshll.u32 %v8901_v16, 16 }
 0x20f   : > { %7089 = vmatmul.mubr.msk.bf16.vlgmr.msra.gmra.mrb[32].mxu0 %vm1728_vm7, %v7640_v56  ;;  %v8866_v56 = vld [vmem:[#allocation2 + $0x4c] sm:$0xf] }
 0x210   : > { %7191 = vmatmul.mubr.msk.bf16.vlgmr.msra.gmra.mrb[16].mxu1 %vm1728_vm7, %v7637_v24  ;;  %7092 = vmatprep.mubr.msk.bf16.mxu0 %vm1728_vm7, %v7642_v30  ;;  %v4696_v24 = vshll.u32 %v8849_v1, 16  ;;  %v4694_v30 = vrot.slane %v4693_v26, 4  ;;  %v4758_v34 = vshll.u32 %v8866_v56, 16  ;;  %v4762_v53 = vshrl.u32 %v8866_v56, 16 }
 0x211   : > { %7223 = vmatpush3.bf16.msra.mxu1 %v5135_v12  ;;  %7194 = vmatprep.mubr.msk.bf16.mxu1 %vm1728_vm7, %v7639_v62  ;;  %v8864_v12 = vsel %vm1777_vm3, %v8813_v48, 0  ;;  %v4675_v62 = vsel %vm7892_vm6, %v4670_v0, %v4674_v17  ;;  %v4773_v26 = vshrl.u32 %v4619_v63, 16  ;;  %v7655_v63 = vld [vmem:[#allocation2 + $0x9c] sm:$0xff]  }
 0x212   : > { %7591 = vmatprep.subr.msk.bf16.mxu1 %vm1777_vm3, %v8813_v48  ;;  %v4716_v48 = vrot.slane %v4714_v27, 4  ;;  %v8882_v44 = vcombine.low %v4665_v29, %v4675_v62  ;;  %v4698_v23 = vrot.slane %v4696_v24, 5  ;;  %v8897_v59 = vrot.slane %v4758_v34, 5  ;;  %v8919_v62 = vld [vmem:[#allocation2 + $0x5c] sm:$0x1] }
 0x213   : > { %v4764_v18 = vrot.slane %v4762_v53, 4  ;;  %v4797_v27 = vshrl.u32 %v4622_v10, 16 }
 0x214   : > { %v4717_v2 = vor.u32 %v4716_v48, %v8872_v54  ;;  %v4778_v48 = vrot.slane %v4776_v41, 5  ;;  %v8936_v41 = vld [vmem:[#allocation2 + $0x7c] sm:$0xf] }
 0x215   : > { %v4765_v24 = vor.u32 %v4764_v18, %v8897_v59  ;;  %v4799_v34 = vrot.slane %v4797_v27, 4 }
 0x217   : > { %7093 = vmatmul.mubr.msk.bf16.gmra.mrb[36].mxu0 %vm1728_vm7, %v7644_v40  ;;  %v4616_v40 = vld [vmem:[#allocation2 + $0x48] sm:$0xf] }
 0x218   : > { %7195 = vmatmul.mubr.msk.bf16.gmra.mrb[20].mxu1 %vm1728_vm7, %v7641_v50  ;;  %7096 = vmatprep.mubr.msk.bf16.mxu0 %vm1728_vm7, %v7646_v15  ;;  %v4720_v50 = vshll.u32 %v8853_v55, 16  ;;  %v4725_v15 = vshrl.u32 %v4613_v33, 16  ;;  %v4749_v60 = vshrl.u32 %v4616_v40, 16  ;;  %v4752_v13 = vshll.u32 %v4616_v40, 16 }
 0x219   : > { %7198 = vmatprep.mubr.msk.bf16.mxu1 %vm1728_vm7, %v7643_v45  ;;  %v4707_v45 = vor.u32 %v4706_v32, %v4703_v47 }
 0x21a   : > { %v8887_v58 = vrot.slane %v4720_v50, 5  ;;  %v4727_v25 = vrot.slane %v4725_v15, 4  ;;  %v4751_v43 = vrot.slane %v4749_v60, 4  ;;  %v4754_v0 = vrot.slane %v4752_v13, 5  ;;  %v8922_v15 = vld [vmem:[#allocation2 + $0x70] sm:$0xf] }
 0x21b   : > { %v4742_v50 = vrot.slane %v4741_v61, 4  ;;  %v4812_v60 = vrot.slane %v4810_v38, 4  ;;  %v8933_v61 = vld [vmem:[#allocation2 + $0x68] sm:$0x1] }
 0x21c   : > { %v4731_v29 = vor.u32 %v4730_v8, %v4727_v25  ;;  %v4755_v19 = vor.u32 %v4754_v0, %v4751_v43 }
 0x21e   : > { %v4756_v18 = vrot.slane %v4755_v19, 4 }
 0x21f   : > { %7097 = vmatmul.mubr.msk.bf16.gmra.mrb[40].mxu0 %vm1728_vm7, %v7648_v14  ;;  %v4786_v14 = vshrl.u32 %v8876_v7, 16 }
 0x220   : > { %7199 = vmatmul.mubr.msk.bf16.gmra.mrb[24].mxu1 %vm1728_vm7, %v7645_v46  ;;  %7100 = vmatprep.mubr.msk.bf16.mxu0 %vm1728_vm7, %v7650_v51  ;;  %v4782_v46 = vshll.u32 %v8876_v7, 16  ;;  %v8893_v51 = vrot.slane %v4707_v45, 4  ;;  %v4775_v45 = vrot.slane %v4773_v26, 4 }
 0x221   : > { %7202 = vmatprep.mubr.msk.bf16.mxu1 %vm1728_vm7, %v7647_v21  ;;  %v4699_v21 = vsel %vm7892_vm6, %v4694_v30, %v4698_v23  ;;  %v4788_v32 = vrot.slane %v4786_v14, 4  ;;  %v4625_v30 = vld [vmem:[#allocation2 + $0x6c] sm:$0xf]  ;;  %v8925_v23 = vrot.slane %v4806_v28, 5  ;;  %v4792_v14 = vshll.u32 %v8919_v62, 16 }
 0x222   : > { %v8906_v47 = vrot.slane %v4782_v46, 5  ;;  %v8909_v17 = vcombine.low %v4689_v5, %v4699_v21  ;;  %v4713_v33 = vsel %vm7892_vm6, %v8893_v51, %v8872_v54  ;;  %v4821_v13 = vshrl.u32 %v4625_v30, 16 }
 0x223   : > { %v4824_v5 = vshll.u32 %v4625_v30, 16  ;;  %v4766_v46 = vrot.slane %v4765_v24, 4  ;;  %v4834_v21 = vshrl.u32 %v8922_v15, 16  ;;  %v4779_v8 = vor.u32 %v4778_v48, %v4775_v45 }
 0x224   : > { %v4789_v3 = vor.u32 %v4788_v32, %v8906_v47  ;;  %v4823_v27 = vrot.slane %v4821_v13, 4  ;;  %v4794_v38 = vrot.slane %v4792_v14, 5  ;;  %v4816_v30 = vshll.u32 %v8933_v61, 16 }
 0x225   : > { %v4780_v24 = vrot.slane %v4779_v8, 4  ;;  %v4858_v45 = vshrl.u32 %v8936_v41, 16  ;;  %v4761_v48 = vsel %vm7892_vm6, %v4756_v18, %v8897_v59 }
 0x226   : > { %v4790_v0 = vrot.slane %v4789_v3, 4 }
 0x227   : > { %7101 = vmatmul.mubr.msk.bf16.gmra.mrb[44].mxu0 %vm1728_vm7, %v7652_v35  ;;  %v4800_v35 = vshll.u32 %v4622_v10, 16  ;;  %v4732_v10 = vrot.slane %v4731_v29, 4  ;;  %v4836_v29 = vrot.slane %v4834_v21, 4  ;;  %v7658_v21 = vld [vmem:[#allocation2 + $0xc0] sm:$0xff]   ;;  %v8986_v54 = vrot.slane %v4858_v45, 4 }
 0x228   : > { %7203 = vmatmul.mubr.msk.bf16.gmra.mrb[28].mxu1 %vm1728_vm7, %v7649_v20  ;;  %v8904_v20 = vld [vmem:[#allocation2 + $0x50] sm:$0x1]  ;;  %v4795_v19 = vsel %vm7892_vm6, %v4790_v0, %v4794_v38 }
 0x229   : > { %7206 = vmatprep.mubr.msk.bf16.mxu1 %vm1728_vm7, %v7651_v57  ;;  %v4718_v57 = vrot.slane %v4717_v2, 4  ;;  %v4768_v40 = vshll.u32 %v8904_v20, 16  ;;  %v4802_v53 = vrot.slane %v4800_v35, 5  ;;  %v7656_v2 = vld [vmem:[#allocation2 + $0xa8] sm:$0xff]   ;;  %v4826_v35 = vrot.slane %v4824_v5, 5 }
 0x22b   : > { %v4723_v25 = vsel %vm7892_vm6, %v4718_v57, %v8887_v58  ;;  %v4770_v43 = vrot.slane %v4768_v40, 5  ;;  %v4803_v26 = vor.u32 %v4802_v53, %v4799_v34  ;;  %v4813_v58 = vor.u32 %v4812_v60, %v8925_v23  ;;  %v8959_v34 = vld [vmem:[#allocation2 + $0x74] sm:$0x1] }
 0x22c   : > { %v4854_v40 = vshll.u32 %v8936_v41, 16  ;;  %v4827_v60 = vor.u32 %v4826_v35, %v4823_v27  ;;  %v9010_v27 = vld [vmem:[#allocation2 + $0x94] sm:$0xf] }
 0x22d   : > { %v4771_v28 = vsel %vm7892_vm6, %v4766_v46, %v4770_v43  ;;  %v8957_v3 = vrot.slane %v4803_v26, 4  ;;  %v8961_v53 = vrot.slane %v4813_v58, 4  ;;  %v7657_v46 = vld [vmem:[#allocation2 + $0xb4] sm:$0xff]   ;;  %v5332_v43 = vld [vmem:[#allocation2 + $0x30] sm:$0xe] }
 0x22e   : > { %v8974_v14 = vcombine.low %v4761_v48, %v4771_v28  ;;  %v8984_v8 = vrot.slane %v4854_v40, 5  ;;  %v9004_v26 = vrot.slane %v4827_v60, 4  ;;  %v5334_v48 = vld [vmem:[#allocation2 + $0x48] sm:$0xe]  ;;  %v5424_v28 = vrot.slane %v8866_v56, 5 }
 0x22f   : > { %v9095_v60 = vld [vmem:[#allocation2 + $0xa0] sm:$0xf]  ;;  %v9143_v40 = vld [vmem:[#allocation2 + $0xc4] sm:$0xf] }
 0x230   : > { %7207 = vmatmul.mubr.msk.bf16.gmra.mrb[0].mxu1 %vm1728_vm7, %v7653_v6  ;;  %v4830_v6 = vshll.u32 %v8922_v15, 16  ;;  %v5426_v56 = vrot.slane %v5424_v28, 4 }
 0x231   : > { %7210 = vmatprep.mubr.msk.bf16.mxu1 %vm1728_vm7, %v7654_v49  ;;  %v4746_v49 = vrot.slane %v4744_v31, 5  ;;  %v4628_v31 = vld [vmem:[#allocation2 + $0x78] sm:$0xf] }
 0x232   : > { %v8944_v57 = vrot.slane %v4830_v6, 5  ;;  %v4845_v13 = vshrl.u32 %v4628_v31, 16  ;;  %v4848_v5 = vshll.u32 %v4628_v31, 16  ;;  %v5333_v31 = vld [vmem:[#allocation2 + $0x3c] sm:$0xe] }
 0x233   : > { %v4747_v32 = vsel %vm7892_vm6, %v4742_v50, %v4746_v49  ;;  %v4737_v50 = vsel %vm7892_vm6, %v4732_v10, %v8878_v4  ;;  %v8970_v4 = vcombine.low %v4713_v33, %v4723_v25  ;;  %v8980_v10 = vrot.slane %v4816_v30, 5  ;;  %v8982_v49 = vld [vmem:[#allocation2 + $0x80] sm:$0x1]  ;;  %v9097_v25 = vld [vmem:[#allocation2 + $0xac] sm:$0xf] }
 0x234   : > { %v8972_v59 = vcombine.low %v4737_v50, %v4747_v32  ;;  %v4837_v6 = vor.u32 %v4836_v29, %v8944_v57  ;;  %v9006_v32 = vrot.slane %v4845_v13, 4  ;;  %v9008_v58 = vrot.slane %v4848_v5, 5 }
 0x235   : > { %v5410_v29 = vrot.slane %v8844_v11, 5  ;;  %v6662_v50 = vrot.slane %v5332_v43, 9  ;;  %v5413_v5 = vrot.slane %v8853_v55, 5  ;;  %v5427_v30 = vrot.slane %v8904_v20, 5  ;;  %v5336_v55 = vld [vmem:[#allocation2 + $0x60] sm:$0xe] }
 0x236   : > { %v9012_v35 = vrot.slane %v4837_v6, 4  ;;  %v6663_v6 = vrot.slane %v5333_v31, 9  ;;  %v5431_v31 = vrot.slane %v8876_v7, 5  ;;  %v5434_v20 = vrot.slane %v8919_v62, 5 }
 0x237   : > { %v5412_v13 = vrot.slane %v5410_v29, 4  ;;  %v9027_v11 = vsel %vm8568_vm1, %v6662_v50, %v5410_v29 }
 0x238   : > { %7211 = vmatmul.mubr.msk.bf16.gmra.mrb[4].mxu1 %vm1728_vm7, %v7655_v63  ;;  %v8963_v63 = vld [vmem:[#allocation2 + $0x84] sm:$0xf] }
 0x239   : > { %7214 = vmatprep.mubr.msk.bf16.mxu1 %vm1728_vm7, %v7656_v2  ;;  %v4785_v2 = vsel %vm7892_vm6, %v4780_v24, %v8906_v47  ;;  %v8996_v47 = vld [vmem:[#allocation2 + $0x88] sm:$0xf]  ;;  %v4869_v18 = vshrl.u32 %v8963_v63, 16  ;;  %v7659_v24 = vld [vmem:[#allocation2 + $0xcc] sm:$0xff]   ;;  %v9033_v43 = vsel %vm8568_vm1, %v5412_v13, %v5413_v5  ;;  %v6666_v13 = vrot.slane %v5336_v55, 9 }
 0x23a   : > { %v8989_v51 = vcombine.low %v4785_v2, %v4795_v19  ;;  %v5420_v2 = vrot.slane %v8901_v16, 5  ;;  %v5438_v5 = vrot.slane %v8899_v42, 5  ;;  %v5339_v55 = vld [vmem:[#allocation2 + $0x84] sm:$0xe] }
 0x23b   : > { %v9021_v19 = vrot.slane %v4869_v18, 4  ;;  %v6664_v18 = vrot.slane %v5334_v48, 9  ;;  %v5337_v48 = vld [vmem:[#allocation2 + $0x6c] sm:$0xe] }
 0x23d   : > { %v9047_v16 = vsel %vm8568_vm1, %v6664_v18, %v5424_v28  ;;  %v9061_v28 = vsel %vm8568_vm1, %v5426_v56, %v5427_v30  ;;  %v6667_v18 = vrot.slane %v5337_v48, 9  ;;  %v5452_v48 = vrot.slane %v8936_v41, 5 }
 0x23e   : > { %v6669_v30 = vrot.slane %v5339_v55, 9  ;;  %v9110_v55 = vld [vmem:[#allocation2 + $0xa4] sm:$0x1]  ;;  %v9735_v1 = vcombine.low %v9047_v16, %v9061_v28 }
 0x240   : > { %7215 = vmatmul.mubr.msk.bf16.gmra.mrb[8].mxu1 %vm1728_vm7, %v7657_v46  ;;  %v5335_v46 = vld [vmem:[#allocation2 + $0x54] sm:$0xe] }
 0x241   : > { %7218 = vmatprep.mubr.msk.bf16.mxu1 %vm1728_vm7, %v7658_v21  ;;  %v5417_v21 = vrot.slane %v8847_v37, 5  ;;  %v6665_v50 = vrot.slane %v5335_v46, 9  ;;  %v9090_v46 = vld [vmem:[#allocation2 + $0x98] sm:$0x1] }
 0x243   : > { %v5419_v29 = vrot.slane %v5417_v21, 4  ;;  %v9043_v37 = vsel %vm8568_vm1, %v6663_v6, %v5417_v21  ;;  %v9065_v62 = vsel %vm8568_vm1, %v6665_v50, %v5431_v31  ;;  %v5338_v6 = vld [vmem:[#allocation2 + $0x78] sm:$0xe]  ;;  %v9080_v50 = vsel %vm8568_vm1, %v6666_v13, %v5438_v5  ;;  %v5340_v21 = vld [vmem:[#allocation2 + $0x90] sm:$0xe] }
 0x244   : > { %v5341_v13 = vld [vmem:[#allocation2 + $0x9c] sm:$0xe] }
 0x245   : > { %v9054_v7 = vsel %vm8568_vm1, %v5419_v29, %v5420_v2  ;;  %v5440_v2 = vrot.slane %v5438_v5, 4  ;;  %v9074_v29 = vld [vmem:[#allocation2 + $0x8c] sm:$0x1]  ;;  %v6671_v45 = vrot.slane %v5341_v13, 9 }
 0x248   : > { %7219 = vmatmul.mubr.msk.bf16.gmra.mrb[12].mxu1 %vm1728_vm7, %v7659_v24  ;;  %v5433_v24 = vrot.slane %v5431_v31, 4  ;;  %v5448_v31 = vrot.slane %v8959_v34, 5 }
 0x249   : > { %7224 = vmatprep.mubr.msk.bf16.mxu1 %vm1728_vm7, %v8882_v44  ;;  %v5441_v44 = vrot.slane %v8933_v61, 5  ;;  %v5445_v61 = vrot.slane %v8922_v15, 5  ;;  %v5459_v15 = vrot.slane %v8996_v47, 5 }
 0x24a   : > { %v9072_v42 = vsel %vm8568_vm1, %v5433_v24, %v5434_v20  ;;  %v6668_v20 = vrot.slane %v5338_v6, 9  ;;  %v5455_v24 = vrot.slane %v8982_v49, 5  ;;  %v5454_v6 = vrot.slane %v5452_v48, 4 }
 0x24b   : > { %v9086_v56 = vsel %vm8568_vm1, %v5440_v2, %v5441_v44  ;;  %v5447_v5 = vrot.slane %v5445_v61, 4  ;;  %v9101_v44 = vsel %vm8568_vm1, %v6667_v18, %v5445_v61  ;;  %v5462_v2 = vrot.slane %v9074_v29, 5 }
 0x24c   : > { %9709 = vst [vmem:[#allocation4_spill] sm:$0xff] %v9086_v56  ;;  %9710 = vst [vmem:[#allocation3_spill] sm:$0xff] %v9101_v44  ;;  %v9105_v41 = vsel %vm8568_vm1, %v6668_v20, %v5452_v48  ;;  %v5461_v0 = vrot.slane %v5459_v15, 4  ;;  %v6670_v18 = vrot.slane %v5340_v21, 9  ;;  %v5466_v61 = vrot.slane %v9010_v27, 5 }
 0x24d   : > { %9711 = vst [vmem:[#allocation7_spill] sm:$0xff] %v9105_v41  ;;  %v9114_v33 = vsel %vm8568_vm1, %v5447_v5, %v5448_v31  ;;  %v9120_v20 = vld [vmem:[#allocation2 + $0xb0] sm:$0x1]  ;;  %v9126_v48 = vsel %vm8568_vm1, %v5454_v6, %v5455_v24  ;;  %v9130_v31 = vsel %vm8568_vm1, %v6669_v30, %v5459_v15  ;;  %v5469_v21 = vrot.slane %v9090_v46, 5  ;;  %v5342_v5 = vld [vmem:[#allocation2 + $0xa8] sm:$0xe] }
 0x24e   : > { %9712 = vst [vmem:[#allocation5_spill] sm:$0xff] %v9114_v33  ;;  %9713 = vst [vmem:[#allocation6_spill] sm:$0xff] %v9126_v48  ;;  %v9139_v38 = vsel %vm8568_vm1, %v5461_v0, %v5462_v2  ;;  %v5343_v24 = vld [vmem:[#allocation2 + $0xb4] sm:$0xe]  ;;  %v9141_v6 = vld [vmem:[#allocation2 + $0xbc] sm:$0x1]  ;;  %v9149_v15 = vsel %vm8568_vm1, %v6670_v18, %v5466_v61  ;;  %v9736_v9 = vcombine.low %v9065_v62, %v9072_v42 }
 0x24f   : > { %9714 = vst [vmem:[#allocation8_spill] sm:$0xff] %v9130_v31  ;;  %9715 = vst [vmem:[#allocation9_spill] sm:$0xff] %v9139_v38  ;;  %v5476_v48 = vrot.slane %v9110_v55, 5  ;;  %v6672_v13 = vrot.slane %v5342_v5, 9  ;;  %v5480_v2 = vrot.slane %v9097_v25, 5  ;;  %v5483_v41 = vrot.slane %v9120_v20, 5 }
 0x250   : > { %7225 = vmatmul.mubr.msk.bf16.vlgmr.msra.gmra.mrb[16].mxu1 %vm1728_vm7, %v8909_v17  ;;  %v5468_v17 = vrot.slane %v5466_v61, 4  ;;  %9716 = vst [vmem:[#allocation10_spill] sm:$0xff] %v9149_v15  ;;  %v5344_v33 = vld [vmem:[#allocation2 + $0xc0] sm:$0xe]  ;;  %v6673_v18 = vrot.slane %v5343_v24, 9  ;;  %v5490_v56 = vrot.slane %v9141_v6, 5 }
 0x251   : > { %7257 = vmatpush3.bf16.msra.mxu1 %v8864_v12  ;;  %7228 = vmatprep.mubr.msk.bf16.mxu1 %vm1728_vm7, %v8970_v4  ;;  %v9133_v12 = vld [vmem:[#allocation2 + $0xb8] sm:$0xf]  ;;  %v5473_v4 = vrot.slane %v9095_v60, 5  ;;  %v5345_v31 = vld [vmem:[#allocation2 + $0xcc] sm:$0xe]  ;;  %v5482_v5 = vrot.slane %v5480_v2, 4 }
 0x252   : > { %v9155_v0 = vsel %vm8568_vm1, %v5468_v17, %v5469_v21  ;;  %v5487_v61 = vrot.slane %v9133_v12, 5  ;;  %v9162_v44 = vld [vmem:[#allocation2 + $0xc8] sm:$0x1]  ;;  %v9170_v21 = vsel %vm8568_vm1, %v6672_v13, %v5480_v2  ;;  %v5494_v15 = vrot.slane %v9143_v40, 5 }
 0x253   : > { %9717 = vst [vmem:[#allocation11_spill] sm:$0xff] %v9155_v0  ;;  %v5475_v38 = vrot.slane %v5473_v4, 4  ;;  %v9166_v17 = vsel %vm8568_vm1, %v6671_v45, %v5473_v4  ;;  %9718 = vst [vmem:[#allocation12_spill] sm:$0xff] %v9170_v21  ;;  %v6674_v0 = vrot.slane %v5344_v33, 9  ;;  %v9184_v4 = vsel %vm8568_vm1, %v5482_v5, %v5483_v41  ;;  %v9192_v33 = vld [vmem:[#allocation2 + $0xd0] sm:$0xf] }
 0x254   : > { %v5489_v24 = vrot.slane %v5487_v61, 4  ;;  %9720 = vst [vmem:[#allocation14_spill] sm:$0xff] %v9184_v4  ;;  %v9188_v13 = vsel %vm8568_vm1, %v6673_v18, %v5487_v61  ;;  %v5496_v41 = vrot.slane %v5494_v15, 4  ;;  %v5497_v5 = vrot.slane %v9162_v44, 5  ;;  %v4634_v18 = vld [vmem:[#allocation2 + $0x90] sm:$0xf] }
 0x255   : > { %v9175_v30 = vsel %vm8568_vm1, %v5475_v38, %v5476_v48  ;;  %9721 = vst [vmem:[#allocation15_spill] sm:$0xff] %v9188_v13  ;;  %v6675_v38 = vrot.slane %v5345_v31, 9  ;;  %v9194_v48 = vld [vmem:[#allocation2 + $0xd4] sm:$0x1]  ;;  %v4906_v31 = vshrl.u32 %v9010_v27, 16  ;;  %v5501_v61 = vrot.slane %v9192_v33, 5 }
 0x256   : > { %9719 = vst [vmem:[#allocation13_spill] sm:$0xff] %v9175_v30  ;;  %v9200_v2 = vsel %vm8568_vm1, %v5489_v24, %v5490_v56  ;;  %v5504_v45 = vrot.slane %v9194_v48, 5  ;;  %v9723_v30 = vshll.u32 %v8996_v47, 16  ;;  %v9724_v56 = vshrl.u32 %v8996_v47, 16  ;;  %v9745_v28 = vld [vmem:[#allocation8_spill] sm:$0xff] }
 0x257   : > { %9722 = vst [vmem:[#allocation16_spill] sm:$0xff] %v9200_v2  ;;  %v9216_v4 = vsel %vm8568_vm1, %v6674_v0, %v5494_v15  ;;  %v9220_v21 = vsel %vm8568_vm1, %v5496_v41, %v5497_v5  ;;  %v5503_v47 = vrot.slane %v5501_v61, 4  ;;  %v9727_v15 = vsel %vm7892_vm6, %v8961_v53, %v8980_v10  ;;  %v4637_v53 = vld [vmem:[#allocation2 + $0x9c] sm:$0xf]  ;;  %v9748_v42 = vld [vmem:[#allocation10_spill] sm:$0xff] }
 0x258   : > { %7229 = vmatmul.mubr.msk.bf16.gmra.mrb[20].mxu1 %vm1728_vm7, %v8972_v59  ;;  %v9210_v59 = vrot.slane %v9723_v30, 5  ;;  %v4884_v24 = vrot.slane %v9724_v56, 4  ;;  %9725 = vst [vmem:[#allocation17_spill] sm:$0xff] %v9220_v21  ;;  %v9228_v30 = vsel %vm8568_vm1, %v6675_v38, %v5501_v61  ;;  %v9728_v0 = vsel %vm7892_vm6, %v8957_v3, %v8925_v23 }
 0x259   : > { %7232 = vmatprep.mubr.msk.bf16.mxu1 %vm1728_vm7, %v8974_v14  ;;  %v9726_v14 = vshll.u32 %v8963_v63, 16  ;;  %v6634_v63 = vcombine.low %v9728_v0, %v9727_v15  ;;  %v9729_v41 = vshll.u32 %v8959_v34, 16  ;;  %v4896_v56 = vshll.u32 %v4634_v18, 16 }
 0x25a   : > { %v4851_v38 = vor.u32 %v9008_v58, %v9006_v32  ;;  %v9730_v61 = vshll.u32 %v9010_v27, 16  ;;  %v4908_v21 = vrot.slane %v4906_v31, 4  ;;  %v9250_v10 = vsel %vm8568_vm1, %v5503_v47, %v5504_v45 }
 0x25b   : > { %v4874_v2 = vrot.slane %v9726_v14, 5  ;;  %v4842_v5 = vrot.slane %v9729_v41, 5  ;;  %v4893_v14 = vshrl.u32 %v4634_v18, 16  ;;  %v9731_v3 = vor.u32 %v8986_v54, %v8984_v8 }
 0x25c   : > { %v9246_v13 = vrot.slane %v9730_v61, 5  ;;  %v4885_v32 = vor.u32 %v4884_v24, %v9210_v59  ;;  %v6692_v58 = vcombine.low %v9228_v30, %v9250_v10  ;;  %v4833_v27 = vsel %vm7892_vm6, %v9004_v26, %v8944_v57 }
 0x25d   : > { %v4843_v23 = vsel %vm7892_vm6, %v9012_v35, %v4842_v5  ;;  %v4862_v34 = vrot.slane %v9731_v3, 4  ;;  %v9732_v45 = vshll.u32 %v8982_v49, 16  ;;  %v4875_v18 = vor.u32 %v4874_v2, %v9021_v19  ;;  %v4640_v2 = vld [vmem:[#allocation2 + $0xa8] sm:$0xf] }
 0x25e   : > { %v4888_v54 = vshll.u32 %v9074_v29, 16  ;;  %v4895_v31 = vrot.slane %v4893_v14, 4  ;;  %v4898_v24 = vrot.slane %v4896_v56, 5  ;;  %v4917_v47 = vshrl.u32 %v4637_v53, 16 }
 0x25f   : > { %v4866_v35 = vrot.slane %v9732_v45, 5  ;;  %v4920_v15 = vshll.u32 %v4637_v53, 16  ;;  %v6635_v0 = vcombine.low %v4833_v27, %v4843_v23  ;;  %v4909_v41 = vor.u32 %v4908_v21, %v9246_v13 }
 0x260   : > { %7233 = vmatmul.mubr.msk.bf16.gmra.mrb[24].mxu1 %vm1728_vm7, %v8989_v51  ;;  %v4852_v51 = vrot.slane %v4851_v38, 4  ;;  %v4886_v26 = vrot.slane %v4885_v32, 4  ;;  %v4926_v49 = vshll.u32 %v9095_v60, 16  ;;  %v4930_v19 = vshrl.u32 %v9095_v60, 16 }
 0x261   : > { %7236 = vmatprep.mubr.msk.bf16.mxu1 %vm1728_vm7, %v6634_v63  ;;  %v4867_v57 = vsel %vm7892_vm6, %v4862_v34, %v4866_v35  ;;  %v4890_v29 = vrot.slane %v4888_v54, 5  ;;  %v4912_v63 = vshll.u32 %v9090_v46, 16  ;;  %v4950_v5 = vshll.u32 %v9097_v25, 16 }
 0x262   : > { %v4954_v14 = vshrl.u32 %v9097_v25, 16  ;;  %v4876_v56 = vrot.slane %v4875_v18, 4  ;;  %v4899_v38 = vor.u32 %v4898_v24, %v4895_v31  ;;  %v4919_v61 = vrot.slane %v4917_v47, 4  ;;  %v4643_v18 = vld [vmem:[#allocation2 + $0xb4] sm:$0xf] }
 0x263   : > { %v4922_v21 = vrot.slane %v4920_v15, 5  ;;  %v4857_v53 = vsel %vm7892_vm6, %v4852_v51, %v8984_v8  ;;  %v4910_v23 = vrot.slane %v4909_v41, 4  ;;  %v4941_v3 = vshrl.u32 %v4640_v2, 16 }
 0x264   : > { %v4944_v34 = vshll.u32 %v4640_v2, 16  ;;  %v6636_v60 = vcombine.low %v4857_v53, %v4867_v57  ;;  %v4891_v32 = vsel %vm7892_vm6, %v4886_v26, %v4890_v29  ;;  %v9285_v46 = vrot.slane %v4926_v49, 5  ;;  %v4649_v53 = vld [vmem:[#allocation2 + $0xcc] sm:$0xf] }
 0x265   : > { %v4932_v27 = vrot.slane %v4930_v19, 4  ;;  %v4914_v25 = vrot.slane %v4912_v63, 5  ;;  %v9288_v45 = vrot.slane %v4950_v5, 5  ;;  %v4956_v35 = vrot.slane %v4954_v14, 4  ;;  %v4646_v19 = vld [vmem:[#allocation2 + $0xc0] sm:$0xf] }
 0x266   : > { %v4881_v8 = vsel %vm7892_vm6, %v4876_v56, %v9210_v59  ;;  %v4900_v54 = vrot.slane %v4899_v38, 4  ;;  %v4923_v31 = vor.u32 %v4922_v21, %v4919_v61  ;;  %v4936_v24 = vshll.u32 %v9110_v55, 16 }
 0x267   : > { %v6637_v47 = vcombine.low %v4881_v8, %v4891_v32  ;;  %v4915_v15 = vsel %vm7892_vm6, %v4910_v23, %v4914_v25  ;;  %v4946_v51 = vrot.slane %v4944_v34, 5  ;;  %v4933_v41 = vor.u32 %v4932_v27, %v9285_v46 }
 0x268   : > { %7237 = vmatmul.mubr.msk.bf16.gmra.mrb[28].mxu1 %vm1728_vm7, %v6635_v0  ;;  %v4943_v0 = vrot.slane %v4941_v3, 4  ;;  %v4965_v57 = vshrl.u32 %v4643_v18, 16  ;;  %v4974_v26 = vshll.u32 %v9133_v12, 16  ;;  %v4978_v49 = vshrl.u32 %v9133_v12, 16 }
 0x269   : > { %7240 = vmatprep.mubr.msk.bf16.mxu1 %vm1728_vm7, %v6636_v60  ;;  %v4957_v59 = vor.u32 %v4956_v35, %v9288_v45  ;;  %v4968_v2 = vshll.u32 %v4643_v18, 16  ;;  %v4998_v29 = vshll.u32 %v9143_v40, 16  ;;  %v5002_v55 = vshrl.u32 %v9143_v40, 16 }
 0x26a   : > { %v4905_v63 = vsel %vm7892_vm6, %v4900_v54, %v9246_v13  ;;  %v4924_v5 = vrot.slane %v4923_v31, 4  ;;  %v4938_v14 = vrot.slane %v4936_v24, 5  ;;  %v4960_v56 = vshll.u32 %v9120_v20, 16 }
 0x26b   : > { %v6638_v38 = vcombine.low %v4905_v63, %v4915_v15  ;;  %v4947_v61 = vor.u32 %v4946_v51, %v4943_v0  ;;  %v4989_v21 = vshrl.u32 %v4646_v19, 16  ;;  %v4992_v12 = vshll.u32 %v4646_v19, 16 }
 0x26c   : > { %v4934_v23 = vrot.slane %v4933_v41, 4  ;;  %v4967_v3 = vrot.slane %v4965_v57, 4  ;;  %v4976_v34 = vrot.slane %v4974_v26, 5  ;;  %v4980_v60 = vrot.slane %v4978_v49, 4 }
 0x26d   : > { %v4958_v40 = vrot.slane %v4957_v59, 4  ;;  %v4970_v32 = vrot.slane %v4968_v2, 5  ;;  %v5000_v27 = vrot.slane %v4998_v29, 5  ;;  %v5004_v25 = vrot.slane %v5002_v55, 4 }
 0x26e   : > { %v5013_v13 = vshrl.u32 %v4649_v53, 16  ;;  %v5016_v35 = vshll.u32 %v4649_v53, 16  ;;  %v5022_v20 = vshll.u32 %v9192_v33, 16  ;;  %v5026_v18 = vshrl.u32 %v9192_v33, 16 }
 0x26f   : > { %v4948_v8 = vrot.slane %v4947_v61, 4  ;;  %v4962_v54 = vrot.slane %v4960_v56, 5  ;;  %v4991_v31 = vrot.slane %v4989_v21, 4  ;;  %v4994_v24 = vrot.slane %v4992_v12, 5 }
 0x270   : > { %7241 = vmatmul.mubr.msk.bf16.gmra.mrb[0].mxu1 %vm1728_vm7, %v6637_v47  ;;  %v4929_v47 = vsel %vm7892_vm6, %v4924_v5, %v9285_v46  ;;  %v4939_v15 = vsel %vm7892_vm6, %v4934_v23, %v4938_v14  ;;  %v4981_v0 = vor.u32 %v4980_v60, %v4976_v34  ;;  %v4971_v41 = vor.u32 %v4970_v32, %v4967_v3 }
 0x271   : > { %7244 = vmatprep.mubr.msk.bf16.mxu1 %vm1728_vm7, %v6638_v38  ;;  %v4963_v51 = vsel %vm7892_vm6, %v4958_v40, %v4962_v54  ;;  %v4984_v57 = vshll.u32 %v9141_v6, 16  ;;  %v5005_v26 = vor.u32 %v5004_v25, %v5000_v27  ;;  %v5015_v33 = vrot.slane %v5013_v13, 4  ;;  %v5887_v13 = vld [vmem:[%s9660_s5] sm:$0x3] }
 0x272   : > { %v5018_v49 = vrot.slane %v5016_v35, 5  ;;  %v5024_v19 = vrot.slane %v5022_v20, 5  ;;  %v5028_v59 = vrot.slane %v5026_v18, 4  ;;  %v6639_v2 = vcombine.low %v4929_v47, %v4939_v15  ;;  %7592 = vmatprep.subr.msk.bf16.mxu0 %vm1777_vm3, %v5887_v13  ;;  %v5330_v18 = vld [vmem:[#allocation2 + $0x18] sm:$0xe] }
 0x273   : > { %v4953_v46 = vsel %vm7892_vm6, %v4948_v8, %v9288_v45  ;;  %v4995_v29 = vor.u32 %v4994_v24, %v4991_v31  ;;  %v5008_v55 = vshll.u32 %v9162_v44, 16  ;;  %v4982_v5 = vrot.slane %v4981_v0, 4 }
 0x274   : > { %v6640_v63 = vcombine.low %v4953_v46, %v4963_v51  ;;  %v4986_v14 = vrot.slane %v4984_v57, 5  ;;  %v5006_v56 = vrot.slane %v5005_v26, 4  ;;  %v4972_v6 = vrot.slane %v4971_v41, 4  ;;  %v5331_v41 = vld [vmem:[#allocation2 + $0x24] sm:$0xe]  ;;  %v9746_v46 = vld [vmem:[#allocation9_spill] sm:$0xff] }
 0x275   : > { %v5019_v38 = vor.u32 %v5018_v49, %v5015_v33  ;;  %v5029_v61 = vor.u32 %v5028_v59, %v5024_v19  ;;  %v5032_v21 = vshll.u32 %v9194_v48, 16  ;;  %v4996_v12 = vrot.slane %v4995_v29, 4  ;;  %v9740_v59 = vld [vmem:[#allocation5_spill] sm:$0xff]  ;;  %v9749_v29 = vld [vmem:[#allocation11_spill] sm:$0xff] }
 0x276   : > { %v5010_v53 = vrot.slane %v5008_v55, 5  ;;  %v4987_v45 = vsel %vm7892_vm6, %v4982_v5, %v4986_v14  ;;  %v5396_v23 = vrot.slane %v8821_v22, 5  ;;  %v4977_v3 = vsel %vm7892_vm6, %v4972_v6, %v4976_v34  ;;  %v9751_v55 = vld [vmem:[#allocation13_spill] sm:$0xff]  ;;  %v9753_v5 = vld [vmem:[#allocation12_spill] sm:$0xff]  ;;  %v9754_v14 = vld [vmem:[#allocation14_spill] sm:$0xff] }
 0x277   : > { %v5020_v60 = vrot.slane %v5019_v38, 4  ;;  %v5030_v40 = vrot.slane %v5029_v61, 4  ;;  %v5034_v32 = vrot.slane %v5032_v21, 5  ;;  %v6641_v25 = vcombine.low %v4977_v3, %v4987_v45  ;;  %v9756_v6 = vld [vmem:[#allocation15_spill] sm:$0xff]  ;;  %v9757_v38 = vld [vmem:[#allocation16_spill] sm:$0xff]  ;;  %v9759_v21 = vld [vmem:[#allocation17_spill] sm:$0xff] }
 0x278   : > { %7245 = vmatmul.mubr.msk.bf16.gmra.mrb[4].mxu1 %vm1728_vm7, %v6639_v2  ;;  %v5011_v44 = vsel %vm7892_vm6, %v5006_v56, %v5010_v53  ;;  %v5001_v48 = vsel %vm7892_vm6, %v4996_v12, %v5000_v27  ;;  %v5944_v20 = vsel %vm1777_vm3, %v5887_v13, 0  ;;  %v5398_v22 = vrot.slane %v5396_v23, 4  ;;  %v9743_v2 = vld [vmem:[#allocation6_spill] sm:$0xff] }
 0x279   : > { %7248 = vmatprep.mubr.msk.bf16.mxu1 %vm1728_vm7, %v6640_v63  ;;  %v6642_v35 = vcombine.low %v5001_v48, %v5011_v44  ;;  %7291 = vmatpush3.bf16.msra.mxu0 %v5944_v20  ;;  %v5025_v34 = vsel %vm7892_vm6, %v5020_v60, %v5024_v19  ;;  %v5035_v27 = vsel %vm7892_vm6, %v5030_v40, %v5034_v32  ;;  %v5399_v8 = vrot.slane %v8835_v52, 5  ;;  %v9737_v19 = vld [vmem:[#allocation4_spill] sm:$0xff] }
 0x27a   : > { %v5403_v54 = vrot.slane %v8829_v39, 5  ;;  %v6643_v31 = vcombine.low %v5025_v34, %v5035_v27  ;;  %v6660_v24 = vrot.slane %v5330_v18, 9  ;;  %v6661_v52 = vrot.slane %v5331_v41, 9 }
 0x27b   : > { %v5400_v47 = vsel %vm8568_vm1, %v5398_v22, %v5399_v8  ;;  %v9733_v33 = vcombine.low %v9027_v11, %v9033_v43  ;;  %v9734_v49 = vcombine.low %v9043_v37, %v9054_v7  ;;  %v9738_v11 = vcombine.low %v9080_v50, %v9737_v19  ;;  %v9739_v43 = vld [vmem:[#allocation3_spill] sm:$0xff] }
 0x27c   : > { %v5397_v15 = vsel %vm8568_vm1, %v6660_v24, %v5396_v23  ;;  %v5405_v51 = vrot.slane %v5403_v54, 4  ;;  %v5404_v57 = vsel %vm8568_vm1, %v6661_v52, %v5403_v54  ;;  %v9741_v37 = vcombine.low %v9739_v43, %v9740_v59  ;;  %v9742_v7 = vld [vmem:[#allocation7_spill] sm:$0xff] }
 0x27d   : > { %v6677_v0 = vcombine.low %v5397_v15, %v5400_v47  ;;  %v9744_v16 = vcombine.low %v9742_v7, %v9743_v2  ;;  %v9747_v62 = vcombine.low %v9745_v28, %v9746_v46  ;;  %v9750_v50 = vcombine.low %v9748_v42, %v9749_v29 }
 0x27e   : > { %v5407_v39 = vsel %vm8568_vm1, %v5405_v51, %v5406_v36  ;;  %v9752_v63 = vcombine.low %v9166_v17, %v9751_v55  ;;  %v9755_v56 = vcombine.low %v9753_v5, %v9754_v14  ;;  %v9758_v61 = vcombine.low %v9756_v6, %v9757_v38 }
 0x27f   : > { %v6678_v26 = vcombine.low %v5404_v57, %v5407_v39  ;;  %v9760_v12 = vcombine.low %v9216_v4, %v9759_v21  ;;  %v9459_v39 = vld [vmem:[%s9659_s4] ss:$0 sm:$0xff] }
 0x280   : > { %7249 = vmatmul.mubr.msk.bf16.gmra.mrb[8].mxu1 %vm1728_vm7, %v6641_v25 }
 0x281   : > { %7252 = vmatprep.mubr.msk.bf16.mxu1 %vm1728_vm7, %v6642_v35 }
 0x288   : > { %7253 = vmatmul.mubr.msk.bf16.gmra.mrb[12].mxu1 %vm1728_vm7, %v6643_v31 }
 0x289   : > { %7258 = vmatprep.mubr.msk.bf16.mxu1 %vm1728_vm7, %v6677_v0 }
 0x290   : > { %7259 = vmatmul.mubr.msk.bf16.vlgmr.msra.gmra.mrb[16].mxu1 %vm1728_vm7, %v6678_v26 }
 0x291   : > { %7262 = vmatprep.mubr.msk.bf16.mxu1 %vm1728_vm7, %v9733_v33 }
 0x298   : > { %7263 = vmatmul.mubr.msk.bf16.gmra.mrb[20].mxu1 %vm1728_vm7, %v9734_v49 }
 0x299   : > { %7266 = vmatprep.mubr.msk.bf16.mxu1 %vm1728_vm7, %v9735_v1 }
 0x2a0   : > { %7267 = vmatmul.mubr.msk.bf16.gmra.mrb[24].mxu1 %vm1728_vm7, %v9736_v9 }
 0x2a1   : > { %7270 = vmatprep.mubr.msk.bf16.mxu1 %vm1728_vm7, %v9738_v11 }
 0x2a8   : > { %7271 = vmatmul.mubr.msk.bf16.gmra.mrb[28].mxu1 %vm1728_vm7, %v9741_v37 }
 0x2a9   : > { %7274 = vmatprep.mubr.msk.bf16.mxu1 %vm1728_vm7, %v9744_v16 }
 0x2b0   : > { %7275 = vmatmul.mubr.msk.bf16.gmra.mrb[0].mxu1 %vm1728_vm7, %v9747_v62 }
 0x2b1   : > { %7278 = vmatprep.mubr.msk.bf16.mxu1 %vm1728_vm7, %v9750_v50 }
 0x2b8   : > { %7279 = vmatmul.mubr.msk.bf16.gmra.mrb[4].mxu1 %vm1728_vm7, %v9752_v63 }
 0x2b9   : > { %7282 = vmatprep.mubr.msk.bf16.mxu1 %vm1728_vm7, %v9755_v56 }
 0x2c0   : > { %7283 = vmatmul.mubr.msk.bf16.gmra.mrb[8].mxu1 %vm1728_vm7, %v9758_v61 }
 0x2c1   : > { %7286 = vmatprep.mubr.msk.bf16.mxu1 %vm1728_vm7, %v9760_v12 }
 0x2c2   : > { %v9412_v53 = vpop.f32.mrb[48].mxu0 }
 0x2c3   : > { %v9414_v17 = vpop.f32.mrb[49].mxu0 }
 0x2c4   : > { %v9416_v45 = vpop.f32.mrb[50].mxu0 }
 0x2c5   : > { %v9418_v44 = vpop.f32.mrb[51].mxu0 }
 0x2c8   : > { %7287 = vmatmul.mubr.msk.bf16.gmra.mrb[12].mxu1 %vm1728_vm7, %v6692_v58 }
 0x2ca   : > { %v9424_v23 = vpop.f32.mrb[52].mxu0 }
 0x2cb   : > { %v9426_v3 = vpop.f32.mrb[53].mxu0 }
 0x2cc   : > { %v9428_v4 = vpop.f32.mrb[54].mxu0 }
 0x2cd   : > { %v9430_v60 = vpop.f32.mrb[55].mxu0 }
 0x2d2   : > { %v9432_v40 = vpop.f32.mrb[56].mxu0 }
 0x2d3   : > { %v9434_v32 = vpop.f32.mrb[57].mxu0 }
 0x2d4   : > { %v9436_v25 = vpop.f32.mrb[58].mxu0 }
 0x2d5   : > { %v9438_v48 = vpop.f32.mrb[59].mxu0 }
 0x2da   : > { %v9440_v13 = vpop.f32.mrb[60].mxu0 }
 0x2db   : > { %v9442_v30 = vpop.f32.mrb[61].mxu0 }
 0x2dc   : > { %v9444_v10 = vpop.f32.mrb[62].mxu0 }
 0x2dd   : > { %v9446_v58 = vpop.f32.mrb[63].mxu0 }
 0x2e2   : > { %v7090_v35 = vpop.f32.mrb[32].mxu0 }
 0x2e3   : > { %v2890_v20 = vpop.f32.mrb[33].mxu0 }
 0x2e4   : > { %v7091_v22 = vpop.f32.mrb[34].mxu0 }
 0x2e5   : > { %v2893_v34 = vpop.f32.mrb[35].mxu0 }
 0x2ea   : > { %v7094_v27 = vpop.f32.mrb[36].mxu0 }
 0x2eb   : > { %v2906_v18 = vpop.f32.mrb[37].mxu0 }
 0x2ec   : > { %v7095_v8 = vpop.f32.mrb[38].mxu0 }
 0x2ed   : > { %v2909_v54 = vpop.f32.mrb[39].mxu0 }
 0x2f2   : > { %v7098_v31 = vpop.f32.mrb[40].mxu0 }
 0x2f3   : > { %v2922_v24 = vpop.f32.mrb[41].mxu0 }
 0x2f4   : > { %v7099_v47 = vpop.f32.mrb[42].mxu0 }
 0x2f5   : > { %v2925_v15 = vpop.f32.mrb[43].mxu0 }
 0x2fa   : > { %v9448_v0 = vpop.f32.mrb[44].mxu0 }
 0x2fb   : > { %v9450_v51 = vpop.f32.mrb[45].mxu0 }
 0x2fc   : > { %v9452_v41 = vpop.f32.mrb[46].mxu0 }
 0x2fd   : > { %v9454_v36 = vpop.f32.mrb[47].mxu0 }
 0x363   : > { %v7260_v52 = vpop.f32.mrb[16].mxu1 }
 0x364   : > { %v7326_v57 = vadd.f32 %v7260_v52, %v7090_v35  ;;  %v5641_v26 = vpop.f32.mrb[17].mxu1 }
 0x365   : > { %v7327_v33 = vadd.f32 %v5641_v26, %v2890_v20  ;;  %v7261_v49 = vpop.f32.mrb[18].mxu1 }
 0x366   : > { %v5809_v1 = vadd.f32 %v7326_v57, %v9459_v39  ;;  %v7328_v9 = vadd.f32 %v7261_v49, %v7091_v22  ;;  %v5644_v19 = vpop.f32.mrb[19].mxu1 }
 0x367   : > { %v5807_v11 = vadd.f32 %v7327_v33, %v9459_v39  ;;  %v7329_v43 = vadd.f32 %v5644_v19, %v2893_v34 }
 0x368   : > { %v5810_v59 = vadd.f32 %v7328_v9, %v9459_v39  ;;  %v5841_v7 = vmax.f32 %v5809_v1, 0.0 }
 0x369   : > { %v5808_v37 = vadd.f32 %v7329_v43, %v9459_v39  ;;  %v5839_v16 = vmax.f32 %v5807_v11, 0.0 }
 0x36a   : > { %v5842_v2 = vmax.f32 %v5810_v59, 0.0 }
 0x36b   : > { %v5840_v28 = vmax.f32 %v5808_v37, 0.0  ;;  %v7264_v46 = vpop.f32.mrb[20].mxu1 }
 0x36c   : > { %v5872_v62 = vpack.c.bf16 %v5842_v2, %v5841_v7  ;;  %v7330_v42 = vadd.f32 %v7264_v46, %v7094_v27  ;;  %v5657_v29 = vpop.f32.mrb[21].mxu1 }
 0x36d   : > { %v5871_v50 = vpack.c.bf16 %v5840_v28, %v5839_v16  ;;  %v7331_v55 = vadd.f32 %v5657_v29, %v2906_v18  ;;  %v7265_v63 = vpop.f32.mrb[22].mxu1 }
 0x36e   : > { %v5813_v5 = vadd.f32 %v7330_v42, %v9459_v39  ;;  %v7332_v14 = vadd.f32 %v7265_v63, %v7095_v8  ;;  %v5660_v56 = vpop.f32.mrb[23].mxu1 }
 0x36f   : > { %v5811_v6 = vadd.f32 %v7331_v55, %v9459_v39  ;;  %v7333_v38 = vadd.f32 %v5660_v56, %v2909_v54  ;;  %7292 = vmatprep.mubr.msk.bf16.mxu0 %vm1728_vm7, %v5871_v50 }
 0x370   : > { %v5814_v61 = vadd.f32 %v7332_v14, %v9459_v39  ;;  %7293 = vmatmul.mubr.msk.bf16.vlgmr.msra.gmra.mrb[64].mxu0 %vm1728_vm7, %v5872_v62  ;;  %v5845_v12 = vmax.f32 %v5813_v5, 0.0 }
 0x371   : > { %v5812_v21 = vadd.f32 %v7333_v38, %v9459_v39  ;;  %v5843_v20 = vmax.f32 %v5811_v6, 0.0 }
 0x372   : > { %v5846_v35 = vmax.f32 %v5814_v61, 0.0 }
 0x373   : > { %v5844_v22 = vmax.f32 %v5812_v21, 0.0  ;;  %v7268_v34 = vpop.f32.mrb[24].mxu1 }
 0x374   : > { %v5874_v27 = vpack.c.bf16 %v5846_v35, %v5845_v12  ;;  %v7334_v18 = vadd.f32 %v7268_v34, %v7098_v31  ;;  %v5673_v8 = vpop.f32.mrb[25].mxu1 }
 0x375   : > { %v5873_v52 = vpack.c.bf16 %v5844_v22, %v5843_v20  ;;  %v7335_v57 = vadd.f32 %v5673_v8, %v2922_v24  ;;  %v7269_v26 = vpop.f32.mrb[26].mxu1 }
 0x376   : > { %v5817_v54 = vadd.f32 %v7334_v18, %v9459_v39  ;;  %v7336_v33 = vadd.f32 %v7269_v26, %v7099_v47  ;;  %v5676_v49 = vpop.f32.mrb[27].mxu1 }
 0x377   : > { %v5815_v1 = vadd.f32 %v7335_v57, %v9459_v39  ;;  %v7337_v9 = vadd.f32 %v5676_v49, %v2925_v15  ;;  %7296 = vmatprep.mubr.msk.bf16.mxu0 %vm1728_vm7, %v5873_v52 }
 0x378   : > { %v5818_v19 = vadd.f32 %v7336_v33, %v9459_v39  ;;  %7297 = vmatmul.mubr.msk.bf16.gmra.mrb[68].mxu0 %vm1728_vm7, %v5874_v27  ;;  %v5849_v31 = vmax.f32 %v5817_v54, 0.0 }
 0x379   : > { %v5816_v11 = vadd.f32 %v7337_v9, %v9459_v39  ;;  %v5847_v59 = vmax.f32 %v5815_v1, 0.0 }
 0x37a   : > { %v5850_v43 = vmax.f32 %v5818_v19, 0.0 }
 0x37b   : > { %v5848_v24 = vmax.f32 %v5816_v11, 0.0  ;;  %v7272_v37 = vpop.f32.mrb[28].mxu1 }
 0x37c   : > { %v5876_v7 = vpack.c.bf16 %v5850_v43, %v5849_v31  ;;  %v7338_v47 = vadd.f32 %v7272_v37, %v9448_v0  ;;  %v5689_v2 = vpop.f32.mrb[29].mxu1 }
 0x37d   : > { %v5875_v16 = vpack.c.bf16 %v5848_v24, %v5847_v59  ;;  %v7339_v15 = vadd.f32 %v5689_v2, %v9450_v51  ;;  %v7273_v28 = vpop.f32.mrb[30].mxu1 }
 0x37e   : > { %v5821_v46 = vadd.f32 %v7338_v47, %v9459_v39  ;;  %v7340_v62 = vadd.f32 %v7273_v28, %v9452_v41  ;;  %v5692_v42 = vpop.f32.mrb[31].mxu1 }
 0x37f   : > { %v5819_v29 = vadd.f32 %v7339_v15, %v9459_v39  ;;  %v7341_v50 = vadd.f32 %v5692_v42, %v9454_v36  ;;  %7300 = vmatprep.mubr.msk.bf16.mxu0 %vm1728_vm7, %v5875_v16 }
 0x380   : > { %v5822_v55 = vadd.f32 %v7340_v62, %v9459_v39  ;;  %7301 = vmatmul.mubr.msk.bf16.gmra.mrb[72].mxu0 %vm1728_vm7, %v5876_v7  ;;  %v5853_v63 = vmax.f32 %v5821_v46, 0.0 }
 0x381   : > { %v5820_v0 = vadd.f32 %v7341_v50, %v9459_v39  ;;  %v5851_v5 = vmax.f32 %v5819_v29, 0.0 }
 0x382   : > { %v5854_v51 = vmax.f32 %v5822_v55, 0.0 }
 0x383   : > { %v5852_v14 = vmax.f32 %v5820_v0, 0.0  ;;  %v7276_v56 = vpop.f32.mrb[0].mxu1 }
 0x384   : > { %v5878_v6 = vpack.c.bf16 %v5854_v51, %v5853_v63  ;;  %v7342_v41 = vadd.f32 %v7276_v56, %v9412_v53  ;;  %v5705_v38 = vpop.f32.mrb[1].mxu1 }
 0x385   : > { %v5877_v61 = vpack.c.bf16 %v5852_v14, %v5851_v5  ;;  %v7343_v36 = vadd.f32 %v5705_v38, %v9414_v17  ;;  %v7277_v21 = vpop.f32.mrb[2].mxu1 }
 0x386   : > { %v5825_v12 = vadd.f32 %v7342_v41, %v9459_v39  ;;  %v7344_v35 = vadd.f32 %v7277_v21, %v9416_v45  ;;  %v5708_v20 = vpop.f32.mrb[3].mxu1 }
 0x387   : > { %v5823_v22 = vadd.f32 %v7343_v36, %v9459_v39  ;;  %v7345_v34 = vadd.f32 %v5708_v20, %v9418_v44  ;;  %7304 = vmatprep.mubr.msk.bf16.mxu0 %vm1728_vm7, %v5877_v61 }
 0x388   : > { %v5826_v27 = vadd.f32 %v7344_v35, %v9459_v39  ;;  %7305 = vmatmul.mubr.msk.bf16.gmra.mrb[76].mxu0 %vm1728_vm7, %v5878_v6  ;;  %v5857_v18 = vmax.f32 %v5825_v12, 0.0 }
 0x389   : > { %v5824_v53 = vadd.f32 %v7345_v34, %v9459_v39  ;;  %v5855_v8 = vmax.f32 %v5823_v22, 0.0 }
 0x38a   : > { %v5858_v17 = vmax.f32 %v5826_v27, 0.0  ;;  %v7717_v27 = vld [vmem:[%s7799_s8 + $0x8] sm:$0xff]  }
 0x38b   : > { %v5856_v52 = vmax.f32 %v5824_v53, 0.0  ;;  %v7280_v57 = vpop.f32.mrb[4].mxu1  ;;  %v6109_v53 = vunpack.c.l.bf16 %v7717_v27 }
 0x38c   : > { %v5880_v26 = vpack.c.bf16 %v5858_v17, %v5857_v18  ;;  %v7346_v45 = vadd.f32 %v7280_v57, %v9424_v23  ;;  %v5721_v54 = vpop.f32.mrb[5].mxu1  ;;  %v7718_v18 = vld [vmem:[%s7799_s8] sm:$0xff]   ;;  %v6110_v57 = vunpack.c.h.bf16 %v7717_v27 }
 0x38d   : > { %v5879_v33 = vpack.c.bf16 %v5856_v52, %v5855_v8  ;;  %v7347_v44 = vadd.f32 %v5721_v54, %v9426_v3  ;;  %v7281_v49 = vpop.f32.mrb[6].mxu1  ;;  %v6107_v17 = vunpack.c.l.bf16 %v7718_v18 }
 0x38e   : > { %v5829_v1 = vadd.f32 %v7346_v45, %v9459_v39  ;;  %v7348_v9 = vadd.f32 %v7281_v49, %v9428_v4  ;;  %v5724_v19 = vpop.f32.mrb[7].mxu1 }
 0x38f   : > { %v5827_v11 = vadd.f32 %v7347_v44, %v9459_v39  ;;  %v7349_v31 = vadd.f32 %v5724_v19, %v9430_v60  ;;  %7308 = vmatprep.mubr.msk.bf16.mxu0 %vm1728_vm7, %v5879_v33 }
 0x390   : > { %v5830_v43 = vadd.f32 %v7348_v9, %v9459_v39  ;;  %7309 = vmatmul.mubr.msk.bf16.gmra.mrb[80].mxu0 %vm1728_vm7, %v5880_v26  ;;  %v5861_v59 = vmax.f32 %v5829_v1, 0.0  ;;  %v6108_v26 = vunpack.c.h.bf16 %v7718_v18  ;;  %v7723_v18 = vld [vmem:[%s7799_s8 + $0x38] sm:$0xff]  }
 0x391   : > { %v5828_v23 = vadd.f32 %v7349_v31, %v9459_v39  ;;  %v5859_v24 = vmax.f32 %v5827_v11, 0.0 }
 0x392   : > { %v5862_v3 = vmax.f32 %v5830_v43, 0.0 }
 0x393   : > { %v5860_v37 = vmax.f32 %v5828_v23, 0.0  ;;  %v7284_v7 = vpop.f32.mrb[8].mxu1 }
 0x394   : > { %v5882_v47 = vpack.c.bf16 %v5862_v3, %v5861_v59  ;;  %v7350_v4 = vadd.f32 %v7284_v7, %v9432_v40  ;;  %v5737_v2 = vpop.f32.mrb[9].mxu1  ;;  %v7719_v59 = vld [vmem:[%s7799_s8 + $0x18] sm:$0xff]   ;;  %v7720_v7 = vld [vmem:[%s7799_s8 + $0x10] sm:$0xff]  }
 0x395   : > { %v5881_v16 = vpack.c.bf16 %v5860_v37, %v5859_v24  ;;  %v7351_v60 = vadd.f32 %v5737_v2, %v9434_v32  ;;  %v7285_v15 = vpop.f32.mrb[10].mxu1  ;;  %v6113_v3 = vunpack.c.l.bf16 %v7719_v59 }
 0x396   : > { %v5833_v28 = vadd.f32 %v7350_v4, %v9459_v39  ;;  %v7352_v46 = vadd.f32 %v7285_v15, %v9436_v25  ;;  %v5740_v62 = vpop.f32.mrb[11].mxu1 }
 0x397   : > { %v5831_v42 = vadd.f32 %v7351_v60, %v9459_v39  ;;  %v7353_v29 = vadd.f32 %v5740_v62, %v9438_v48  ;;  %7312 = vmatprep.mubr.msk.bf16.mxu0 %vm1728_vm7, %v5881_v16  ;;  %v6114_v16 = vunpack.c.h.bf16 %v7719_v59 }
 0x398   : > { %v5834_v50 = vadd.f32 %v7352_v46, %v9459_v39  ;;  %7313 = vmatmul.mubr.msk.bf16.gmra.mrb[84].mxu0 %vm1728_vm7, %v5882_v47  ;;  %v5865_v55 = vmax.f32 %v5833_v28, 0.0  ;;  %v6111_v47 = vunpack.c.l.bf16 %v7720_v7  ;;  %v6112_v28 = vunpack.c.h.bf16 %v7720_v7 }
 0x399   : > { %v5832_v40 = vadd.f32 %v7353_v29, %v9459_v39  ;;  %v5863_v0 = vmax.f32 %v5831_v42, 0.0 }
 0x39a   : > { %v5866_v32 = vmax.f32 %v5834_v50, 0.0 }
 0x39b   : > { %v5864_v63 = vmax.f32 %v5832_v40, 0.0  ;;  %v7288_v51 = vpop.f32.mrb[12].mxu1 }
 0x39c   : > { %v5884_v5 = vpack.c.bf16 %v5866_v32, %v5865_v55  ;;  %v7354_v25 = vadd.f32 %v7288_v51, %v9440_v13  ;;  %v5753_v14 = vpop.f32.mrb[13].mxu1  ;;  %v7721_v51 = vld [vmem:[%s7799_s8 + $0x28] sm:$0xff]  }
 0x39d   : > { %v5883_v56 = vpack.c.bf16 %v5864_v63, %v5863_v0  ;;  %v7355_v48 = vadd.f32 %v5753_v14, %v9442_v30  ;;  %v7289_v6 = vpop.f32.mrb[14].mxu1 }
 0x39e   : > { %v5837_v41 = vadd.f32 %v7354_v25, %v9459_v39  ;;  %v7356_v38 = vadd.f32 %v7289_v6, %v9444_v10  ;;  %v5756_v61 = vpop.f32.mrb[15].mxu1 }
 0x39f   : > { %v5835_v36 = vadd.f32 %v7355_v48, %v9459_v39  ;;  %v7357_v21 = vadd.f32 %v5756_v61, %v9446_v58  ;;  %7316 = vmatprep.mubr.msk.bf16.mxu0 %vm1728_vm7, %v5883_v56  ;;  %v9532_v58 = vld [vmem:[%s9661_s6] ss:$0 sm:$0xff] }
 0x3a0   : > { %v5838_v13 = vadd.f32 %v7356_v38, %v9459_v39  ;;  %7317 = vmatmul.mubr.msk.bf16.gmra.mrb[88].mxu0 %vm1728_vm7, %v5884_v5  ;;  %v5869_v12 = vmax.f32 %v5837_v41, 0.0  ;;  %v6117_v5 = vunpack.c.l.bf16 %v7721_v51  ;;  %v7722_v56 = vld [vmem:[%s7799_s8 + $0x20] sm:$0xff]   ;;  %v6118_v38 = vunpack.c.h.bf16 %v7721_v51 }
 0x3a1   : > { %v5836_v30 = vadd.f32 %v7357_v21, %v9459_v39  ;;  %v5867_v20 = vmax.f32 %v5835_v36, 0.0  ;;  %v6115_v48 = vunpack.c.l.bf16 %v7722_v56  ;;  %v6116_v21 = vunpack.c.h.bf16 %v7722_v56 }
 0x3a2   : > { %v5870_v35 = vmax.f32 %v5838_v13, 0.0 }
 0x3a3   : > { %v5868_v10 = vmax.f32 %v5836_v30, 0.0 }
 0x3a4   : > { %v5886_v22 = vpack.c.bf16 %v5870_v35, %v5869_v12 }
 0x3a5   : > { %v5885_v34 = vpack.c.bf16 %v5868_v10, %v5867_v20 }
 0x3a7   : > { %7320 = vmatprep.mubr.msk.bf16.mxu0 %vm1728_vm7, %v5885_v34 }
 0x3a8   : > { %7321 = vmatmul.mubr.msk.bf16.gmra.mrb[92].mxu0 %vm1728_vm7, %v5886_v22 }
 0x443   : > { %v7294_v39 = vpop.f32.mrb[64].mxu0 }
 0x444   : > { %v5989_v8 = vadd.f32 %v7294_v39, %v9532_v58  ;;  %v5980_v52 = vpop.f32.mrb[65].mxu0 }
 0x445   : > { %v5981_v45 = vadd.f32 %v9532_v58, %v5980_v52  ;;  %v7295_v54 = vpop.f32.mrb[66].mxu0  ;;  %v7724_v52 = vld [vmem:[%s7799_s8 + $0x30] sm:$0xff]  }
 0x446   : > { %v6141_v33 = vadd.f32 %v6109_v53, %v5989_v8  ;;  %v5992_v44 = vadd.f32 %v7295_v54, %v9532_v58  ;;  %v5983_v49 = vpop.f32.mrb[67].mxu0  ;;  %v6122_v54 = vunpack.c.h.bf16 %v7723_v18 }
 0x447   : > { %v6139_v1 = vadd.f32 %v6107_v17, %v5981_v45  ;;  %v5984_v9 = vadd.f32 %v9532_v58, %v5983_v49  ;;  %v6121_v17 = vunpack.c.l.bf16 %v7723_v18  ;;  %v6120_v49 = vunpack.c.h.bf16 %v7724_v52 }
 0x448   : > { %v6173_v19 = vmax.f32 %v6141_v33, 0.0  ;;  %v6142_v11 = vadd.f32 %v6110_v57, %v5992_v44  ;;  %v6119_v57 = vunpack.c.l.bf16 %v7724_v52 }
 0x449   : > { %v6171_v31 = vmax.f32 %v6139_v1, 0.0  ;;  %v6140_v43 = vadd.f32 %v6108_v26, %v5984_v9 }
 0x44a   : > { %6205 = vst.msk [vmem:[%s9543_s26 + $0x10] sm:$0xff] %vm407_vm0, %v6173_v19  ;;  %v6174_v23 = vmax.f32 %v6142_v11, 0.0 }
 0x44b   : > { %6203 = vst.msk [vmem:[%s9543_s26] sm:$0xff] %vm407_vm0, %v6171_v31  ;;  %v6172_v24 = vmax.f32 %v6140_v43, 0.0  ;;  %v7298_v37 = vpop.f32.mrb[68].mxu0 }
 0x44c   : > { %6206 = vst.msk [vmem:[%s9543_s26 + $0x18] sm:$0xff] %vm407_vm0, %v6174_v23  ;;  %v6005_v4 = vadd.f32 %v7298_v37, %v9532_v58  ;;  %v5996_v2 = vpop.f32.mrb[69].mxu0  ;;  %v7725_v37 = vld [vmem:[%s7799_s8 + $0x48] sm:$0xff]  }
 0x44d   : > { %6204 = vst.msk [vmem:[%s9543_s26 + $0x8] sm:$0xff] %vm407_vm0, %v6172_v24  ;;  %v5997_v60 = vadd.f32 %v9532_v58, %v5996_v2  ;;  %v7299_v15 = vpop.f32.mrb[70].mxu0  ;;  %v6125_v7 = vunpack.c.l.bf16 %v7725_v37  ;;  %v7726_v2 = vld [vmem:[%s7799_s8 + $0x40] sm:$0xff]  }
 0x44e   : > { %v6145_v46 = vadd.f32 %v6113_v3, %v6005_v4  ;;  %v6008_v62 = vadd.f32 %v7299_v15, %v9532_v58  ;;  %v5999_v42 = vpop.f32.mrb[71].mxu0 }
 0x44f   : > { %v6143_v29 = vadd.f32 %v6111_v47, %v5997_v60  ;;  %v6000_v50 = vadd.f32 %v9532_v58, %v5999_v42  ;;  %v6124_v42 = vunpack.c.h.bf16 %v7726_v2 }
 0x450   : > { %v6177_v40 = vmax.f32 %v6145_v46, 0.0  ;;  %v6146_v55 = vadd.f32 %v6114_v16, %v6008_v62  ;;  %v6123_v16 = vunpack.c.l.bf16 %v7726_v2 }
 0x451   : > { %v6175_v32 = vmax.f32 %v6143_v29, 0.0  ;;  %v6144_v0 = vadd.f32 %v6112_v28, %v6000_v50  ;;  %v6126_v28 = vunpack.c.h.bf16 %v7725_v37 }
 0x452   : > { %6209 = vst.msk [vmem:[%s9543_s26 + $0x30] sm:$0xff] %vm407_vm0, %v6177_v40  ;;  %v6178_v63 = vmax.f32 %v6146_v55, 0.0 }
 0x453   : > { %6207 = vst.msk [vmem:[%s9543_s26 + $0x20] sm:$0xff] %vm407_vm0, %v6175_v32  ;;  %v6176_v25 = vmax.f32 %v6144_v0, 0.0  ;;  %v7302_v14 = vpop.f32.mrb[72].mxu0 }
 0x454   : > { %6210 = vst.msk [vmem:[%s9543_s26 + $0x38] sm:$0xff] %vm407_vm0, %v6178_v63  ;;  %v6021_v6 = vadd.f32 %v7302_v14, %v9532_v58  ;;  %v6012_v41 = vpop.f32.mrb[73].mxu0  ;;  %v7727_v14 = vld [vmem:[%s7799_s8 + $0x58] sm:$0xff]  }
 0x455   : > { %6208 = vst.msk [vmem:[%s9543_s26 + $0x28] sm:$0xff] %vm407_vm0, %v6176_v25  ;;  %v6013_v61 = vadd.f32 %v9532_v58, %v6012_v41  ;;  %v7303_v36 = vpop.f32.mrb[74].mxu0  ;;  %v6129_v56 = vunpack.c.l.bf16 %v7727_v14  ;;  %v7728_v41 = vld [vmem:[%s7799_s8 + $0x50] sm:$0xff]  }
 0x456   : > { %v6149_v13 = vadd.f32 %v6117_v5, %v6021_v6  ;;  %v6024_v30 = vadd.f32 %v7303_v36, %v9532_v58  ;;  %v6015_v12 = vpop.f32.mrb[75].mxu0 }
 0x457   : > { %v6147_v35 = vadd.f32 %v6115_v48, %v6013_v61  ;;  %v6016_v20 = vadd.f32 %v9532_v58, %v6015_v12  ;;  %v6128_v12 = vunpack.c.h.bf16 %v7728_v41 }
 0x458   : > { %v6181_v10 = vmax.f32 %v6149_v13, 0.0  ;;  %v6150_v22 = vadd.f32 %v6118_v38, %v6024_v30  ;;  %v6127_v38 = vunpack.c.l.bf16 %v7728_v41 }
 0x459   : > { %v6179_v34 = vmax.f32 %v6147_v35, 0.0  ;;  %v6148_v27 = vadd.f32 %v6116_v21, %v6016_v20  ;;  %v6130_v21 = vunpack.c.h.bf16 %v7727_v14 }
 0x45a   : > { %6213 = vst.msk [vmem:[%s9543_s26 + $0x50] sm:$0xff] %vm407_vm0, %v6181_v10  ;;  %v6182_v53 = vmax.f32 %v6150_v22, 0.0 }
 0x45b   : > { %6211 = vst.msk [vmem:[%s9543_s26 + $0x40] sm:$0xff] %vm407_vm0, %v6179_v34  ;;  %v6180_v39 = vmax.f32 %v6148_v27, 0.0  ;;  %v7306_v8 = vpop.f32.mrb[76].mxu0 }
 0x45c   : > { %6214 = vst.msk [vmem:[%s9543_s26 + $0x58] sm:$0xff] %vm407_vm0, %v6182_v53  ;;  %v6037_v26 = vadd.f32 %v7306_v8, %v9532_v58  ;;  %v6028_v45 = vpop.f32.mrb[77].mxu0  ;;  %v7729_v8 = vld [vmem:[%s7799_s8 + $0x68] sm:$0xff]  }
 0x45d   : > { %6212 = vst.msk [vmem:[%s9543_s26 + $0x48] sm:$0xff] %vm407_vm0, %v6180_v39  ;;  %v6029_v33 = vadd.f32 %v9532_v58, %v6028_v45  ;;  %v7307_v44 = vpop.f32.mrb[78].mxu0  ;;  %v6133_v52 = vunpack.c.l.bf16 %v7729_v8  ;;  %v7730_v45 = vld [vmem:[%s7799_s8 + $0x60] sm:$0xff]  }
 0x45e   : > { %v6153_v1 = vadd.f32 %v6121_v17, %v6037_v26  ;;  %v6040_v9 = vadd.f32 %v7307_v44, %v9532_v58  ;;  %v6031_v19 = vpop.f32.mrb[79].mxu0 }
 0x45f   : > { %v6151_v11 = vadd.f32 %v6119_v57, %v6029_v33  ;;  %v6032_v31 = vadd.f32 %v9532_v58, %v6031_v19  ;;  %v6132_v19 = vunpack.c.h.bf16 %v7730_v45 }
 0x460   : > { %v6185_v43 = vmax.f32 %v6153_v1, 0.0  ;;  %v6154_v23 = vadd.f32 %v6122_v54, %v6040_v9  ;;  %v6131_v54 = vunpack.c.l.bf16 %v7730_v45 }
 0x461   : > { %v6183_v59 = vmax.f32 %v6151_v11, 0.0  ;;  %v6152_v3 = vadd.f32 %v6120_v49, %v6032_v31  ;;  %v6134_v49 = vunpack.c.h.bf16 %v7729_v8 }
 0x462   : > { %6217 = vst.msk [vmem:[%s9543_s26 + $0x70] sm:$0xff] %vm407_vm0, %v6185_v43  ;;  %v6186_v24 = vmax.f32 %v6154_v23, 0.0 }
 0x463   : > { %6215 = vst.msk [vmem:[%s9543_s26 + $0x60] sm:$0xff] %vm407_vm0, %v6183_v59  ;;  %v6184_v47 = vmax.f32 %v6152_v3, 0.0  ;;  %v7310_v4 = vpop.f32.mrb[80].mxu0 }
 0x464   : > { %6218 = vst.msk [vmem:[%s9543_s26 + $0x78] sm:$0xff] %vm407_vm0, %v6186_v24  ;;  %v6053_v60 = vadd.f32 %v7310_v4, %v9532_v58  ;;  %v6044_v15 = vpop.f32.mrb[81].mxu0  ;;  %v7731_v4 = vld [vmem:[%s7799_s8 + $0x78] sm:$0xff]  }
 0x465   : > { %6216 = vst.msk [vmem:[%s9543_s26 + $0x68] sm:$0xff] %vm407_vm0, %v6184_v47  ;;  %v6045_v46 = vadd.f32 %v9532_v58, %v6044_v15  ;;  %v7311_v62 = vpop.f32.mrb[82].mxu0  ;;  %v6137_v2 = vunpack.c.l.bf16 %v7731_v4  ;;  %v7732_v15 = vld [vmem:[%s7799_s8 + $0x70] sm:$0xff]  }
 0x466   : > { %v6157_v29 = vadd.f32 %v6125_v7, %v6053_v60  ;;  %v6056_v50 = vadd.f32 %v7311_v62, %v9532_v58  ;;  %v6047_v40 = vpop.f32.mrb[83].mxu0 }
 0x467   : > { %v6155_v55 = vadd.f32 %v6123_v16, %v6045_v46  ;;  %v6048_v32 = vadd.f32 %v9532_v58, %v6047_v40  ;;  %v6136_v40 = vunpack.c.h.bf16 %v7732_v15 }
 0x468   : > { %v6189_v0 = vmax.f32 %v6157_v29, 0.0  ;;  %v6158_v63 = vadd.f32 %v6126_v28, %v6056_v50  ;;  %v6135_v28 = vunpack.c.l.bf16 %v7732_v15 }
 0x469   : > { %v6187_v51 = vmax.f32 %v6155_v55, 0.0  ;;  %v6156_v5 = vadd.f32 %v6124_v42, %v6048_v32  ;;  %v6138_v42 = vunpack.c.h.bf16 %v7731_v4 }
 0x46a   : > { %6221 = vst.msk [vmem:[%s9543_s26 + $0x90] sm:$0xff] %vm407_vm0, %v6189_v0  ;;  %v6190_v25 = vmax.f32 %v6158_v63, 0.0 }
 0x46b   : > { %6219 = vst.msk [vmem:[%s9543_s26 + $0x80] sm:$0xff] %vm407_vm0, %v6187_v51  ;;  %v6188_v48 = vmax.f32 %v6156_v5, 0.0  ;;  %v7314_v6 = vpop.f32.mrb[84].mxu0 }
 0x46c   : > { %6222 = vst.msk [vmem:[%s9543_s26 + $0x98] sm:$0xff] %vm407_vm0, %v6190_v25  ;;  %v6069_v61 = vadd.f32 %v7314_v6, %v9532_v58  ;;  %v6060_v36 = vpop.f32.mrb[85].mxu0 }
 0x46d   : > { %6220 = vst.msk [vmem:[%s9543_s26 + $0x88] sm:$0xff] %vm407_vm0, %v6188_v48  ;;  %v6061_v13 = vadd.f32 %v9532_v58, %v6060_v36  ;;  %v7315_v30 = vpop.f32.mrb[86].mxu0 }
 0x46e   : > { %v6161_v35 = vadd.f32 %v6129_v56, %v6069_v61  ;;  %v6072_v20 = vadd.f32 %v7315_v30, %v9532_v58  ;;  %v6063_v10 = vpop.f32.mrb[87].mxu0 }
 0x46f   : > { %v6159_v22 = vadd.f32 %v6127_v38, %v6061_v13  ;;  %v6064_v34 = vadd.f32 %v9532_v58, %v6063_v10 }
 0x470   : > { %v6193_v27 = vmax.f32 %v6161_v35, 0.0  ;;  %v6162_v53 = vadd.f32 %v6130_v21, %v6072_v20 }
 0x471   : > { %v6191_v18 = vmax.f32 %v6159_v22, 0.0  ;;  %v6160_v17 = vadd.f32 %v6128_v12, %v6064_v34 }
 0x472   : > { %6225 = vst.msk [vmem:[%s9543_s26 + $0xb0] sm:$0xff] %vm407_vm0, %v6193_v27  ;;  %v6194_v39 = vmax.f32 %v6162_v53, 0.0 }
 0x473   : > { %6223 = vst.msk [vmem:[%s9543_s26 + $0xa0] sm:$0xff] %vm407_vm0, %v6191_v18  ;;  %v6192_v57 = vmax.f32 %v6160_v17, 0.0  ;;  %v7318_v26 = vpop.f32.mrb[88].mxu0 }
 0x474   : > { %6226 = vst.msk [vmem:[%s9543_s26 + $0xb8] sm:$0xff] %vm407_vm0, %v6194_v39  ;;  %v6085_v33 = vadd.f32 %v7318_v26, %v9532_v58  ;;  %v6076_v44 = vpop.f32.mrb[89].mxu0 }
 0x475   : > { %6224 = vst.msk [vmem:[%s9543_s26 + $0xa8] sm:$0xff] %vm407_vm0, %v6192_v57  ;;  %v6077_v1 = vadd.f32 %v9532_v58, %v6076_v44  ;;  %v7319_v9 = vpop.f32.mrb[90].mxu0 }
 0x476   : > { %v6165_v11 = vadd.f32 %v6133_v52, %v6085_v33  ;;  %v6088_v31 = vadd.f32 %v7319_v9, %v9532_v58  ;;  %v6079_v43 = vpop.f32.mrb[91].mxu0 }
 0x477   : > { %v6163_v23 = vadd.f32 %v6131_v54, %v6077_v1  ;;  %v6080_v59 = vadd.f32 %v9532_v58, %v6079_v43 }
 0x478   : > { %v6197_v3 = vmax.f32 %v6165_v11, 0.0  ;;  %v6166_v24 = vadd.f32 %v6134_v49, %v6088_v31 }
 0x479   : > { %v6195_v37 = vmax.f32 %v6163_v23, 0.0  ;;  %v6164_v7 = vadd.f32 %v6132_v19, %v6080_v59 }
 0x47a   : > { %6229 = vst.msk [vmem:[%s9543_s26 + $0xd0] sm:$0xff] %vm407_vm0, %v6197_v3  ;;  %v6198_v47 = vmax.f32 %v6166_v24, 0.0 }
 0x47b   : > { %6227 = vst.msk [vmem:[%s9543_s26 + $0xc0] sm:$0xff] %vm407_vm0, %v6195_v37  ;;  %v6196_v16 = vmax.f32 %v6164_v7, 0.0  ;;  %v7322_v60 = vpop.f32.mrb[92].mxu0 }
 0x47c   : > { %6230 = vst.msk [vmem:[%s9543_s26 + $0xd8] sm:$0xff] %vm407_vm0, %v6198_v47  ;;  %v6101_v46 = vadd.f32 %v7322_v60, %v9532_v58  ;;  %v6092_v62 = vpop.f32.mrb[93].mxu0 }
 0x47d   : > { %6228 = vst.msk [vmem:[%s9543_s26 + $0xc8] sm:$0xff] %vm407_vm0, %v6196_v16  ;;  %v6093_v29 = vadd.f32 %v9532_v58, %v6092_v62  ;;  %v7323_v50 = vpop.f32.mrb[94].mxu0 }
 0x47e   : > { %v6169_v55 = vadd.f32 %v6137_v2, %v6101_v46  ;;  %v6104_v32 = vadd.f32 %v7323_v50, %v9532_v58  ;;  %v6095_v0 = vpop.f32.mrb[95].mxu0 }
 0x47f   : > { %v6167_v63 = vadd.f32 %v6135_v28, %v6093_v29  ;;  %v6096_v51 = vadd.f32 %v9532_v58, %v6095_v0 }
 0x480   : > { %v6201_v5 = vmax.f32 %v6169_v55, 0.0  ;;  %v6170_v25 = vadd.f32 %v6138_v42, %v6104_v32 }
 0x481   : > { %v6199_v14 = vmax.f32 %v6167_v63, 0.0  ;;  %v6168_v56 = vadd.f32 %v6136_v40, %v6096_v51 }
 0x482   : > { %6233 = vst.msk [vmem:[%s9543_s26 + $0xf0] sm:$0xff] %vm407_vm0, %v6201_v5  ;;  %v6202_v48 = vmax.f32 %v6170_v25, 0.0 }
 0x483   : > { %6231 = vst.msk [vmem:[%s9543_s26 + $0xe0] sm:$0xff] %vm407_vm0, %v6199_v14  ;;  %v6200_v6 = vmax.f32 %v6168_v56, 0.0 }
 0x484   : > { %6234 = vst.msk [vmem:[%s9543_s26 + $0xf8] sm:$0xff] %vm407_vm0, %v6202_v48 }
 0x485   : > { %6232 = vst.msk [vmem:[%s9543_s26 + $0xe8] sm:$0xff] %vm407_vm0, %v6200_v6 }
 0x486 PF: > { %s17_s24 = sadd.s32 1, %s7739_s24  }
 0x487   : > { %p14_p4 = scmp.ge.s32.totalorder %s17_s24, 4  }
 0x489   :  { %16 = sbr.rel (!%p14_p4) target bundleno = 1 (0x1), region = 88 }

</bundles_post_ra>
